<compile_context>
chip_gen: v5e
topology: v5e:2x2
jax: 0.10.0
libtpu: 0.0.40
codegen_flags: <defaults>
</compile_context>

<pallas_src>
import functools

import jax
import jax.numpy as jnp
from jax.experimental import pallas as pl
from jax.experimental.pallas import tpu as pltpu


def _round_up(x, m):
    return ((x + m - 1) // m) * m


# ---------------------------------------------------------------------------
# Pallas kernel
# ---------------------------------------------------------------------------
def make_gcngru_kernel(B, V, F, H, L, OUT, BW):
    """Fused GCN + GRU + FC kernel for fixed (static) sizes.

    BW = lane width of one fused gate block (= round_up(3H, 128))."""

    def kernel(x_ref, adjn_ref, gcnw_ref, gcnb_ref, perm_ref, gin0_ref,
               wstep_ref, h0_ref, f1w_ref, f1b_ref, f2w_ref, f2b_ref,
               out_ref):
        f32 = jnp.float32
        adjn = adjn_ref[...]                       # (V, V) normalized adjacency
        x_v = x_ref[...]                           # (V, B*F): x[b,v,f] at [v, b*F+f]
        w1 = gcnw_ref[:, :F]
        w2 = gcnw_ref[:, F:]
        b1 = gcnb_ref[:, :F]
        b2 = gcnb_ref[:, F:]

        def vcols_to_brows(m):                     # (V, B*F) -> (B*V, F)
            return jnp.concatenate(
                [m[:, b * F:(b + 1) * F] for b in range(B)], axis=0)

        def brows_to_vcols(m):                     # (B*V, F) -> (V, B*F)
            return jnp.concatenate(
                [m[b * V:(b + 1) * V, :] for b in range(B)], axis=1)

        # ---------------- GCNCov block 1: ReLU(Linear(graphcov(X))) ----------
        # Shared (V,V) adjacency, batch along lanes -> ONE dense matmul.
        g1 = jnp.dot(adjn, x_v, preferred_element_type=f32)         # (V, B*F)
        # TODO(synk): nn.Dropout(p=0.2) is identity here (inference/eval mode).
        y1 = jnp.maximum(
            jnp.dot(vcols_to_brows(g1), w1, preferred_element_type=f32) + b1,
            0.0)                                                     # (B*V, F)

        # ---------------- GCNCov block 2 --------------------------------------
        g2 = jnp.dot(adjn, brows_to_vcols(y1), preferred_element_type=f32)
        y2 = jnp.maximum(
            jnp.dot(vcols_to_brows(g2), w2, preferred_element_type=f32) + b2,
            0.0)                                                     # (B*V, F)

        # ---------------- time-major sequence + hoisted layer-0 input gates --
        # y_bm rows are batch-major (b, t); `perm` interleaves them to (t, b)
        # so the serial loop only takes contiguous row slices.
        y_bm = jnp.concatenate(
            [jnp.transpose(y2[b * V:(b + 1) * V, :]) for b in range(B)],
            axis=0)                                                  # (B*F, V)
        y_seq = jnp.dot(perm_ref[...], y_bm, preferred_element_type=f32)  # (F*B, V)
        gx0 = (jnp.dot(y_seq, gin0_ref[:V, :], preferred_element_type=f32)
               + gin0_ref[V:V + 1, :])                               # (F*B, BW)

        # ---------------- multi-layer GRU, wavefront over (layer, time) ------
        # At wavefront step s, layer l processes timestep t = s - l; all
        # hidden-hidden and (l>=1) input-hidden projections + biases are fused
        # into ONE matmul against `wstep` (ones column carries the biases).
        hs = [h0_ref[l * B:(l + 1) * B, :] for l in range(L)]        # each (B, H)
        ones_col = jnp.ones((B, 1), f32)
        # Fully unrolled: F + L - 1 steps (good for LLO scheduling at F=16).
        # TODO(synk): switch to a chunked lax.fori_loop if F grows well past ~64.
        for s in range(F + L - 1):
            h_cat = jnp.concatenate(hs + [ones_col], axis=1)         # (B, L*H+1)
            g = jnp.dot(h_cat, wstep_ref[...],
                        preferred_element_type=f32)                  # (B, (2L-1)*BW)
            new_hs = list(hs)
            for l in range(L):
                t = s - l
                if t < 0 or t >= F:
                    continue
                gh = g[:, l * BW:l * BW + 3 * H]                     # incl. b_hn
                if l == 0:
                    gx = gx0[t * B:(t + 1) * B, :3 * H]              # contiguous slice
                else:
                    base = (L + l - 1) * BW
                    gx = g[:, base:base + 3 * H]                     # incl. biases
                rz = jax.nn.sigmoid(gx[:, :2 * H] + gh[:, :2 * H])
                r = rz[:, :H]
                z = rz[:, H:2 * H]
                n = jnp.tanh(gx[:, 2 * H:3 * H] + r * gh[:, 2 * H:3 * H])
                new_hs[l] = (1.0 - z) * n + z * hs[l]
            hs = new_hs
        h_last = hs[L - 1]                                           # (B, H)

        # ---------------- fc head: Linear(H,32) -> ReLU -> Linear(32,OUT) ----
        z1 = jnp.maximum(
            jnp.dot(h_last, f1w_ref[...], preferred_element_type=f32)
            + f1b_ref[...], 0.0)
        out = jnp.dot(z1, f2w_ref[...], preferred_element_type=f32) + f2b_ref[...]
        out_ref[...] = out.astype(out_ref.dtype)

    return kernel


# ---------------------------------------------------------------------------
# Wrapper: normalization + weight packing (jitted together with pallas_call)
# ---------------------------------------------------------------------------
def _pack_gru(gru_params, B, V, F, H, L, BW):
    f32 = jnp.float32

    def layer(l):
        return gru_params[12 * l:12 * (l + 1)]

    # Layer-0 input projection (hoisted over the whole sequence in the kernel):
    # fused [r|z|n] weights, input biases folded with b_hr/b_hz, padded to BW.
    (w_ir0, w_iz0, w_in0, _, _, _,
     b_ir0, b_iz0, b_in0, b_hr0, b_hz0, _) = layer(0)
    wi0 = jnp.concatenate([w_ir0, w_iz0, w_in0], axis=1)             # (V, 3H)
    bi0 = jnp.concatenate([b_ir0 + b_hr0, b_iz0 + b_hz0, b_in0], axis=1)
    pad = BW - 3 * H
    wi0 = jnp.pad(wi0, ((0, 0), (0, pad)))
    bi0 = jnp.pad(bi0, ((0, 0), (0, pad)))
    gin0 = jnp.concatenate([wi0, bi0], axis=0)                       # (V+1, BW)

    # Fused per-wavefront-step weight slab.  Column blocks:
    #   [gh_0 | gh_1 | ... | gh_{L-1} | gx_1 | ... | gx_{L-1}]
    # Row blocks: h_0, h_1, ..., h_{L-1}, then a ones row carrying the biases
    # (b_hn_l goes into the n-lanes of its gh_l block; layer>=1 input biases
    # go into its gx_l block), so the kernel does zero per-step bias adds.
    K = L * H + 1
    wstep = jnp.zeros((K, (2 * L - 1) * BW), f32)
    for l in range(L):
        (w_ir, w_iz, w_in, w_hr, w_hz, w_hn,
         b_ir, b_iz, b_in, b_hr, b_hz, b_hn) = layer(l)
        wh = jnp.concatenate([w_hr, w_hz, w_hn], axis=1)             # (H, 3H)
        c0 = l * BW
        wstep = wstep.at[l * H:(l + 1) * H, c0:c0 + 3 * H].set(wh)
        wstep = wstep.at[K - 1, c0 + 2 * H:c0 + 3 * H].set(b_hn[0])
        if l >= 1:
            wi = jnp.concatenate([w_ir, w_iz, w_in], axis=1)         # (H, 3H)
            bi = jnp.concatenate([b_ir + b_hr, b_iz + b_hz, b_in], axis=1)
            c1 = (L + l - 1) * BW
            wstep = wstep.at[(l - 1) * H:l * H, c1:c1 + 3 * H].set(wi)
            wstep = wstep.at[K - 1, c1:c1 + 3 * H].set(bi[0])
    return gin0, wstep


def gcngru_pallas(x, adj, params, h0, *, num_layers, hidden, out_features):
    B, V, F = x.shape
    H, L, OUT = hidden, num_layers, out_features
    BW = _round_up(3 * H, 128)                       # fused gate block, lane-aligned

    # graphcov normalization D^{-1/2} A D^{-1/2} (same expression as reference)
    deg = adj.sum(axis=1)
    d_inv_sqrt = jnp.where(deg > 0, deg ** -0.5, 0.0)
    adjn = adj * d_inv_sqrt[:, None] * d_inv_sqrt[None, :]

    # batch along lanes of the graphcov matmuls: x_v[v, b*F+f] = x[b, v, f]
    x_v = jnp.transpose(x, (1, 0, 2)).reshape(V, B * F)

    g1w, g1b, g2w, g2b = params["gcn"]
    gcn_w = jnp.concatenate([g1w, g2w], axis=1)      # (F, 2F)   packed slab
    gcn_b = jnp.concatenate([g1b, g2b], axis=1)      # (1, 2F)

    # batch-major (b, t) rows -> time-major (t, b) rows interleave (0/1 matrix)
    rows = jnp.arange(F * B)
    cols = (rows % B) * F + rows // B
    perm = jnp.zeros((F * B, B * F), jnp.float32).at[rows, cols].set(1.0)

    gin0, wstep = _pack_gru(params["gru"], B, V, F, H, L, BW)
    h0_2d = h0.reshape(L * B, H)

    flat_inputs = [x_v, adjn, gcn_w, gcn_b, perm, gin0, wstep, h0_2d] \
        + list(params["fc"])

    kernel = make_gcngru_kernel(B, V, F, H, L, OUT, BW)

    return pl.pallas_call(
        kernel,
        out_shape=jax.ShapeDtypeStruct((B, OUT), jnp.float32),
        # Single invocation, no grid: avoids per-grid-step pipeline overhead
        # and double-buffering of ~a dozen tiny operands.  Everything lives in
        # VMEM for the whole call (total footprint is a few hundred KB).
        in_specs=[pl.BlockSpec(memory_space=pltpu.MemorySpace.VMEM)
                  for _ in flat_inputs],
        out_specs=pl.BlockSpec(memory_space=pltpu.MemorySpace.VMEM),
    )(*flat_inputs)


# ---------------------------------------------------------------------------
# Pure-JAX reference (same math, unpacked params) used to validate the kernel
# ---------------------------------------------------------------------------
def gcngru_reference(x, adj, params, h0, *, num_layers, hidden, out_features):
    deg = adj.sum(axis=1)
    dis = jnp.where(deg > 0, deg ** -0.5, 0.0)
    adjn = adj * dis[:, None] * dis[None, :]

    g1wt, g1b, g2wt, g2b = params["gcn"]
    y = x
    for wt, b in ((g1wt, g1b), (g2wt, g2b)):
        g = jnp.einsum("uv,bvf->buf", adjn, y)
        y = jax.nn.relu(jnp.einsum("bvf,fo->bvo", g, wt) + b)

    layer_in = jnp.transpose(y, (0, 2, 1))           # (B, T=F, V)
    for l in range(num_layers):
        (w_ir, w_iz, w_in, w_hr, w_hz, w_hn,
         b_ir, b_iz, b_in, b_hr, b_hz, b_hn) = params["gru"][12 * l:12 * (l + 1)]
        h = h0[l]
        outs = []
        for t in range(layer_in.shape[1]):
            xt = layer_in[:, t, :]
            r = jax.nn.sigmoid(xt @ w_ir + b_ir + h @ w_hr + b_hr)
            z = jax.nn.sigmoid(xt @ w_iz + b_iz + h @ w_hz + b_hz)
            n = jnp.tanh(xt @ w_in + b_in + r * (h @ w_hn + b_hn))
            h = (1.0 - z) * n + z * h
            outs.append(h)
        layer_in = jnp.stack(outs, axis=1)
    h_last = layer_in[:, -1, :]

    f1wt, f1b, f2wt, f2b = params["fc"]
    return jax.nn.relu(h_last @ f1wt + f1b) @ f2wt + f2b


# ---------------------------------------------------------------------------
# Deterministic parameter initialization (shapes as in the module __init__)
# ---------------------------------------------------------------------------
def init_params(key, in_features, varible_num, hidden, out_features, num_layers):
    F, V, H, OUT, L = in_features, varible_num, hidden, out_features, num_layers
    keys = iter(jax.random.split(key, 128))

    def w(shape, fan_in):
        return (jax.random.normal(next(keys), shape, jnp.float32)
                / jnp.sqrt(jnp.float32(fan_in)))

    # GCN linears (stored transposed: in x out), biases as (1, out)
    gcn = [w((F, F), F), w((1, F), F), w((F, F), F), w((1, F), F)]

    gru = []
    for l in range(L):
        in_l = V if l == 0 else H
        gru += [w((in_l, H), in_l), w((in_l, H), in_l), w((in_l, H), in_l)]   # W_i{r,z,n}
        gru += [w((H, H), H), w((H, H), H), w((H, H), H)]                     # W_h{r,z,n}
        gru += [w((1, H), H) for _ in range(6)]      # b_ir, b_iz, b_in, b_hr, b_hz, b_hn

    fc = [w((H, 32), H), w((1, 32), H), w((32, OUT), 32), w((1, OUT), 32)]

    return {"gcn": gcn, "gru": gru, "fc": fc}


# ---------------------------------------------------------------------------
if __name__ == "__main__":
    B = 2            # batch
    V = 4            # varible_num (graph nodes / GRU input size)
    F = 16           # in_features (GCN feature dim / GRU sequence length)
    H = 32           # hidden_features
    L = 2            # num_layers
    OUT = 8          # out_features

    key = jax.random.PRNGKey(0)
    k_x, k_p = jax.random.split(key)

    x = jax.random.normal(k_x, (B, V, F), dtype=jnp.float32)

    # deterministic symmetric adjacency: ring graph + self loops
    eye = jnp.eye(V, dtype=jnp.float32)
    adj = eye + jnp.roll(eye, 1, axis=1) + jnp.roll(eye, -1, axis=1)
    adj = jnp.clip(adj, 0.0, 1.0)

    params = init_params(k_p, F, V, H, OUT, L)
    h0 = jnp.zeros((L, B, H), dtype=jnp.float32)     # init_states

    run = jax.jit(functools.partial(gcngru_pallas, num_layers=L, hidden=H,
                                    out_features=OUT))
    out = jax.block_until_ready(run(x, adj, params, h0))

    ref = gcngru_reference(x, adj, params, h0,
                           num_layers=L, hidden=H, out_features=OUT)

    assert out.shape == (B, OUT), out.shape
    assert jnp.allclose(out, ref, atol=2e-3, rtol=2e-3), (
        float(jnp.max(jnp.abs(out - ref))))

    print("KERNEL_OK")
</pallas_src>

<mosaic_0001>
module attributes {stable_mosaic.version = 11 : i64} {
  func.func @kernel(%arg0: memref<4x32xf32, #tpu.memory_space<vmem>>, %arg1: memref<4x4xf32, #tpu.memory_space<vmem>>, %arg2: memref<16x32xf32, #tpu.memory_space<vmem>>, %arg3: memref<1x32xf32, #tpu.memory_space<vmem>>, %arg4: memref<32x32xf32, #tpu.memory_space<vmem>>, %arg5: memref<5x128xf32, #tpu.memory_space<vmem>>, %arg6: memref<65x384xf32, #tpu.memory_space<vmem>>, %arg7: memref<4x32xf32, #tpu.memory_space<vmem>>, %arg8: memref<32x32xf32, #tpu.memory_space<vmem>>, %arg9: memref<1x32xf32, #tpu.memory_space<vmem>>, %arg10: memref<32x8xf32, #tpu.memory_space<vmem>>, %arg11: memref<1x8xf32, #tpu.memory_space<vmem>>, %arg12: memref<2x8xf32, #tpu.memory_space<vmem>>) attributes {dimension_semantics = [], scalar_prefetch = 0 : i64, scratch_operands = 0 : i64, tpu.core_type = #tpu.core_type<tc>} {
    %c0 = arith.constant 0 : index
    %c0_0 = arith.constant 0 : index
    %0 = vector.load %arg1[%c0, %c0_0] : memref<4x4xf32, #tpu.memory_space<vmem>>, vector<4x4xf32>
    %c0_1 = arith.constant 0 : index
    %c0_2 = arith.constant 0 : index
    %1 = vector.load %arg0[%c0_1, %c0_2] : memref<4x32xf32, #tpu.memory_space<vmem>>, vector<4x32xf32>
    %c0_3 = arith.constant 0 : index
    %c0_4 = arith.constant 0 : index
    %2 = vector.load %arg2[%c0_3, %c0_4] : memref<16x32xf32, #tpu.memory_space<vmem>>, vector<16x16xf32>
    %c0_5 = arith.constant 0 : index
    %c16 = arith.constant 16 : index
    %3 = vector.load %arg2[%c0_5, %c16] : memref<16x32xf32, #tpu.memory_space<vmem>>, vector<16x16xf32>
    %c0_6 = arith.constant 0 : index
    %c0_7 = arith.constant 0 : index
    %4 = vector.load %arg3[%c0_6, %c0_7] : memref<1x32xf32, #tpu.memory_space<vmem>>, vector<1x16xf32>
    %c0_8 = arith.constant 0 : index
    %c16_9 = arith.constant 16 : index
    %5 = vector.load %arg3[%c0_8, %c16_9] : memref<1x32xf32, #tpu.memory_space<vmem>>, vector<1x16xf32>
    %cst = arith.constant dense<0.000000e+00> : vector<4x32xf32>
    %6 = tpu.matmul %0, %1, %cst {dimension_numbers = #tpu.dot_dimension_numbers<[1], [0], [0], [1], [0, 0, 1, 1], [], []>} : vector<4x4xf32>, vector<4x32xf32>, vector<4x32xf32> -> vector<4x32xf32>
    %7 = vector.extract_strided_slice %6 {offsets = [0, 0], sizes = [4, 16], strides = [1, 1]} : vector<4x32xf32> to vector<4x16xf32>
    %8 = vector.extract_strided_slice %6 {offsets = [0, 16], sizes = [4, 16], strides = [1, 1]} : vector<4x32xf32> to vector<4x16xf32>
    %9 = tpu.concatenate %7, %8 in 0 : vector<4x16xf32>, vector<4x16xf32> -> vector<8x16xf32>
    %cst_10 = arith.constant dense<0.000000e+00> : vector<8x16xf32>
    %10 = tpu.matmul %9, %2, %cst_10 {dimension_numbers = #tpu.dot_dimension_numbers<[1], [0], [0], [1], [0, 0, 1, 1], [], []>} : vector<8x16xf32>, vector<16x16xf32>, vector<8x16xf32> -> vector<8x16xf32>
    %11 = vector.broadcast %4 : vector<1x16xf32> to vector<8x16xf32>
    %12 = arith.addf %10, %11 : vector<8x16xf32>
    %cst_11 = arith.constant 0.000000e+00 : f32
    %13 = vector.broadcast %cst_11 : f32 to vector<8x16xf32>
    %14 = arith.maximumf %12, %13 : vector<8x16xf32>
    %15 = vector.extract_strided_slice %14 {offsets = [0, 0], sizes = [4, 16], strides = [1, 1]} : vector<8x16xf32> to vector<4x16xf32>
    %16 = vector.extract_strided_slice %14 {offsets = [4, 0], sizes = [4, 16], strides = [1, 1]} : vector<8x16xf32> to vector<4x16xf32>
    %17 = tpu.concatenate %15, %16 in 1 : vector<4x16xf32>, vector<4x16xf32> -> vector<4x32xf32>
    %cst_12 = arith.constant dense<0.000000e+00> : vector<4x32xf32>
    %18 = tpu.matmul %0, %17, %cst_12 {dimension_numbers = #tpu.dot_dimension_numbers<[1], [0], [0], [1], [0, 0, 1, 1], [], []>} : vector<4x4xf32>, vector<4x32xf32>, vector<4x32xf32> -> vector<4x32xf32>
    %19 = vector.extract_strided_slice %18 {offsets = [0, 0], sizes = [4, 16], strides = [1, 1]} : vector<4x32xf32> to vector<4x16xf32>
    %20 = vector.extract_strided_slice %18 {offsets = [0, 16], sizes = [4, 16], strides = [1, 1]} : vector<4x32xf32> to vector<4x16xf32>
    %21 = tpu.concatenate %19, %20 in 0 : vector<4x16xf32>, vector<4x16xf32> -> vector<8x16xf32>
    %cst_13 = arith.constant dense<0.000000e+00> : vector<8x16xf32>
    %22 = tpu.matmul %21, %3, %cst_13 {dimension_numbers = #tpu.dot_dimension_numbers<[1], [0], [0], [1], [0, 0, 1, 1], [], []>} : vector<8x16xf32>, vector<16x16xf32>, vector<8x16xf32> -> vector<8x16xf32>
    %23 = vector.broadcast %5 : vector<1x16xf32> to vector<8x16xf32>
    %24 = arith.addf %22, %23 : vector<8x16xf32>
    %cst_14 = arith.constant 0.000000e+00 : f32
    %25 = vector.broadcast %cst_14 : f32 to vector<8x16xf32>
    %26 = arith.maximumf %24, %25 : vector<8x16xf32>
    %27 = vector.extract_strided_slice %26 {offsets = [0, 0], sizes = [4, 16], strides = [1, 1]} : vector<8x16xf32> to vector<4x16xf32>
    %28 = tpu.transpose %27, [1, 0] : vector<4x16xf32> -> vector<16x4xf32>
    %29 = vector.extract_strided_slice %26 {offsets = [4, 0], sizes = [4, 16], strides = [1, 1]} : vector<8x16xf32> to vector<4x16xf32>
    %30 = tpu.transpose %29, [1, 0] : vector<4x16xf32> -> vector<16x4xf32>
    %31 = tpu.concatenate %28, %30 in 0 : vector<16x4xf32>, vector<16x4xf32> -> vector<32x4xf32>
    %c0_15 = arith.constant 0 : index
    %c0_16 = arith.constant 0 : index
    %32 = vector.load %arg4[%c0_15, %c0_16] : memref<32x32xf32, #tpu.memory_space<vmem>>, vector<32x32xf32>
    %cst_17 = arith.constant dense<0.000000e+00> : vector<32x4xf32>
    %33 = tpu.matmul %32, %31, %cst_17 {dimension_numbers = #tpu.dot_dimension_numbers<[1], [0], [0], [1], [0, 0, 1, 1], [], []>} : vector<32x32xf32>, vector<32x4xf32>, vector<32x4xf32> -> vector<32x4xf32>
    %c0_18 = arith.constant 0 : index
    %c0_19 = arith.constant 0 : index
    %34 = vector.load %arg5[%c0_18, %c0_19] : memref<5x128xf32, #tpu.memory_space<vmem>>, vector<4x128xf32>
    %cst_20 = arith.constant dense<0.000000e+00> : vector<32x128xf32>
    %35 = tpu.matmul %33, %34, %cst_20 {dimension_numbers = #tpu.dot_dimension_numbers<[1], [0], [0], [1], [0, 0, 1, 1], [], []>} : vector<32x4xf32>, vector<4x128xf32>, vector<32x128xf32> -> vector<32x128xf32>
    %c4 = arith.constant 4 : index
    %c0_21 = arith.constant 0 : index
    %36 = vector.load %arg5[%c4, %c0_21] : memref<5x128xf32, #tpu.memory_space<vmem>>, vector<1x128xf32>
    %37 = vector.broadcast %36 : vector<1x128xf32> to vector<32x128xf32>
    %38 = arith.addf %35, %37 : vector<32x128xf32>
    %c0_22 = arith.constant 0 : index
    %c0_23 = arith.constant 0 : index
    %39 = vector.load %arg7[%c0_22, %c0_23] : memref<4x32xf32, #tpu.memory_space<vmem>>, vector<2x32xf32>
    %c2 = arith.constant 2 : index
    %c0_24 = arith.constant 0 : index
    %40 = vector.load %arg7[%c2, %c0_24] : memref<4x32xf32, #tpu.memory_space<vmem>>, vector<2x32xf32>
    %cst_25 = arith.constant 1.000000e+00 : f32
    %41 = vector.broadcast %cst_25 : f32 to vector<2x1xf32>
    %42 = tpu.concatenate %39, %40, %41 in 1 : vector<2x32xf32>, vector<2x32xf32>, vector<2x1xf32> -> vector<2x65xf32>
    %c0_26 = arith.constant 0 : index
    %c0_27 = arith.constant 0 : index
    %43 = vector.load %arg6[%c0_26, %c0_27] : memref<65x384xf32, #tpu.memory_space<vmem>>, vector<65x384xf32>
    %cst_28 = arith.constant dense<0.000000e+00> : vector<2x384xf32>
    %44 = tpu.matmul %42, %43, %cst_28 {dimension_numbers = #tpu.dot_dimension_numbers<[1], [0], [0], [1], [0, 0, 1, 1], [], []>} : vector<2x65xf32>, vector<65x384xf32>, vector<2x384xf32> -> vector<2x384xf32>
    %45 = vector.extract_strided_slice %44 {offsets = [0, 0], sizes = [2, 96], strides = [1, 1]} : vector<2x384xf32> to vector<2x96xf32>
    %46 = vector.extract_strided_slice %38 {offsets = [0, 0], sizes = [2, 96], strides = [1, 1]} : vector<32x128xf32> to vector<2x96xf32>
    %47 = vector.extract_strided_slice %46 {offsets = [0, 0], sizes = [2, 64], strides = [1, 1]} : vector<2x96xf32> to vector<2x64xf32>
    %48 = vector.extract_strided_slice %45 {offsets = [0, 0], sizes = [2, 64], strides = [1, 1]} : vector<2x96xf32> to vector<2x64xf32>
    %49 = arith.addf %47, %48 : vector<2x64xf32>
    %50 = arith.negf %49 : vector<2x64xf32>
    %51 = math.exp %50 : vector<2x64xf32>
    %cst_29 = arith.constant 1.000000e+00 : f32
    %52 = vector.broadcast %cst_29 : f32 to vector<2x64xf32>
    %53 = arith.addf %52, %51 : vector<2x64xf32>
    %54 = arith.divf %52, %53 : vector<2x64xf32>
    %55 = vector.extract_strided_slice %54 {offsets = [0, 0], sizes = [2, 32], strides = [1, 1]} : vector<2x64xf32> to vector<2x32xf32>
    %56 = vector.extract_strided_slice %54 {offsets = [0, 32], sizes = [2, 32], strides = [1, 1]} : vector<2x64xf32> to vector<2x32xf32>
    %57 = vector.extract_strided_slice %46 {offsets = [0, 64], sizes = [2, 32], strides = [1, 1]} : vector<2x96xf32> to vector<2x32xf32>
    %58 = vector.extract_strided_slice %45 {offsets = [0, 64], sizes = [2, 32], strides = [1, 1]} : vector<2x96xf32> to vector<2x32xf32>
    %59 = arith.mulf %55, %58 : vector<2x32xf32>
    %60 = arith.addf %57, %59 : vector<2x32xf32>
    %61 = math.tanh %60 : vector<2x32xf32>
    %cst_30 = arith.constant 1.000000e+00 : f32
    %62 = vector.broadcast %cst_30 : f32 to vector<2x32xf32>
    %63 = arith.subf %62, %56 : vector<2x32xf32>
    %64 = arith.mulf %63, %61 : vector<2x32xf32>
    %65 = arith.mulf %56, %39 : vector<2x32xf32>
    %66 = arith.addf %64, %65 : vector<2x32xf32>
    %67 = tpu.concatenate %66, %40, %41 in 1 : vector<2x32xf32>, vector<2x32xf32>, vector<2x1xf32> -> vector<2x65xf32>
    %c0_31 = arith.constant 0 : index
    %c0_32 = arith.constant 0 : index
    %68 = vector.load %arg6[%c0_31, %c0_32] : memref<65x384xf32, #tpu.memory_space<vmem>>, vector<65x384xf32>
    %cst_33 = arith.constant dense<0.000000e+00> : vector<2x384xf32>
    %69 = tpu.matmul %67, %68, %cst_33 {dimension_numbers = #tpu.dot_dimension_numbers<[1], [0], [0], [1], [0, 0, 1, 1], [], []>} : vector<2x65xf32>, vector<65x384xf32>, vector<2x384xf32> -> vector<2x384xf32>
    %70 = vector.extract_strided_slice %69 {offsets = [0, 0], sizes = [2, 96], strides = [1, 1]} : vector<2x384xf32> to vector<2x96xf32>
    %71 = vector.extract_strided_slice %38 {offsets = [2, 0], sizes = [2, 96], strides = [1, 1]} : vector<32x128xf32> to vector<2x96xf32>
    %72 = vector.extract_strided_slice %71 {offsets = [0, 0], sizes = [2, 64], strides = [1, 1]} : vector<2x96xf32> to vector<2x64xf32>
    %73 = vector.extract_strided_slice %70 {offsets = [0, 0], sizes = [2, 64], strides = [1, 1]} : vector<2x96xf32> to vector<2x64xf32>
    %74 = arith.addf %72, %73 : vector<2x64xf32>
    %75 = arith.negf %74 : vector<2x64xf32>
    %76 = math.exp %75 : vector<2x64xf32>
    %cst_34 = arith.constant 1.000000e+00 : f32
    %77 = vector.broadcast %cst_34 : f32 to vector<2x64xf32>
    %78 = arith.addf %77, %76 : vector<2x64xf32>
    %79 = arith.divf %77, %78 : vector<2x64xf32>
    %80 = vector.extract_strided_slice %79 {offsets = [0, 0], sizes = [2, 32], strides = [1, 1]} : vector<2x64xf32> to vector<2x32xf32>
    %81 = vector.extract_strided_slice %79 {offsets = [0, 32], sizes = [2, 32], strides = [1, 1]} : vector<2x64xf32> to vector<2x32xf32>
    %82 = vector.extract_strided_slice %71 {offsets = [0, 64], sizes = [2, 32], strides = [1, 1]} : vector<2x96xf32> to vector<2x32xf32>
    %83 = vector.extract_strided_slice %70 {offsets = [0, 64], sizes = [2, 32], strides = [1, 1]} : vector<2x96xf32> to vector<2x32xf32>
    %84 = arith.mulf %80, %83 : vector<2x32xf32>
    %85 = arith.addf %82, %84 : vector<2x32xf32>
    %86 = math.tanh %85 : vector<2x32xf32>
    %cst_35 = arith.constant 1.000000e+00 : f32
    %87 = vector.broadcast %cst_35 : f32 to vector<2x32xf32>
    %88 = arith.subf %87, %81 : vector<2x32xf32>
    %89 = arith.mulf %88, %86 : vector<2x32xf32>
    %90 = arith.mulf %81, %66 : vector<2x32xf32>
    %91 = arith.addf %89, %90 : vector<2x32xf32>
    %92 = vector.extract_strided_slice %69 {offsets = [0, 128], sizes = [2, 96], strides = [1, 1]} : vector<2x384xf32> to vector<2x96xf32>
    %93 = vector.extract_strided_slice %69 {offsets = [0, 256], sizes = [2, 96], strides = [1, 1]} : vector<2x384xf32> to vector<2x96xf32>
    %94 = vector.extract_strided_slice %93 {offsets = [0, 0], sizes = [2, 64], strides = [1, 1]} : vector<2x96xf32> to vector<2x64xf32>
    %95 = vector.extract_strided_slice %92 {offsets = [0, 0], sizes = [2, 64], strides = [1, 1]} : vector<2x96xf32> to vector<2x64xf32>
    %96 = arith.addf %94, %95 : vector<2x64xf32>
    %97 = arith.negf %96 : vector<2x64xf32>
    %98 = math.exp %97 : vector<2x64xf32>
    %cst_36 = arith.constant 1.000000e+00 : f32
    %99 = vector.broadcast %cst_36 : f32 to vector<2x64xf32>
    %100 = arith.addf %99, %98 : vector<2x64xf32>
    %101 = arith.divf %99, %100 : vector<2x64xf32>
    %102 = vector.extract_strided_slice %101 {offsets = [0, 0], sizes = [2, 32], strides = [1, 1]} : vector<2x64xf32> to vector<2x32xf32>
    %103 = vector.extract_strided_slice %101 {offsets = [0, 32], sizes = [2, 32], strides = [1, 1]} : vector<2x64xf32> to vector<2x32xf32>
    %104 = vector.extract_strided_slice %93 {offsets = [0, 64], sizes = [2, 32], strides = [1, 1]} : vector<2x96xf32> to vector<2x32xf32>
    %105 = vector.extract_strided_slice %92 {offsets = [0, 64], sizes = [2, 32], strides = [1, 1]} : vector<2x96xf32> to vector<2x32xf32>
    %106 = arith.mulf %102, %105 : vector<2x32xf32>
    %107 = arith.addf %104, %106 : vector<2x32xf32>
    %108 = math.tanh %107 : vector<2x32xf32>
    %cst_37 = arith.constant 1.000000e+00 : f32
    %109 = vector.broadcast %cst_37 : f32 to vector<2x32xf32>
    %110 = arith.subf %109, %103 : vector<2x32xf32>
    %111 = arith.mulf %110, %108 : vector<2x32xf32>
    %112 = arith.mulf %103, %40 : vector<2x32xf32>
    %113 = arith.addf %111, %112 : vector<2x32xf32>
    %114 = tpu.concatenate %91, %113, %41 in 1 : vector<2x32xf32>, vector<2x32xf32>, vector<2x1xf32> -> vector<2x65xf32>
    %c0_38 = arith.constant 0 : index
    %c0_39 = arith.constant 0 : index
    %115 = vector.load %arg6[%c0_38, %c0_39] : memref<65x384xf32, #tpu.memory_space<vmem>>, vector<65x384xf32>
    %cst_40 = arith.constant dense<0.000000e+00> : vector<2x384xf32>
    %116 = tpu.matmul %114, %115, %cst_40 {dimension_numbers = #tpu.dot_dimension_numbers<[1], [0], [0], [1], [0, 0, 1, 1], [], []>} : vector<2x65xf32>, vector<65x384xf32>, vector<2x384xf32> -> vector<2x384xf32>
    %117 = vector.extract_strided_slice %116 {offsets = [0, 0], sizes = [2, 96], strides = [1, 1]} : vector<2x384xf32> to vector<2x96xf32>
    %118 = vector.extract_strided_slice %38 {offsets = [4, 0], sizes = [2, 96], strides = [1, 1]} : vector<32x128xf32> to vector<2x96xf32>
    %119 = vector.extract_strided_slice %118 {offsets = [0, 0], sizes = [2, 64], strides = [1, 1]} : vector<2x96xf32> to vector<2x64xf32>
    %120 = vector.extract_strided_slice %117 {offsets = [0, 0], sizes = [2, 64], strides = [1, 1]} : vector<2x96xf32> to vector<2x64xf32>
    %121 = arith.addf %119, %120 : vector<2x64xf32>
    %122 = arith.negf %121 : vector<2x64xf32>
    %123 = math.exp %122 : vector<2x64xf32>
    %cst_41 = arith.constant 1.000000e+00 : f32
    %124 = vector.broadcast %cst_41 : f32 to vector<2x64xf32>
    %125 = arith.addf %124, %123 : vector<2x64xf32>
    %126 = arith.divf %124, %125 : vector<2x64xf32>
    %127 = vector.extract_strided_slice %126 {offsets = [0, 0], sizes = [2, 32], strides = [1, 1]} : vector<2x64xf32> to vector<2x32xf32>
    %128 = vector.extract_strided_slice %126 {offsets = [0, 32], sizes = [2, 32], strides = [1, 1]} : vector<2x64xf32> to vector<2x32xf32>
    %129 = vector.extract_strided_slice %118 {offsets = [0, 64], sizes = [2, 32], strides = [1, 1]} : vector<2x96xf32> to vector<2x32xf32>
    %130 = vector.extract_strided_slice %117 {offsets = [0, 64], sizes = [2, 32], strides = [1, 1]} : vector<2x96xf32> to vector<2x32xf32>
    %131 = arith.mulf %127, %130 : vector<2x32xf32>
    %132 = arith.addf %129, %131 : vector<2x32xf32>
    %133 = math.tanh %132 : vector<2x32xf32>
    %cst_42 = arith.constant 1.000000e+00 : f32
    %134 = vector.broadcast %cst_42 : f32 to vector<2x32xf32>
    %135 = arith.subf %134, %128 : vector<2x32xf32>
    %136 = arith.mulf %135, %133 : vector<2x32xf32>
    %137 = arith.mulf %128, %91 : vector<2x32xf32>
    %138 = arith.addf %136, %137 : vector<2x32xf32>
    %139 = vector.extract_strided_slice %116 {offsets = [0, 128], sizes = [2, 96], strides = [1, 1]} : vector<2x384xf32> to vector<2x96xf32>
    %140 = vector.extract_strided_slice %116 {offsets = [0, 256], sizes = [2, 96], strides = [1, 1]} : vector<2x384xf32> to vector<2x96xf32>
    %141 = vector.extract_strided_slice %140 {offsets = [0, 0], sizes = [2, 64], strides = [1, 1]} : vector<2x96xf32> to vector<2x64xf32>
    %142 = vector.extract_strided_slice %139 {offsets = [0, 0], sizes = [2, 64], strides = [1, 1]} : vector<2x96xf32> to vector<2x64xf32>
    %143 = arith.addf %141, %142 : vector<2x64xf32>
    %144 = arith.negf %143 : vector<2x64xf32>
    %145 = math.exp %144 : vector<2x64xf32>
    %cst_43 = arith.constant 1.000000e+00 : f32
    %146 = vector.broadcast %cst_43 : f32 to vector<2x64xf32>
    %147 = arith.addf %146, %145 : vector<2x64xf32>
    %148 = arith.divf %146, %147 : vector<2x64xf32>
    %149 = vector.extract_strided_slice %148 {offsets = [0, 0], sizes = [2, 32], strides = [1, 1]} : vector<2x64xf32> to vector<2x32xf32>
    %150 = vector.extract_strided_slice %148 {offsets = [0, 32], sizes = [2, 32], strides = [1, 1]} : vector<2x64xf32> to vector<2x32xf32>
    %151 = vector.extract_strided_slice %140 {offsets = [0, 64], sizes = [2, 32], strides = [1, 1]} : vector<2x96xf32> to vector<2x32xf32>
    %152 = vector.extract_strided_slice %139 {offsets = [0, 64], sizes = [2, 32], strides = [1, 1]} : vector<2x96xf32> to vector<2x32xf32>
    %153 = arith.mulf %149, %152 : vector<2x32xf32>
    %154 = arith.addf %151, %153 : vector<2x32xf32>
    %155 = math.tanh %154 : vector<2x32xf32>
    %cst_44 = arith.constant 1.000000e+00 : f32
    %156 = vector.broadcast %cst_44 : f32 to vector<2x32xf32>
    %157 = arith.subf %156, %150 : vector<2x32xf32>
    %158 = arith.mulf %157, %155 : vector<2x32xf32>
    %159 = arith.mulf %150, %113 : vector<2x32xf32>
    %160 = arith.addf %158, %159 : vector<2x32xf32>
    %161 = tpu.concatenate %138, %160, %41 in 1 : vector<2x32xf32>, vector<2x32xf32>, vector<2x1xf32> -> vector<2x65xf32>
    %c0_45 = arith.constant 0 : index
    %c0_46 = arith.constant 0 : index
    %162 = vector.load %arg6[%c0_45, %c0_46] : memref<65x384xf32, #tpu.memory_space<vmem>>, vector<65x384xf32>
    %cst_47 = arith.constant dense<0.000000e+00> : vector<2x384xf32>
    %163 = tpu.matmul %161, %162, %cst_47 {dimension_numbers = #tpu.dot_dimension_numbers<[1], [0], [0], [1], [0, 0, 1, 1], [], []>} : vector<2x65xf32>, vector<65x384xf32>, vector<2x384xf32> -> vector<2x384xf32>
    %164 = vector.extract_strided_slice %163 {offsets = [0, 0], sizes = [2, 96], strides = [1, 1]} : vector<2x384xf32> to vector<2x96xf32>
    %165 = vector.extract_strided_slice %38 {offsets = [6, 0], sizes = [2, 96], strides = [1, 1]} : vector<32x128xf32> to vector<2x96xf32>
    %166 = vector.extract_strided_slice %165 {offsets = [0, 0], sizes = [2, 64], strides = [1, 1]} : vector<2x96xf32> to vector<2x64xf32>
    %167 = vector.extract_strided_slice %164 {offsets = [0, 0], sizes = [2, 64], strides = [1, 1]} : vector<2x96xf32> to vector<2x64xf32>
    %168 = arith.addf %166, %167 : vector<2x64xf32>
    %169 = arith.negf %168 : vector<2x64xf32>
    %170 = math.exp %169 : vector<2x64xf32>
    %cst_48 = arith.constant 1.000000e+00 : f32
    %171 = vector.broadcast %cst_48 : f32 to vector<2x64xf32>
    %172 = arith.addf %171, %170 : vector<2x64xf32>
    %173 = arith.divf %171, %172 : vector<2x64xf32>
    %174 = vector.extract_strided_slice %173 {offsets = [0, 0], sizes = [2, 32], strides = [1, 1]} : vector<2x64xf32> to vector<2x32xf32>
    %175 = vector.extract_strided_slice %173 {offsets = [0, 32], sizes = [2, 32], strides = [1, 1]} : vector<2x64xf32> to vector<2x32xf32>
    %176 = vector.extract_strided_slice %165 {offsets = [0, 64], sizes = [2, 32], strides = [1, 1]} : vector<2x96xf32> to vector<2x32xf32>
    %177 = vector.extract_strided_slice %164 {offsets = [0, 64], sizes = [2, 32], strides = [1, 1]} : vector<2x96xf32> to vector<2x32xf32>
    %178 = arith.mulf %174, %177 : vector<2x32xf32>
    %179 = arith.addf %176, %178 : vector<2x32xf32>
    %180 = math.tanh %179 : vector<2x32xf32>
    %cst_49 = arith.constant 1.000000e+00 : f32
    %181 = vector.broadcast %cst_49 : f32 to vector<2x32xf32>
    %182 = arith.subf %181, %175 : vector<2x32xf32>
    %183 = arith.mulf %182, %180 : vector<2x32xf32>
    %184 = arith.mulf %175, %138 : vector<2x32xf32>
    %185 = arith.addf %183, %184 : vector<2x32xf32>
    %186 = vector.extract_strided_slice %163 {offsets = [0, 128], sizes = [2, 96], strides = [1, 1]} : vector<2x384xf32> to vector<2x96xf32>
    %187 = vector.extract_strided_slice %163 {offsets = [0, 256], sizes = [2, 96], strides = [1, 1]} : vector<2x384xf32> to vector<2x96xf32>
    %188 = vector.extract_strided_slice %187 {offsets = [0, 0], sizes = [2, 64], strides = [1, 1]} : vector<2x96xf32> to vector<2x64xf32>
    %189 = vector.extract_strided_slice %186 {offsets = [0, 0], sizes = [2, 64], strides = [1, 1]} : vector<2x96xf32> to vector<2x64xf32>
    %190 = arith.addf %188, %189 : vector<2x64xf32>
    %191 = arith.negf %190 : vector<2x64xf32>
    %192 = math.exp %191 : vector<2x64xf32>
    %cst_50 = arith.constant 1.000000e+00 : f32
    %193 = vector.broadcast %cst_50 : f32 to vector<2x64xf32>
    %194 = arith.addf %193, %192 : vector<2x64xf32>
    %195 = arith.divf %193, %194 : vector<2x64xf32>
    %196 = vector.extract_strided_slice %195 {offsets = [0, 0], sizes = [2, 32], strides = [1, 1]} : vector<2x64xf32> to vector<2x32xf32>
    %197 = vector.extract_strided_slice %195 {offsets = [0, 32], sizes = [2, 32], strides = [1, 1]} : vector<2x64xf32> to vector<2x32xf32>
    %198 = vector.extract_strided_slice %187 {offsets = [0, 64], sizes = [2, 32], strides = [1, 1]} : vector<2x96xf32> to vector<2x32xf32>
    %199 = vector.extract_strided_slice %186 {offsets = [0, 64], sizes = [2, 32], strides = [1, 1]} : vector<2x96xf32> to vector<2x32xf32>
    %200 = arith.mulf %196, %199 : vector<2x32xf32>
    %201 = arith.addf %198, %200 : vector<2x32xf32>
    %202 = math.tanh %201 : vector<2x32xf32>
    %cst_51 = arith.constant 1.000000e+00 : f32
    %203 = vector.broadcast %cst_51 : f32 to vector<2x32xf32>
    %204 = arith.subf %203, %197 : vector<2x32xf32>
    %205 = arith.mulf %204, %202 : vector<2x32xf32>
    %206 = arith.mulf %197, %160 : vector<2x32xf32>
    %207 = arith.addf %205, %206 : vector<2x32xf32>
    %208 = tpu.concatenate %185, %207, %41 in 1 : vector<2x32xf32>, vector<2x32xf32>, vector<2x1xf32> -> vector<2x65xf32>
    %c0_52 = arith.constant 0 : index
    %c0_53 = arith.constant 0 : index
    %209 = vector.load %arg6[%c0_52, %c0_53] : memref<65x384xf32, #tpu.memory_space<vmem>>, vector<65x384xf32>
    %cst_54 = arith.constant dense<0.000000e+00> : vector<2x384xf32>
    %210 = tpu.matmul %208, %209, %cst_54 {dimension_numbers = #tpu.dot_dimension_numbers<[1], [0], [0], [1], [0, 0, 1, 1], [], []>} : vector<2x65xf32>, vector<65x384xf32>, vector<2x384xf32> -> vector<2x384xf32>
    %211 = vector.extract_strided_slice %210 {offsets = [0, 0], sizes = [2, 96], strides = [1, 1]} : vector<2x384xf32> to vector<2x96xf32>
    %212 = vector.extract_strided_slice %38 {offsets = [8, 0], sizes = [2, 96], strides = [1, 1]} : vector<32x128xf32> to vector<2x96xf32>
    %213 = vector.extract_strided_slice %212 {offsets = [0, 0], sizes = [2, 64], strides = [1, 1]} : vector<2x96xf32> to vector<2x64xf32>
    %214 = vector.extract_strided_slice %211 {offsets = [0, 0], sizes = [2, 64], strides = [1, 1]} : vector<2x96xf32> to vector<2x64xf32>
    %215 = arith.addf %213, %214 : vector<2x64xf32>
    %216 = arith.negf %215 : vector<2x64xf32>
    %217 = math.exp %216 : vector<2x64xf32>
    %cst_55 = arith.constant 1.000000e+00 : f32
    %218 = vector.broadcast %cst_55 : f32 to vector<2x64xf32>
    %219 = arith.addf %218, %217 : vector<2x64xf32>
    %220 = arith.divf %218, %219 : vector<2x64xf32>
    %221 = vector.extract_strided_slice %220 {offsets = [0, 0], sizes = [2, 32], strides = [1, 1]} : vector<2x64xf32> to vector<2x32xf32>
    %222 = vector.extract_strided_slice %220 {offsets = [0, 32], sizes = [2, 32], strides = [1, 1]} : vector<2x64xf32> to vector<2x32xf32>
    %223 = vector.extract_strided_slice %212 {offsets = [0, 64], sizes = [2, 32], strides = [1, 1]} : vector<2x96xf32> to vector<2x32xf32>
    %224 = vector.extract_strided_slice %211 {offsets = [0, 64], sizes = [2, 32], strides = [1, 1]} : vector<2x96xf32> to vector<2x32xf32>
    %225 = arith.mulf %221, %224 : vector<2x32xf32>
    %226 = arith.addf %223, %225 : vector<2x32xf32>
    %227 = math.tanh %226 : vector<2x32xf32>
    %cst_56 = arith.constant 1.000000e+00 : f32
    %228 = vector.broadcast %cst_56 : f32 to vector<2x32xf32>
    %229 = arith.subf %228, %222 : vector<2x32xf32>
    %230 = arith.mulf %229, %227 : vector<2x32xf32>
    %231 = arith.mulf %222, %185 : vector<2x32xf32>
    %232 = arith.addf %230, %231 : vector<2x32xf32>
    %233 = vector.extract_strided_slice %210 {offsets = [0, 128], sizes = [2, 96], strides = [1, 1]} : vector<2x384xf32> to vector<2x96xf32>
    %234 = vector.extract_strided_slice %210 {offsets = [0, 256], sizes = [2, 96], strides = [1, 1]} : vector<2x384xf32> to vector<2x96xf32>
    %235 = vector.extract_strided_slice %234 {offsets = [0, 0], sizes = [2, 64], strides = [1, 1]} : vector<2x96xf32> to vector<2x64xf32>
    %236 = vector.extract_strided_slice %233 {offsets = [0, 0], sizes = [2, 64], strides = [1, 1]} : vector<2x96xf32> to vector<2x64xf32>
    %237 = arith.addf %235, %236 : vector<2x64xf32>
    %238 = arith.negf %237 : vector<2x64xf32>
    %239 = math.exp %238 : vector<2x64xf32>
    %cst_57 = arith.constant 1.000000e+00 : f32
    %240 = vector.broadcast %cst_57 : f32 to vector<2x64xf32>
    %241 = arith.addf %240, %239 : vector<2x64xf32>
    %242 = arith.divf %240, %241 : vector<2x64xf32>
    %243 = vector.extract_strided_slice %242 {offsets = [0, 0], sizes = [2, 32], strides = [1, 1]} : vector<2x64xf32> to vector<2x32xf32>
    %244 = vector.extract_strided_slice %242 {offsets = [0, 32], sizes = [2, 32], strides = [1, 1]} : vector<2x64xf32> to vector<2x32xf32>
    %245 = vector.extract_strided_slice %234 {offsets = [0, 64], sizes = [2, 32], strides = [1, 1]} : vector<2x96xf32> to vector<2x32xf32>
    %246 = vector.extract_strided_slice %233 {offsets = [0, 64], sizes = [2, 32], strides = [1, 1]} : vector<2x96xf32> to vector<2x32xf32>
    %247 = arith.mulf %243, %246 : vector<2x32xf32>
    %248 = arith.addf %245, %247 : vector<2x32xf32>
    %249 = math.tanh %248 : vector<2x32xf32>
    %cst_58 = arith.constant 1.000000e+00 : f32
    %250 = vector.broadcast %cst_58 : f32 to vector<2x32xf32>
    %251 = arith.subf %250, %244 : vector<2x32xf32>
    %252 = arith.mulf %251, %249 : vector<2x32xf32>
    %253 = arith.mulf %244, %207 : vector<2x32xf32>
    %254 = arith.addf %252, %253 : vector<2x32xf32>
    %255 = tpu.concatenate %232, %254, %41 in 1 : vector<2x32xf32>, vector<2x32xf32>, vector<2x1xf32> -> vector<2x65xf32>
    %c0_59 = arith.constant 0 : index
    %c0_60 = arith.constant 0 : index
    %256 = vector.load %arg6[%c0_59, %c0_60] : memref<65x384xf32, #tpu.memory_space<vmem>>, vector<65x384xf32>
    %cst_61 = arith.constant dense<0.000000e+00> : vector<2x384xf32>
    %257 = tpu.matmul %255, %256, %cst_61 {dimension_numbers = #tpu.dot_dimension_numbers<[1], [0], [0], [1], [0, 0, 1, 1], [], []>} : vector<2x65xf32>, vector<65x384xf32>, vector<2x384xf32> -> vector<2x384xf32>
    %258 = vector.extract_strided_slice %257 {offsets = [0, 0], sizes = [2, 96], strides = [1, 1]} : vector<2x384xf32> to vector<2x96xf32>
    %259 = vector.extract_strided_slice %38 {offsets = [10, 0], sizes = [2, 96], strides = [1, 1]} : vector<32x128xf32> to vector<2x96xf32>
    %260 = vector.extract_strided_slice %259 {offsets = [0, 0], sizes = [2, 64], strides = [1, 1]} : vector<2x96xf32> to vector<2x64xf32>
    %261 = vector.extract_strided_slice %258 {offsets = [0, 0], sizes = [2, 64], strides = [1, 1]} : vector<2x96xf32> to vector<2x64xf32>
    %262 = arith.addf %260, %261 : vector<2x64xf32>
    %263 = arith.negf %262 : vector<2x64xf32>
    %264 = math.exp %263 : vector<2x64xf32>
    %cst_62 = arith.constant 1.000000e+00 : f32
    %265 = vector.broadcast %cst_62 : f32 to vector<2x64xf32>
    %266 = arith.addf %265, %264 : vector<2x64xf32>
    %267 = arith.divf %265, %266 : vector<2x64xf32>
    %268 = vector.extract_strided_slice %267 {offsets = [0, 0], sizes = [2, 32], strides = [1, 1]} : vector<2x64xf32> to vector<2x32xf32>
    %269 = vector.extract_strided_slice %267 {offsets = [0, 32], sizes = [2, 32], strides = [1, 1]} : vector<2x64xf32> to vector<2x32xf32>
    %270 = vector.extract_strided_slice %259 {offsets = [0, 64], sizes = [2, 32], strides = [1, 1]} : vector<2x96xf32> to vector<2x32xf32>
    %271 = vector.extract_strided_slice %258 {offsets = [0, 64], sizes = [2, 32], strides = [1, 1]} : vector<2x96xf32> to vector<2x32xf32>
    %272 = arith.mulf %268, %271 : vector<2x32xf32>
    %273 = arith.addf %270, %272 : vector<2x32xf32>
    %274 = math.tanh %273 : vector<2x32xf32>
    %cst_63 = arith.constant 1.000000e+00 : f32
    %275 = vector.broadcast %cst_63 : f32 to vector<2x32xf32>
    %276 = arith.subf %275, %269 : vector<2x32xf32>
    %277 = arith.mulf %276, %274 : vector<2x32xf32>
    %278 = arith.mulf %269, %232 : vector<2x32xf32>
    %279 = arith.addf %277, %278 : vector<2x32xf32>
    %280 = vector.extract_strided_slice %257 {offsets = [0, 128], sizes = [2, 96], strides = [1, 1]} : vector<2x384xf32> to vector<2x96xf32>
    %281 = vector.extract_strided_slice %257 {offsets = [0, 256], sizes = [2, 96], strides = [1, 1]} : vector<2x384xf32> to vector<2x96xf32>
    %282 = vector.extract_strided_slice %281 {offsets = [0, 0], sizes = [2, 64], strides = [1, 1]} : vector<2x96xf32> to vector<2x64xf32>
    %283 = vector.extract_strided_slice %280 {offsets = [0, 0], sizes = [2, 64], strides = [1, 1]} : vector<2x96xf32> to vector<2x64xf32>
    %284 = arith.addf %282, %283 : vector<2x64xf32>
    %285 = arith.negf %284 : vector<2x64xf32>
    %286 = math.exp %285 : vector<2x64xf32>
    %cst_64 = arith.constant 1.000000e+00 : f32
    %287 = vector.broadcast %cst_64 : f32 to vector<2x64xf32>
    %288 = arith.addf %287, %286 : vector<2x64xf32>
    %289 = arith.divf %287, %288 : vector<2x64xf32>
    %290 = vector.extract_strided_slice %289 {offsets = [0, 0], sizes = [2, 32], strides = [1, 1]} : vector<2x64xf32> to vector<2x32xf32>
    %291 = vector.extract_strided_slice %289 {offsets = [0, 32], sizes = [2, 32], strides = [1, 1]} : vector<2x64xf32> to vector<2x32xf32>
    %292 = vector.extract_strided_slice %281 {offsets = [0, 64], sizes = [2, 32], strides = [1, 1]} : vector<2x96xf32> to vector<2x32xf32>
    %293 = vector.extract_strided_slice %280 {offsets = [0, 64], sizes = [2, 32], strides = [1, 1]} : vector<2x96xf32> to vector<2x32xf32>
    %294 = arith.mulf %290, %293 : vector<2x32xf32>
    %295 = arith.addf %292, %294 : vector<2x32xf32>
    %296 = math.tanh %295 : vector<2x32xf32>
    %cst_65 = arith.constant 1.000000e+00 : f32
    %297 = vector.broadcast %cst_65 : f32 to vector<2x32xf32>
    %298 = arith.subf %297, %291 : vector<2x32xf32>
    %299 = arith.mulf %298, %296 : vector<2x32xf32>
    %300 = arith.mulf %291, %254 : vector<2x32xf32>
    %301 = arith.addf %299, %300 : vector<2x32xf32>
    %302 = tpu.concatenate %279, %301, %41 in 1 : vector<2x32xf32>, vector<2x32xf32>, vector<2x1xf32> -> vector<2x65xf32>
    %c0_66 = arith.constant 0 : index
    %c0_67 = arith.constant 0 : index
    %303 = vector.load %arg6[%c0_66, %c0_67] : memref<65x384xf32, #tpu.memory_space<vmem>>, vector<65x384xf32>
    %cst_68 = arith.constant dense<0.000000e+00> : vector<2x384xf32>
    %304 = tpu.matmul %302, %303, %cst_68 {dimension_numbers = #tpu.dot_dimension_numbers<[1], [0], [0], [1], [0, 0, 1, 1], [], []>} : vector<2x65xf32>, vector<65x384xf32>, vector<2x384xf32> -> vector<2x384xf32>
    %305 = vector.extract_strided_slice %304 {offsets = [0, 0], sizes = [2, 96], strides = [1, 1]} : vector<2x384xf32> to vector<2x96xf32>
    %306 = vector.extract_strided_slice %38 {offsets = [12, 0], sizes = [2, 96], strides = [1, 1]} : vector<32x128xf32> to vector<2x96xf32>
    %307 = vector.extract_strided_slice %306 {offsets = [0, 0], sizes = [2, 64], strides = [1, 1]} : vector<2x96xf32> to vector<2x64xf32>
    %308 = vector.extract_strided_slice %305 {offsets = [0, 0], sizes = [2, 64], strides = [1, 1]} : vector<2x96xf32> to vector<2x64xf32>
    %309 = arith.addf %307, %308 : vector<2x64xf32>
    %310 = arith.negf %309 : vector<2x64xf32>
    %311 = math.exp %310 : vector<2x64xf32>
    %cst_69 = arith.constant 1.000000e+00 : f32
    %312 = vector.broadcast %cst_69 : f32 to vector<2x64xf32>
    %313 = arith.addf %312, %311 : vector<2x64xf32>
    %314 = arith.divf %312, %313 : vector<2x64xf32>
    %315 = vector.extract_strided_slice %314 {offsets = [0, 0], sizes = [2, 32], strides = [1, 1]} : vector<2x64xf32> to vector<2x32xf32>
    %316 = vector.extract_strided_slice %314 {offsets = [0, 32], sizes = [2, 32], strides = [1, 1]} : vector<2x64xf32> to vector<2x32xf32>
    %317 = vector.extract_strided_slice %306 {offsets = [0, 64], sizes = [2, 32], strides = [1, 1]} : vector<2x96xf32> to vector<2x32xf32>
    %318 = vector.extract_strided_slice %305 {offsets = [0, 64], sizes = [2, 32], strides = [1, 1]} : vector<2x96xf32> to vector<2x32xf32>
    %319 = arith.mulf %315, %318 : vector<2x32xf32>
    %320 = arith.addf %317, %319 : vector<2x32xf32>
    %321 = math.tanh %320 : vector<2x32xf32>
    %cst_70 = arith.constant 1.000000e+00 : f32
    %322 = vector.broadcast %cst_70 : f32 to vector<2x32xf32>
    %323 = arith.subf %322, %316 : vector<2x32xf32>
    %324 = arith.mulf %323, %321 : vector<2x32xf32>
    %325 = arith.mulf %316, %279 : vector<2x32xf32>
    %326 = arith.addf %324, %325 : vector<2x32xf32>
    %327 = vector.extract_strided_slice %304 {offsets = [0, 128], sizes = [2, 96], strides = [1, 1]} : vector<2x384xf32> to vector<2x96xf32>
    %328 = vector.extract_strided_slice %304 {offsets = [0, 256], sizes = [2, 96], strides = [1, 1]} : vector<2x384xf32> to vector<2x96xf32>
    %329 = vector.extract_strided_slice %328 {offsets = [0, 0], sizes = [2, 64], strides = [1, 1]} : vector<2x96xf32> to vector<2x64xf32>
    %330 = vector.extract_strided_slice %327 {offsets = [0, 0], sizes = [2, 64], strides = [1, 1]} : vector<2x96xf32> to vector<2x64xf32>
    %331 = arith.addf %329, %330 : vector<2x64xf32>
    %332 = arith.negf %331 : vector<2x64xf32>
    %333 = math.exp %332 : vector<2x64xf32>
    %cst_71 = arith.constant 1.000000e+00 : f32
    %334 = vector.broadcast %cst_71 : f32 to vector<2x64xf32>
    %335 = arith.addf %334, %333 : vector<2x64xf32>
    %336 = arith.divf %334, %335 : vector<2x64xf32>
    %337 = vector.extract_strided_slice %336 {offsets = [0, 0], sizes = [2, 32], strides = [1, 1]} : vector<2x64xf32> to vector<2x32xf32>
    %338 = vector.extract_strided_slice %336 {offsets = [0, 32], sizes = [2, 32], strides = [1, 1]} : vector<2x64xf32> to vector<2x32xf32>
    %339 = vector.extract_strided_slice %328 {offsets = [0, 64], sizes = [2, 32], strides = [1, 1]} : vector<2x96xf32> to vector<2x32xf32>
    %340 = vector.extract_strided_slice %327 {offsets = [0, 64], sizes = [2, 32], strides = [1, 1]} : vector<2x96xf32> to vector<2x32xf32>
    %341 = arith.mulf %337, %340 : vector<2x32xf32>
    %342 = arith.addf %339, %341 : vector<2x32xf32>
    %343 = math.tanh %342 : vector<2x32xf32>
    %cst_72 = arith.constant 1.000000e+00 : f32
    %344 = vector.broadcast %cst_72 : f32 to vector<2x32xf32>
    %345 = arith.subf %344, %338 : vector<2x32xf32>
    %346 = arith.mulf %345, %343 : vector<2x32xf32>
    %347 = arith.mulf %338, %301 : vector<2x32xf32>
    %348 = arith.addf %346, %347 : vector<2x32xf32>
    %349 = tpu.concatenate %326, %348, %41 in 1 : vector<2x32xf32>, vector<2x32xf32>, vector<2x1xf32> -> vector<2x65xf32>
    %c0_73 = arith.constant 0 : index
    %c0_74 = arith.constant 0 : index
    %350 = vector.load %arg6[%c0_73, %c0_74] : memref<65x384xf32, #tpu.memory_space<vmem>>, vector<65x384xf32>
    %cst_75 = arith.constant dense<0.000000e+00> : vector<2x384xf32>
    %351 = tpu.matmul %349, %350, %cst_75 {dimension_numbers = #tpu.dot_dimension_numbers<[1], [0], [0], [1], [0, 0, 1, 1], [], []>} : vector<2x65xf32>, vector<65x384xf32>, vector<2x384xf32> -> vector<2x384xf32>
    %352 = vector.extract_strided_slice %351 {offsets = [0, 0], sizes = [2, 96], strides = [1, 1]} : vector<2x384xf32> to vector<2x96xf32>
    %353 = vector.extract_strided_slice %38 {offsets = [14, 0], sizes = [2, 96], strides = [1, 1]} : vector<32x128xf32> to vector<2x96xf32>
    %354 = vector.extract_strided_slice %353 {offsets = [0, 0], sizes = [2, 64], strides = [1, 1]} : vector<2x96xf32> to vector<2x64xf32>
    %355 = vector.extract_strided_slice %352 {offsets = [0, 0], sizes = [2, 64], strides = [1, 1]} : vector<2x96xf32> to vector<2x64xf32>
    %356 = arith.addf %354, %355 : vector<2x64xf32>
    %357 = arith.negf %356 : vector<2x64xf32>
    %358 = math.exp %357 : vector<2x64xf32>
    %cst_76 = arith.constant 1.000000e+00 : f32
    %359 = vector.broadcast %cst_76 : f32 to vector<2x64xf32>
    %360 = arith.addf %359, %358 : vector<2x64xf32>
    %361 = arith.divf %359, %360 : vector<2x64xf32>
    %362 = vector.extract_strided_slice %361 {offsets = [0, 0], sizes = [2, 32], strides = [1, 1]} : vector<2x64xf32> to vector<2x32xf32>
    %363 = vector.extract_strided_slice %361 {offsets = [0, 32], sizes = [2, 32], strides = [1, 1]} : vector<2x64xf32> to vector<2x32xf32>
    %364 = vector.extract_strided_slice %353 {offsets = [0, 64], sizes = [2, 32], strides = [1, 1]} : vector<2x96xf32> to vector<2x32xf32>
    %365 = vector.extract_strided_slice %352 {offsets = [0, 64], sizes = [2, 32], strides = [1, 1]} : vector<2x96xf32> to vector<2x32xf32>
    %366 = arith.mulf %362, %365 : vector<2x32xf32>
    %367 = arith.addf %364, %366 : vector<2x32xf32>
    %368 = math.tanh %367 : vector<2x32xf32>
    %cst_77 = arith.constant 1.000000e+00 : f32
    %369 = vector.broadcast %cst_77 : f32 to vector<2x32xf32>
    %370 = arith.subf %369, %363 : vector<2x32xf32>
    %371 = arith.mulf %370, %368 : vector<2x32xf32>
    %372 = arith.mulf %363, %326 : vector<2x32xf32>
    %373 = arith.addf %371, %372 : vector<2x32xf32>
    %374 = vector.extract_strided_slice %351 {offsets = [0, 128], sizes = [2, 96], strides = [1, 1]} : vector<2x384xf32> to vector<2x96xf32>
    %375 = vector.extract_strided_slice %351 {offsets = [0, 256], sizes = [2, 96], strides = [1, 1]} : vector<2x384xf32> to vector<2x96xf32>
    %376 = vector.extract_strided_slice %375 {offsets = [0, 0], sizes = [2, 64], strides = [1, 1]} : vector<2x96xf32> to vector<2x64xf32>
    %377 = vector.extract_strided_slice %374 {offsets = [0, 0], sizes = [2, 64], strides = [1, 1]} : vector<2x96xf32> to vector<2x64xf32>
    %378 = arith.addf %376, %377 : vector<2x64xf32>
    %379 = arith.negf %378 : vector<2x64xf32>
    %380 = math.exp %379 : vector<2x64xf32>
    %cst_78 = arith.constant 1.000000e+00 : f32
    %381 = vector.broadcast %cst_78 : f32 to vector<2x64xf32>
    %382 = arith.addf %381, %380 : vector<2x64xf32>
    %383 = arith.divf %381, %382 : vector<2x64xf32>
    %384 = vector.extract_strided_slice %383 {offsets = [0, 0], sizes = [2, 32], strides = [1, 1]} : vector<2x64xf32> to vector<2x32xf32>
    %385 = vector.extract_strided_slice %383 {offsets = [0, 32], sizes = [2, 32], strides = [1, 1]} : vector<2x64xf32> to vector<2x32xf32>
    %386 = vector.extract_strided_slice %375 {offsets = [0, 64], sizes = [2, 32], strides = [1, 1]} : vector<2x96xf32> to vector<2x32xf32>
    %387 = vector.extract_strided_slice %374 {offsets = [0, 64], sizes = [2, 32], strides = [1, 1]} : vector<2x96xf32> to vector<2x32xf32>
    %388 = arith.mulf %384, %387 : vector<2x32xf32>
    %389 = arith.addf %386, %388 : vector<2x32xf32>
    %390 = math.tanh %389 : vector<2x32xf32>
    %cst_79 = arith.constant 1.000000e+00 : f32
    %391 = vector.broadcast %cst_79 : f32 to vector<2x32xf32>
    %392 = arith.subf %391, %385 : vector<2x32xf32>
    %393 = arith.mulf %392, %390 : vector<2x32xf32>
    %394 = arith.mulf %385, %348 : vector<2x32xf32>
    %395 = arith.addf %393, %394 : vector<2x32xf32>
    %396 = tpu.concatenate %373, %395, %41 in 1 : vector<2x32xf32>, vector<2x32xf32>, vector<2x1xf32> -> vector<2x65xf32>
    %c0_80 = arith.constant 0 : index
    %c0_81 = arith.constant 0 : index
    %397 = vector.load %arg6[%c0_80, %c0_81] : memref<65x384xf32, #tpu.memory_space<vmem>>, vector<65x384xf32>
    %cst_82 = arith.constant dense<0.000000e+00> : vector<2x384xf32>
    %398 = tpu.matmul %396, %397, %cst_82 {dimension_numbers = #tpu.dot_dimension_numbers<[1], [0], [0], [1], [0, 0, 1, 1], [], []>} : vector<2x65xf32>, vector<65x384xf32>, vector<2x384xf32> -> vector<2x384xf32>
    %399 = vector.extract_strided_slice %398 {offsets = [0, 0], sizes = [2, 96], strides = [1, 1]} : vector<2x384xf32> to vector<2x96xf32>
    %400 = vector.extract_strided_slice %38 {offsets = [16, 0], sizes = [2, 96], strides = [1, 1]} : vector<32x128xf32> to vector<2x96xf32>
    %401 = vector.extract_strided_slice %400 {offsets = [0, 0], sizes = [2, 64], strides = [1, 1]} : vector<2x96xf32> to vector<2x64xf32>
    %402 = vector.extract_strided_slice %399 {offsets = [0, 0], sizes = [2, 64], strides = [1, 1]} : vector<2x96xf32> to vector<2x64xf32>
    %403 = arith.addf %401, %402 : vector<2x64xf32>
    %404 = arith.negf %403 : vector<2x64xf32>
    %405 = math.exp %404 : vector<2x64xf32>
    %cst_83 = arith.constant 1.000000e+00 : f32
    %406 = vector.broadcast %cst_83 : f32 to vector<2x64xf32>
    %407 = arith.addf %406, %405 : vector<2x64xf32>
    %408 = arith.divf %406, %407 : vector<2x64xf32>
    %409 = vector.extract_strided_slice %408 {offsets = [0, 0], sizes = [2, 32], strides = [1, 1]} : vector<2x64xf32> to vector<2x32xf32>
    %410 = vector.extract_strided_slice %408 {offsets = [0, 32], sizes = [2, 32], strides = [1, 1]} : vector<2x64xf32> to vector<2x32xf32>
    %411 = vector.extract_strided_slice %400 {offsets = [0, 64], sizes = [2, 32], strides = [1, 1]} : vector<2x96xf32> to vector<2x32xf32>
    %412 = vector.extract_strided_slice %399 {offsets = [0, 64], sizes = [2, 32], strides = [1, 1]} : vector<2x96xf32> to vector<2x32xf32>
    %413 = arith.mulf %409, %412 : vector<2x32xf32>
    %414 = arith.addf %411, %413 : vector<2x32xf32>
    %415 = math.tanh %414 : vector<2x32xf32>
    %cst_84 = arith.constant 1.000000e+00 : f32
    %416 = vector.broadcast %cst_84 : f32 to vector<2x32xf32>
    %417 = arith.subf %416, %410 : vector<2x32xf32>
    %418 = arith.mulf %417, %415 : vector<2x32xf32>
    %419 = arith.mulf %410, %373 : vector<2x32xf32>
    %420 = arith.addf %418, %419 : vector<2x32xf32>
    %421 = vector.extract_strided_slice %398 {offsets = [0, 128], sizes = [2, 96], strides = [1, 1]} : vector<2x384xf32> to vector<2x96xf32>
    %422 = vector.extract_strided_slice %398 {offsets = [0, 256], sizes = [2, 96], strides = [1, 1]} : vector<2x384xf32> to vector<2x96xf32>
    %423 = vector.extract_strided_slice %422 {offsets = [0, 0], sizes = [2, 64], strides = [1, 1]} : vector<2x96xf32> to vector<2x64xf32>
    %424 = vector.extract_strided_slice %421 {offsets = [0, 0], sizes = [2, 64], strides = [1, 1]} : vector<2x96xf32> to vector<2x64xf32>
    %425 = arith.addf %423, %424 : vector<2x64xf32>
    %426 = arith.negf %425 : vector<2x64xf32>
    %427 = math.exp %426 : vector<2x64xf32>
    %cst_85 = arith.constant 1.000000e+00 : f32
    %428 = vector.broadcast %cst_85 : f32 to vector<2x64xf32>
    %429 = arith.addf %428, %427 : vector<2x64xf32>
    %430 = arith.divf %428, %429 : vector<2x64xf32>
    %431 = vector.extract_strided_slice %430 {offsets = [0, 0], sizes = [2, 32], strides = [1, 1]} : vector<2x64xf32> to vector<2x32xf32>
    %432 = vector.extract_strided_slice %430 {offsets = [0, 32], sizes = [2, 32], strides = [1, 1]} : vector<2x64xf32> to vector<2x32xf32>
    %433 = vector.extract_strided_slice %422 {offsets = [0, 64], sizes = [2, 32], strides = [1, 1]} : vector<2x96xf32> to vector<2x32xf32>
    %434 = vector.extract_strided_slice %421 {offsets = [0, 64], sizes = [2, 32], strides = [1, 1]} : vector<2x96xf32> to vector<2x32xf32>
    %435 = arith.mulf %431, %434 : vector<2x32xf32>
    %436 = arith.addf %433, %435 : vector<2x32xf32>
    %437 = math.tanh %436 : vector<2x32xf32>
    %cst_86 = arith.constant 1.000000e+00 : f32
    %438 = vector.broadcast %cst_86 : f32 to vector<2x32xf32>
    %439 = arith.subf %438, %432 : vector<2x32xf32>
    %440 = arith.mulf %439, %437 : vector<2x32xf32>
    %441 = arith.mulf %432, %395 : vector<2x32xf32>
    %442 = arith.addf %440, %441 : vector<2x32xf32>
    %443 = tpu.concatenate %420, %442, %41 in 1 : vector<2x32xf32>, vector<2x32xf32>, vector<2x1xf32> -> vector<2x65xf32>
    %c0_87 = arith.constant 0 : index
    %c0_88 = arith.constant 0 : index
    %444 = vector.load %arg6[%c0_87, %c0_88] : memref<65x384xf32, #tpu.memory_space<vmem>>, vector<65x384xf32>
    %cst_89 = arith.constant dense<0.000000e+00> : vector<2x384xf32>
    %445 = tpu.matmul %443, %444, %cst_89 {dimension_numbers = #tpu.dot_dimension_numbers<[1], [0], [0], [1], [0, 0, 1, 1], [], []>} : vector<2x65xf32>, vector<65x384xf32>, vector<2x384xf32> -> vector<2x384xf32>
    %446 = vector.extract_strided_slice %445 {offsets = [0, 0], sizes = [2, 96], strides = [1, 1]} : vector<2x384xf32> to vector<2x96xf32>
    %447 = vector.extract_strided_slice %38 {offsets = [18, 0], sizes = [2, 96], strides = [1, 1]} : vector<32x128xf32> to vector<2x96xf32>
    %448 = vector.extract_strided_slice %447 {offsets = [0, 0], sizes = [2, 64], strides = [1, 1]} : vector<2x96xf32> to vector<2x64xf32>
    %449 = vector.extract_strided_slice %446 {offsets = [0, 0], sizes = [2, 64], strides = [1, 1]} : vector<2x96xf32> to vector<2x64xf32>
    %450 = arith.addf %448, %449 : vector<2x64xf32>
    %451 = arith.negf %450 : vector<2x64xf32>
    %452 = math.exp %451 : vector<2x64xf32>
    %cst_90 = arith.constant 1.000000e+00 : f32
    %453 = vector.broadcast %cst_90 : f32 to vector<2x64xf32>
    %454 = arith.addf %453, %452 : vector<2x64xf32>
    %455 = arith.divf %453, %454 : vector<2x64xf32>
    %456 = vector.extract_strided_slice %455 {offsets = [0, 0], sizes = [2, 32], strides = [1, 1]} : vector<2x64xf32> to vector<2x32xf32>
    %457 = vector.extract_strided_slice %455 {offsets = [0, 32], sizes = [2, 32], strides = [1, 1]} : vector<2x64xf32> to vector<2x32xf32>
    %458 = vector.extract_strided_slice %447 {offsets = [0, 64], sizes = [2, 32], strides = [1, 1]} : vector<2x96xf32> to vector<2x32xf32>
    %459 = vector.extract_strided_slice %446 {offsets = [0, 64], sizes = [2, 32], strides = [1, 1]} : vector<2x96xf32> to vector<2x32xf32>
    %460 = arith.mulf %456, %459 : vector<2x32xf32>
    %461 = arith.addf %458, %460 : vector<2x32xf32>
    %462 = math.tanh %461 : vector<2x32xf32>
    %cst_91 = arith.constant 1.000000e+00 : f32
    %463 = vector.broadcast %cst_91 : f32 to vector<2x32xf32>
    %464 = arith.subf %463, %457 : vector<2x32xf32>
    %465 = arith.mulf %464, %462 : vector<2x32xf32>
    %466 = arith.mulf %457, %420 : vector<2x32xf32>
    %467 = arith.addf %465, %466 : vector<2x32xf32>
    %468 = vector.extract_strided_slice %445 {offsets = [0, 128], sizes = [2, 96], strides = [1, 1]} : vector<2x384xf32> to vector<2x96xf32>
    %469 = vector.extract_strided_slice %445 {offsets = [0, 256], sizes = [2, 96], strides = [1, 1]} : vector<2x384xf32> to vector<2x96xf32>
    %470 = vector.extract_strided_slice %469 {offsets = [0, 0], sizes = [2, 64], strides = [1, 1]} : vector<2x96xf32> to vector<2x64xf32>
    %471 = vector.extract_strided_slice %468 {offsets = [0, 0], sizes = [2, 64], strides = [1, 1]} : vector<2x96xf32> to vector<2x64xf32>
    %472 = arith.addf %470, %471 : vector<2x64xf32>
    %473 = arith.negf %472 : vector<2x64xf32>
    %474 = math.exp %473 : vector<2x64xf32>
    %cst_92 = arith.constant 1.000000e+00 : f32
    %475 = vector.broadcast %cst_92 : f32 to vector<2x64xf32>
    %476 = arith.addf %475, %474 : vector<2x64xf32>
    %477 = arith.divf %475, %476 : vector<2x64xf32>
    %478 = vector.extract_strided_slice %477 {offsets = [0, 0], sizes = [2, 32], strides = [1, 1]} : vector<2x64xf32> to vector<2x32xf32>
    %479 = vector.extract_strided_slice %477 {offsets = [0, 32], sizes = [2, 32], strides = [1, 1]} : vector<2x64xf32> to vector<2x32xf32>
    %480 = vector.extract_strided_slice %469 {offsets = [0, 64], sizes = [2, 32], strides = [1, 1]} : vector<2x96xf32> to vector<2x32xf32>
    %481 = vector.extract_strided_slice %468 {offsets = [0, 64], sizes = [2, 32], strides = [1, 1]} : vector<2x96xf32> to vector<2x32xf32>
    %482 = arith.mulf %478, %481 : vector<2x32xf32>
    %483 = arith.addf %480, %482 : vector<2x32xf32>
    %484 = math.tanh %483 : vector<2x32xf32>
    %cst_93 = arith.constant 1.000000e+00 : f32
    %485 = vector.broadcast %cst_93 : f32 to vector<2x32xf32>
    %486 = arith.subf %485, %479 : vector<2x32xf32>
    %487 = arith.mulf %486, %484 : vector<2x32xf32>
    %488 = arith.mulf %479, %442 : vector<2x32xf32>
    %489 = arith.addf %487, %488 : vector<2x32xf32>
    %490 = tpu.concatenate %467, %489, %41 in 1 : vector<2x32xf32>, vector<2x32xf32>, vector<2x1xf32> -> vector<2x65xf32>
    %c0_94 = arith.constant 0 : index
    %c0_95 = arith.constant 0 : index
    %491 = vector.load %arg6[%c0_94, %c0_95] : memref<65x384xf32, #tpu.memory_space<vmem>>, vector<65x384xf32>
    %cst_96 = arith.constant dense<0.000000e+00> : vector<2x384xf32>
    %492 = tpu.matmul %490, %491, %cst_96 {dimension_numbers = #tpu.dot_dimension_numbers<[1], [0], [0], [1], [0, 0, 1, 1], [], []>} : vector<2x65xf32>, vector<65x384xf32>, vector<2x384xf32> -> vector<2x384xf32>
    %493 = vector.extract_strided_slice %492 {offsets = [0, 0], sizes = [2, 96], strides = [1, 1]} : vector<2x384xf32> to vector<2x96xf32>
    %494 = vector.extract_strided_slice %38 {offsets = [20, 0], sizes = [2, 96], strides = [1, 1]} : vector<32x128xf32> to vector<2x96xf32>
    %495 = vector.extract_strided_slice %494 {offsets = [0, 0], sizes = [2, 64], strides = [1, 1]} : vector<2x96xf32> to vector<2x64xf32>
    %496 = vector.extract_strided_slice %493 {offsets = [0, 0], sizes = [2, 64], strides = [1, 1]} : vector<2x96xf32> to vector<2x64xf32>
    %497 = arith.addf %495, %496 : vector<2x64xf32>
    %498 = arith.negf %497 : vector<2x64xf32>
    %499 = math.exp %498 : vector<2x64xf32>
    %cst_97 = arith.constant 1.000000e+00 : f32
    %500 = vector.broadcast %cst_97 : f32 to vector<2x64xf32>
    %501 = arith.addf %500, %499 : vector<2x64xf32>
    %502 = arith.divf %500, %501 : vector<2x64xf32>
    %503 = vector.extract_strided_slice %502 {offsets = [0, 0], sizes = [2, 32], strides = [1, 1]} : vector<2x64xf32> to vector<2x32xf32>
    %504 = vector.extract_strided_slice %502 {offsets = [0, 32], sizes = [2, 32], strides = [1, 1]} : vector<2x64xf32> to vector<2x32xf32>
    %505 = vector.extract_strided_slice %494 {offsets = [0, 64], sizes = [2, 32], strides = [1, 1]} : vector<2x96xf32> to vector<2x32xf32>
    %506 = vector.extract_strided_slice %493 {offsets = [0, 64], sizes = [2, 32], strides = [1, 1]} : vector<2x96xf32> to vector<2x32xf32>
    %507 = arith.mulf %503, %506 : vector<2x32xf32>
    %508 = arith.addf %505, %507 : vector<2x32xf32>
    %509 = math.tanh %508 : vector<2x32xf32>
    %cst_98 = arith.constant 1.000000e+00 : f32
    %510 = vector.broadcast %cst_98 : f32 to vector<2x32xf32>
    %511 = arith.subf %510, %504 : vector<2x32xf32>
    %512 = arith.mulf %511, %509 : vector<2x32xf32>
    %513 = arith.mulf %504, %467 : vector<2x32xf32>
    %514 = arith.addf %512, %513 : vector<2x32xf32>
    %515 = vector.extract_strided_slice %492 {offsets = [0, 128], sizes = [2, 96], strides = [1, 1]} : vector<2x384xf32> to vector<2x96xf32>
    %516 = vector.extract_strided_slice %492 {offsets = [0, 256], sizes = [2, 96], strides = [1, 1]} : vector<2x384xf32> to vector<2x96xf32>
    %517 = vector.extract_strided_slice %516 {offsets = [0, 0], sizes = [2, 64], strides = [1, 1]} : vector<2x96xf32> to vector<2x64xf32>
    %518 = vector.extract_strided_slice %515 {offsets = [0, 0], sizes = [2, 64], strides = [1, 1]} : vector<2x96xf32> to vector<2x64xf32>
    %519 = arith.addf %517, %518 : vector<2x64xf32>
    %520 = arith.negf %519 : vector<2x64xf32>
    %521 = math.exp %520 : vector<2x64xf32>
    %cst_99 = arith.constant 1.000000e+00 : f32
    %522 = vector.broadcast %cst_99 : f32 to vector<2x64xf32>
    %523 = arith.addf %522, %521 : vector<2x64xf32>
    %524 = arith.divf %522, %523 : vector<2x64xf32>
    %525 = vector.extract_strided_slice %524 {offsets = [0, 0], sizes = [2, 32], strides = [1, 1]} : vector<2x64xf32> to vector<2x32xf32>
    %526 = vector.extract_strided_slice %524 {offsets = [0, 32], sizes = [2, 32], strides = [1, 1]} : vector<2x64xf32> to vector<2x32xf32>
    %527 = vector.extract_strided_slice %516 {offsets = [0, 64], sizes = [2, 32], strides = [1, 1]} : vector<2x96xf32> to vector<2x32xf32>
    %528 = vector.extract_strided_slice %515 {offsets = [0, 64], sizes = [2, 32], strides = [1, 1]} : vector<2x96xf32> to vector<2x32xf32>
    %529 = arith.mulf %525, %528 : vector<2x32xf32>
    %530 = arith.addf %527, %529 : vector<2x32xf32>
    %531 = math.tanh %530 : vector<2x32xf32>
    %cst_100 = arith.constant 1.000000e+00 : f32
    %532 = vector.broadcast %cst_100 : f32 to vector<2x32xf32>
    %533 = arith.subf %532, %526 : vector<2x32xf32>
    %534 = arith.mulf %533, %531 : vector<2x32xf32>
    %535 = arith.mulf %526, %489 : vector<2x32xf32>
    %536 = arith.addf %534, %535 : vector<2x32xf32>
    %537 = tpu.concatenate %514, %536, %41 in 1 : vector<2x32xf32>, vector<2x32xf32>, vector<2x1xf32> -> vector<2x65xf32>
    %c0_101 = arith.constant 0 : index
    %c0_102 = arith.constant 0 : index
    %538 = vector.load %arg6[%c0_101, %c0_102] : memref<65x384xf32, #tpu.memory_space<vmem>>, vector<65x384xf32>
    %cst_103 = arith.constant dense<0.000000e+00> : vector<2x384xf32>
    %539 = tpu.matmul %537, %538, %cst_103 {dimension_numbers = #tpu.dot_dimension_numbers<[1], [0], [0], [1], [0, 0, 1, 1], [], []>} : vector<2x65xf32>, vector<65x384xf32>, vector<2x384xf32> -> vector<2x384xf32>
    %540 = vector.extract_strided_slice %539 {offsets = [0, 0], sizes = [2, 96], strides = [1, 1]} : vector<2x384xf32> to vector<2x96xf32>
    %541 = vector.extract_strided_slice %38 {offsets = [22, 0], sizes = [2, 96], strides = [1, 1]} : vector<32x128xf32> to vector<2x96xf32>
    %542 = vector.extract_strided_slice %541 {offsets = [0, 0], sizes = [2, 64], strides = [1, 1]} : vector<2x96xf32> to vector<2x64xf32>
    %543 = vector.extract_strided_slice %540 {offsets = [0, 0], sizes = [2, 64], strides = [1, 1]} : vector<2x96xf32> to vector<2x64xf32>
    %544 = arith.addf %542, %543 : vector<2x64xf32>
    %545 = arith.negf %544 : vector<2x64xf32>
    %546 = math.exp %545 : vector<2x64xf32>
    %cst_104 = arith.constant 1.000000e+00 : f32
    %547 = vector.broadcast %cst_104 : f32 to vector<2x64xf32>
    %548 = arith.addf %547, %546 : vector<2x64xf32>
    %549 = arith.divf %547, %548 : vector<2x64xf32>
    %550 = vector.extract_strided_slice %549 {offsets = [0, 0], sizes = [2, 32], strides = [1, 1]} : vector<2x64xf32> to vector<2x32xf32>
    %551 = vector.extract_strided_slice %549 {offsets = [0, 32], sizes = [2, 32], strides = [1, 1]} : vector<2x64xf32> to vector<2x32xf32>
    %552 = vector.extract_strided_slice %541 {offsets = [0, 64], sizes = [2, 32], strides = [1, 1]} : vector<2x96xf32> to vector<2x32xf32>
    %553 = vector.extract_strided_slice %540 {offsets = [0, 64], sizes = [2, 32], strides = [1, 1]} : vector<2x96xf32> to vector<2x32xf32>
    %554 = arith.mulf %550, %553 : vector<2x32xf32>
    %555 = arith.addf %552, %554 : vector<2x32xf32>
    %556 = math.tanh %555 : vector<2x32xf32>
    %cst_105 = arith.constant 1.000000e+00 : f32
    %557 = vector.broadcast %cst_105 : f32 to vector<2x32xf32>
    %558 = arith.subf %557, %551 : vector<2x32xf32>
    %559 = arith.mulf %558, %556 : vector<2x32xf32>
    %560 = arith.mulf %551, %514 : vector<2x32xf32>
    %561 = arith.addf %559, %560 : vector<2x32xf32>
    %562 = vector.extract_strided_slice %539 {offsets = [0, 128], sizes = [2, 96], strides = [1, 1]} : vector<2x384xf32> to vector<2x96xf32>
    %563 = vector.extract_strided_slice %539 {offsets = [0, 256], sizes = [2, 96], strides = [1, 1]} : vector<2x384xf32> to vector<2x96xf32>
    %564 = vector.extract_strided_slice %563 {offsets = [0, 0], sizes = [2, 64], strides = [1, 1]} : vector<2x96xf32> to vector<2x64xf32>
    %565 = vector.extract_strided_slice %562 {offsets = [0, 0], sizes = [2, 64], strides = [1, 1]} : vector<2x96xf32> to vector<2x64xf32>
    %566 = arith.addf %564, %565 : vector<2x64xf32>
    %567 = arith.negf %566 : vector<2x64xf32>
    %568 = math.exp %567 : vector<2x64xf32>
    %cst_106 = arith.constant 1.000000e+00 : f32
    %569 = vector.broadcast %cst_106 : f32 to vector<2x64xf32>
    %570 = arith.addf %569, %568 : vector<2x64xf32>
    %571 = arith.divf %569, %570 : vector<2x64xf32>
    %572 = vector.extract_strided_slice %571 {offsets = [0, 0], sizes = [2, 32], strides = [1, 1]} : vector<2x64xf32> to vector<2x32xf32>
    %573 = vector.extract_strided_slice %571 {offsets = [0, 32], sizes = [2, 32], strides = [1, 1]} : vector<2x64xf32> to vector<2x32xf32>
    %574 = vector.extract_strided_slice %563 {offsets = [0, 64], sizes = [2, 32], strides = [1, 1]} : vector<2x96xf32> to vector<2x32xf32>
    %575 = vector.extract_strided_slice %562 {offsets = [0, 64], sizes = [2, 32], strides = [1, 1]} : vector<2x96xf32> to vector<2x32xf32>
    %576 = arith.mulf %572, %575 : vector<2x32xf32>
    %577 = arith.addf %574, %576 : vector<2x32xf32>
    %578 = math.tanh %577 : vector<2x32xf32>
    %cst_107 = arith.constant 1.000000e+00 : f32
    %579 = vector.broadcast %cst_107 : f32 to vector<2x32xf32>
    %580 = arith.subf %579, %573 : vector<2x32xf32>
    %581 = arith.mulf %580, %578 : vector<2x32xf32>
    %582 = arith.mulf %573, %536 : vector<2x32xf32>
    %583 = arith.addf %581, %582 : vector<2x32xf32>
    %584 = tpu.concatenate %561, %583, %41 in 1 : vector<2x32xf32>, vector<2x32xf32>, vector<2x1xf32> -> vector<2x65xf32>
    %c0_108 = arith.constant 0 : index
    %c0_109 = arith.constant 0 : index
    %585 = vector.load %arg6[%c0_108, %c0_109] : memref<65x384xf32, #tpu.memory_space<vmem>>, vector<65x384xf32>
    %cst_110 = arith.constant dense<0.000000e+00> : vector<2x384xf32>
    %586 = tpu.matmul %584, %585, %cst_110 {dimension_numbers = #tpu.dot_dimension_numbers<[1], [0], [0], [1], [0, 0, 1, 1], [], []>} : vector<2x65xf32>, vector<65x384xf32>, vector<2x384xf32> -> vector<2x384xf32>
    %587 = vector.extract_strided_slice %586 {offsets = [0, 0], sizes = [2, 96], strides = [1, 1]} : vector<2x384xf32> to vector<2x96xf32>
    %588 = vector.extract_strided_slice %38 {offsets = [24, 0], sizes = [2, 96], strides = [1, 1]} : vector<32x128xf32> to vector<2x96xf32>
    %589 = vector.extract_strided_slice %588 {offsets = [0, 0], sizes = [2, 64], strides = [1, 1]} : vector<2x96xf32> to vector<2x64xf32>
    %590 = vector.extract_strided_slice %587 {offsets = [0, 0], sizes = [2, 64], strides = [1, 1]} : vector<2x96xf32> to vector<2x64xf32>
    %591 = arith.addf %589, %590 : vector<2x64xf32>
    %592 = arith.negf %591 : vector<2x64xf32>
    %593 = math.exp %592 : vector<2x64xf32>
    %cst_111 = arith.constant 1.000000e+00 : f32
    %594 = vector.broadcast %cst_111 : f32 to vector<2x64xf32>
    %595 = arith.addf %594, %593 : vector<2x64xf32>
    %596 = arith.divf %594, %595 : vector<2x64xf32>
    %597 = vector.extract_strided_slice %596 {offsets = [0, 0], sizes = [2, 32], strides = [1, 1]} : vector<2x64xf32> to vector<2x32xf32>
    %598 = vector.extract_strided_slice %596 {offsets = [0, 32], sizes = [2, 32], strides = [1, 1]} : vector<2x64xf32> to vector<2x32xf32>
    %599 = vector.extract_strided_slice %588 {offsets = [0, 64], sizes = [2, 32], strides = [1, 1]} : vector<2x96xf32> to vector<2x32xf32>
    %600 = vector.extract_strided_slice %587 {offsets = [0, 64], sizes = [2, 32], strides = [1, 1]} : vector<2x96xf32> to vector<2x32xf32>
    %601 = arith.mulf %597, %600 : vector<2x32xf32>
    %602 = arith.addf %599, %601 : vector<2x32xf32>
    %603 = math.tanh %602 : vector<2x32xf32>
    %cst_112 = arith.constant 1.000000e+00 : f32
    %604 = vector.broadcast %cst_112 : f32 to vector<2x32xf32>
    %605 = arith.subf %604, %598 : vector<2x32xf32>
    %606 = arith.mulf %605, %603 : vector<2x32xf32>
    %607 = arith.mulf %598, %561 : vector<2x32xf32>
    %608 = arith.addf %606, %607 : vector<2x32xf32>
    %609 = vector.extract_strided_slice %586 {offsets = [0, 128], sizes = [2, 96], strides = [1, 1]} : vector<2x384xf32> to vector<2x96xf32>
    %610 = vector.extract_strided_slice %586 {offsets = [0, 256], sizes = [2, 96], strides = [1, 1]} : vector<2x384xf32> to vector<2x96xf32>
    %611 = vector.extract_strided_slice %610 {offsets = [0, 0], sizes = [2, 64], strides = [1, 1]} : vector<2x96xf32> to vector<2x64xf32>
    %612 = vector.extract_strided_slice %609 {offsets = [0, 0], sizes = [2, 64], strides = [1, 1]} : vector<2x96xf32> to vector<2x64xf32>
    %613 = arith.addf %611, %612 : vector<2x64xf32>
    %614 = arith.negf %613 : vector<2x64xf32>
    %615 = math.exp %614 : vector<2x64xf32>
    %cst_113 = arith.constant 1.000000e+00 : f32
    %616 = vector.broadcast %cst_113 : f32 to vector<2x64xf32>
    %617 = arith.addf %616, %615 : vector<2x64xf32>
    %618 = arith.divf %616, %617 : vector<2x64xf32>
    %619 = vector.extract_strided_slice %618 {offsets = [0, 0], sizes = [2, 32], strides = [1, 1]} : vector<2x64xf32> to vector<2x32xf32>
    %620 = vector.extract_strided_slice %618 {offsets = [0, 32], sizes = [2, 32], strides = [1, 1]} : vector<2x64xf32> to vector<2x32xf32>
    %621 = vector.extract_strided_slice %610 {offsets = [0, 64], sizes = [2, 32], strides = [1, 1]} : vector<2x96xf32> to vector<2x32xf32>
    %622 = vector.extract_strided_slice %609 {offsets = [0, 64], sizes = [2, 32], strides = [1, 1]} : vector<2x96xf32> to vector<2x32xf32>
    %623 = arith.mulf %619, %622 : vector<2x32xf32>
    %624 = arith.addf %621, %623 : vector<2x32xf32>
    %625 = math.tanh %624 : vector<2x32xf32>
    %cst_114 = arith.constant 1.000000e+00 : f32
    %626 = vector.broadcast %cst_114 : f32 to vector<2x32xf32>
    %627 = arith.subf %626, %620 : vector<2x32xf32>
    %628 = arith.mulf %627, %625 : vector<2x32xf32>
    %629 = arith.mulf %620, %583 : vector<2x32xf32>
    %630 = arith.addf %628, %629 : vector<2x32xf32>
    %631 = tpu.concatenate %608, %630, %41 in 1 : vector<2x32xf32>, vector<2x32xf32>, vector<2x1xf32> -> vector<2x65xf32>
    %c0_115 = arith.constant 0 : index
    %c0_116 = arith.constant 0 : index
    %632 = vector.load %arg6[%c0_115, %c0_116] : memref<65x384xf32, #tpu.memory_space<vmem>>, vector<65x384xf32>
    %cst_117 = arith.constant dense<0.000000e+00> : vector<2x384xf32>
    %633 = tpu.matmul %631, %632, %cst_117 {dimension_numbers = #tpu.dot_dimension_numbers<[1], [0], [0], [1], [0, 0, 1, 1], [], []>} : vector<2x65xf32>, vector<65x384xf32>, vector<2x384xf32> -> vector<2x384xf32>
    %634 = vector.extract_strided_slice %633 {offsets = [0, 0], sizes = [2, 96], strides = [1, 1]} : vector<2x384xf32> to vector<2x96xf32>
    %635 = vector.extract_strided_slice %38 {offsets = [26, 0], sizes = [2, 96], strides = [1, 1]} : vector<32x128xf32> to vector<2x96xf32>
    %636 = vector.extract_strided_slice %635 {offsets = [0, 0], sizes = [2, 64], strides = [1, 1]} : vector<2x96xf32> to vector<2x64xf32>
    %637 = vector.extract_strided_slice %634 {offsets = [0, 0], sizes = [2, 64], strides = [1, 1]} : vector<2x96xf32> to vector<2x64xf32>
    %638 = arith.addf %636, %637 : vector<2x64xf32>
    %639 = arith.negf %638 : vector<2x64xf32>
    %640 = math.exp %639 : vector<2x64xf32>
    %cst_118 = arith.constant 1.000000e+00 : f32
    %641 = vector.broadcast %cst_118 : f32 to vector<2x64xf32>
    %642 = arith.addf %641, %640 : vector<2x64xf32>
    %643 = arith.divf %641, %642 : vector<2x64xf32>
    %644 = vector.extract_strided_slice %643 {offsets = [0, 0], sizes = [2, 32], strides = [1, 1]} : vector<2x64xf32> to vector<2x32xf32>
    %645 = vector.extract_strided_slice %643 {offsets = [0, 32], sizes = [2, 32], strides = [1, 1]} : vector<2x64xf32> to vector<2x32xf32>
    %646 = vector.extract_strided_slice %635 {offsets = [0, 64], sizes = [2, 32], strides = [1, 1]} : vector<2x96xf32> to vector<2x32xf32>
    %647 = vector.extract_strided_slice %634 {offsets = [0, 64], sizes = [2, 32], strides = [1, 1]} : vector<2x96xf32> to vector<2x32xf32>
    %648 = arith.mulf %644, %647 : vector<2x32xf32>
    %649 = arith.addf %646, %648 : vector<2x32xf32>
    %650 = math.tanh %649 : vector<2x32xf32>
    %cst_119 = arith.constant 1.000000e+00 : f32
    %651 = vector.broadcast %cst_119 : f32 to vector<2x32xf32>
    %652 = arith.subf %651, %645 : vector<2x32xf32>
    %653 = arith.mulf %652, %650 : vector<2x32xf32>
    %654 = arith.mulf %645, %608 : vector<2x32xf32>
    %655 = arith.addf %653, %654 : vector<2x32xf32>
    %656 = vector.extract_strided_slice %633 {offsets = [0, 128], sizes = [2, 96], strides = [1, 1]} : vector<2x384xf32> to vector<2x96xf32>
    %657 = vector.extract_strided_slice %633 {offsets = [0, 256], sizes = [2, 96], strides = [1, 1]} : vector<2x384xf32> to vector<2x96xf32>
    %658 = vector.extract_strided_slice %657 {offsets = [0, 0], sizes = [2, 64], strides = [1, 1]} : vector<2x96xf32> to vector<2x64xf32>
    %659 = vector.extract_strided_slice %656 {offsets = [0, 0], sizes = [2, 64], strides = [1, 1]} : vector<2x96xf32> to vector<2x64xf32>
    %660 = arith.addf %658, %659 : vector<2x64xf32>
    %661 = arith.negf %660 : vector<2x64xf32>
    %662 = math.exp %661 : vector<2x64xf32>
    %cst_120 = arith.constant 1.000000e+00 : f32
    %663 = vector.broadcast %cst_120 : f32 to vector<2x64xf32>
    %664 = arith.addf %663, %662 : vector<2x64xf32>
    %665 = arith.divf %663, %664 : vector<2x64xf32>
    %666 = vector.extract_strided_slice %665 {offsets = [0, 0], sizes = [2, 32], strides = [1, 1]} : vector<2x64xf32> to vector<2x32xf32>
    %667 = vector.extract_strided_slice %665 {offsets = [0, 32], sizes = [2, 32], strides = [1, 1]} : vector<2x64xf32> to vector<2x32xf32>
    %668 = vector.extract_strided_slice %657 {offsets = [0, 64], sizes = [2, 32], strides = [1, 1]} : vector<2x96xf32> to vector<2x32xf32>
    %669 = vector.extract_strided_slice %656 {offsets = [0, 64], sizes = [2, 32], strides = [1, 1]} : vector<2x96xf32> to vector<2x32xf32>
    %670 = arith.mulf %666, %669 : vector<2x32xf32>
    %671 = arith.addf %668, %670 : vector<2x32xf32>
    %672 = math.tanh %671 : vector<2x32xf32>
    %cst_121 = arith.constant 1.000000e+00 : f32
    %673 = vector.broadcast %cst_121 : f32 to vector<2x32xf32>
    %674 = arith.subf %673, %667 : vector<2x32xf32>
    %675 = arith.mulf %674, %672 : vector<2x32xf32>
    %676 = arith.mulf %667, %630 : vector<2x32xf32>
    %677 = arith.addf %675, %676 : vector<2x32xf32>
    %678 = tpu.concatenate %655, %677, %41 in 1 : vector<2x32xf32>, vector<2x32xf32>, vector<2x1xf32> -> vector<2x65xf32>
    %c0_122 = arith.constant 0 : index
    %c0_123 = arith.constant 0 : index
    %679 = vector.load %arg6[%c0_122, %c0_123] : memref<65x384xf32, #tpu.memory_space<vmem>>, vector<65x384xf32>
    %cst_124 = arith.constant dense<0.000000e+00> : vector<2x384xf32>
    %680 = tpu.matmul %678, %679, %cst_124 {dimension_numbers = #tpu.dot_dimension_numbers<[1], [0], [0], [1], [0, 0, 1, 1], [], []>} : vector<2x65xf32>, vector<65x384xf32>, vector<2x384xf32> -> vector<2x384xf32>
    %681 = vector.extract_strided_slice %680 {offsets = [0, 0], sizes = [2, 96], strides = [1, 1]} : vector<2x384xf32> to vector<2x96xf32>
    %682 = vector.extract_strided_slice %38 {offsets = [28, 0], sizes = [2, 96], strides = [1, 1]} : vector<32x128xf32> to vector<2x96xf32>
    %683 = vector.extract_strided_slice %682 {offsets = [0, 0], sizes = [2, 64], strides = [1, 1]} : vector<2x96xf32> to vector<2x64xf32>
    %684 = vector.extract_strided_slice %681 {offsets = [0, 0], sizes = [2, 64], strides = [1, 1]} : vector<2x96xf32> to vector<2x64xf32>
    %685 = arith.addf %683, %684 : vector<2x64xf32>
    %686 = arith.negf %685 : vector<2x64xf32>
    %687 = math.exp %686 : vector<2x64xf32>
    %cst_125 = arith.constant 1.000000e+00 : f32
    %688 = vector.broadcast %cst_125 : f32 to vector<2x64xf32>
    %689 = arith.addf %688, %687 : vector<2x64xf32>
    %690 = arith.divf %688, %689 : vector<2x64xf32>
    %691 = vector.extract_strided_slice %690 {offsets = [0, 0], sizes = [2, 32], strides = [1, 1]} : vector<2x64xf32> to vector<2x32xf32>
    %692 = vector.extract_strided_slice %690 {offsets = [0, 32], sizes = [2, 32], strides = [1, 1]} : vector<2x64xf32> to vector<2x32xf32>
    %693 = vector.extract_strided_slice %682 {offsets = [0, 64], sizes = [2, 32], strides = [1, 1]} : vector<2x96xf32> to vector<2x32xf32>
    %694 = vector.extract_strided_slice %681 {offsets = [0, 64], sizes = [2, 32], strides = [1, 1]} : vector<2x96xf32> to vector<2x32xf32>
    %695 = arith.mulf %691, %694 : vector<2x32xf32>
    %696 = arith.addf %693, %695 : vector<2x32xf32>
    %697 = math.tanh %696 : vector<2x32xf32>
    %cst_126 = arith.constant 1.000000e+00 : f32
    %698 = vector.broadcast %cst_126 : f32 to vector<2x32xf32>
    %699 = arith.subf %698, %692 : vector<2x32xf32>
    %700 = arith.mulf %699, %697 : vector<2x32xf32>
    %701 = arith.mulf %692, %655 : vector<2x32xf32>
    %702 = arith.addf %700, %701 : vector<2x32xf32>
    %703 = vector.extract_strided_slice %680 {offsets = [0, 128], sizes = [2, 96], strides = [1, 1]} : vector<2x384xf32> to vector<2x96xf32>
    %704 = vector.extract_strided_slice %680 {offsets = [0, 256], sizes = [2, 96], strides = [1, 1]} : vector<2x384xf32> to vector<2x96xf32>
    %705 = vector.extract_strided_slice %704 {offsets = [0, 0], sizes = [2, 64], strides = [1, 1]} : vector<2x96xf32> to vector<2x64xf32>
    %706 = vector.extract_strided_slice %703 {offsets = [0, 0], sizes = [2, 64], strides = [1, 1]} : vector<2x96xf32> to vector<2x64xf32>
    %707 = arith.addf %705, %706 : vector<2x64xf32>
    %708 = arith.negf %707 : vector<2x64xf32>
    %709 = math.exp %708 : vector<2x64xf32>
    %cst_127 = arith.constant 1.000000e+00 : f32
    %710 = vector.broadcast %cst_127 : f32 to vector<2x64xf32>
    %711 = arith.addf %710, %709 : vector<2x64xf32>
    %712 = arith.divf %710, %711 : vector<2x64xf32>
    %713 = vector.extract_strided_slice %712 {offsets = [0, 0], sizes = [2, 32], strides = [1, 1]} : vector<2x64xf32> to vector<2x32xf32>
    %714 = vector.extract_strided_slice %712 {offsets = [0, 32], sizes = [2, 32], strides = [1, 1]} : vector<2x64xf32> to vector<2x32xf32>
    %715 = vector.extract_strided_slice %704 {offsets = [0, 64], sizes = [2, 32], strides = [1, 1]} : vector<2x96xf32> to vector<2x32xf32>
    %716 = vector.extract_strided_slice %703 {offsets = [0, 64], sizes = [2, 32], strides = [1, 1]} : vector<2x96xf32> to vector<2x32xf32>
    %717 = arith.mulf %713, %716 : vector<2x32xf32>
    %718 = arith.addf %715, %717 : vector<2x32xf32>
    %719 = math.tanh %718 : vector<2x32xf32>
    %cst_128 = arith.constant 1.000000e+00 : f32
    %720 = vector.broadcast %cst_128 : f32 to vector<2x32xf32>
    %721 = arith.subf %720, %714 : vector<2x32xf32>
    %722 = arith.mulf %721, %719 : vector<2x32xf32>
    %723 = arith.mulf %714, %677 : vector<2x32xf32>
    %724 = arith.addf %722, %723 : vector<2x32xf32>
    %725 = tpu.concatenate %702, %724, %41 in 1 : vector<2x32xf32>, vector<2x32xf32>, vector<2x1xf32> -> vector<2x65xf32>
    %c0_129 = arith.constant 0 : index
    %c0_130 = arith.constant 0 : index
    %726 = vector.load %arg6[%c0_129, %c0_130] : memref<65x384xf32, #tpu.memory_space<vmem>>, vector<65x384xf32>
    %cst_131 = arith.constant dense<0.000000e+00> : vector<2x384xf32>
    %727 = tpu.matmul %725, %726, %cst_131 {dimension_numbers = #tpu.dot_dimension_numbers<[1], [0], [0], [1], [0, 0, 1, 1], [], []>} : vector<2x65xf32>, vector<65x384xf32>, vector<2x384xf32> -> vector<2x384xf32>
    %728 = vector.extract_strided_slice %727 {offsets = [0, 0], sizes = [2, 96], strides = [1, 1]} : vector<2x384xf32> to vector<2x96xf32>
    %729 = vector.extract_strided_slice %38 {offsets = [30, 0], sizes = [2, 96], strides = [1, 1]} : vector<32x128xf32> to vector<2x96xf32>
    %730 = vector.extract_strided_slice %729 {offsets = [0, 0], sizes = [2, 64], strides = [1, 1]} : vector<2x96xf32> to vector<2x64xf32>
    %731 = vector.extract_strided_slice %728 {offsets = [0, 0], sizes = [2, 64], strides = [1, 1]} : vector<2x96xf32> to vector<2x64xf32>
    %732 = arith.addf %730, %731 : vector<2x64xf32>
    %733 = arith.negf %732 : vector<2x64xf32>
    %734 = math.exp %733 : vector<2x64xf32>
    %cst_132 = arith.constant 1.000000e+00 : f32
    %735 = vector.broadcast %cst_132 : f32 to vector<2x64xf32>
    %736 = arith.addf %735, %734 : vector<2x64xf32>
    %737 = arith.divf %735, %736 : vector<2x64xf32>
    %738 = vector.extract_strided_slice %737 {offsets = [0, 0], sizes = [2, 32], strides = [1, 1]} : vector<2x64xf32> to vector<2x32xf32>
    %739 = vector.extract_strided_slice %737 {offsets = [0, 32], sizes = [2, 32], strides = [1, 1]} : vector<2x64xf32> to vector<2x32xf32>
    %740 = vector.extract_strided_slice %729 {offsets = [0, 64], sizes = [2, 32], strides = [1, 1]} : vector<2x96xf32> to vector<2x32xf32>
    %741 = vector.extract_strided_slice %728 {offsets = [0, 64], sizes = [2, 32], strides = [1, 1]} : vector<2x96xf32> to vector<2x32xf32>
    %742 = arith.mulf %738, %741 : vector<2x32xf32>
    %743 = arith.addf %740, %742 : vector<2x32xf32>
    %744 = math.tanh %743 : vector<2x32xf32>
    %cst_133 = arith.constant 1.000000e+00 : f32
    %745 = vector.broadcast %cst_133 : f32 to vector<2x32xf32>
    %746 = arith.subf %745, %739 : vector<2x32xf32>
    %747 = arith.mulf %746, %744 : vector<2x32xf32>
    %748 = arith.mulf %739, %702 : vector<2x32xf32>
    %749 = arith.addf %747, %748 : vector<2x32xf32>
    %750 = vector.extract_strided_slice %727 {offsets = [0, 128], sizes = [2, 96], strides = [1, 1]} : vector<2x384xf32> to vector<2x96xf32>
    %751 = vector.extract_strided_slice %727 {offsets = [0, 256], sizes = [2, 96], strides = [1, 1]} : vector<2x384xf32> to vector<2x96xf32>
    %752 = vector.extract_strided_slice %751 {offsets = [0, 0], sizes = [2, 64], strides = [1, 1]} : vector<2x96xf32> to vector<2x64xf32>
    %753 = vector.extract_strided_slice %750 {offsets = [0, 0], sizes = [2, 64], strides = [1, 1]} : vector<2x96xf32> to vector<2x64xf32>
    %754 = arith.addf %752, %753 : vector<2x64xf32>
    %755 = arith.negf %754 : vector<2x64xf32>
    %756 = math.exp %755 : vector<2x64xf32>
    %cst_134 = arith.constant 1.000000e+00 : f32
    %757 = vector.broadcast %cst_134 : f32 to vector<2x64xf32>
    %758 = arith.addf %757, %756 : vector<2x64xf32>
    %759 = arith.divf %757, %758 : vector<2x64xf32>
    %760 = vector.extract_strided_slice %759 {offsets = [0, 0], sizes = [2, 32], strides = [1, 1]} : vector<2x64xf32> to vector<2x32xf32>
    %761 = vector.extract_strided_slice %759 {offsets = [0, 32], sizes = [2, 32], strides = [1, 1]} : vector<2x64xf32> to vector<2x32xf32>
    %762 = vector.extract_strided_slice %751 {offsets = [0, 64], sizes = [2, 32], strides = [1, 1]} : vector<2x96xf32> to vector<2x32xf32>
    %763 = vector.extract_strided_slice %750 {offsets = [0, 64], sizes = [2, 32], strides = [1, 1]} : vector<2x96xf32> to vector<2x32xf32>
    %764 = arith.mulf %760, %763 : vector<2x32xf32>
    %765 = arith.addf %762, %764 : vector<2x32xf32>
    %766 = math.tanh %765 : vector<2x32xf32>
    %cst_135 = arith.constant 1.000000e+00 : f32
    %767 = vector.broadcast %cst_135 : f32 to vector<2x32xf32>
    %768 = arith.subf %767, %761 : vector<2x32xf32>
    %769 = arith.mulf %768, %766 : vector<2x32xf32>
    %770 = arith.mulf %761, %724 : vector<2x32xf32>
    %771 = arith.addf %769, %770 : vector<2x32xf32>
    %772 = tpu.concatenate %749, %771, %41 in 1 : vector<2x32xf32>, vector<2x32xf32>, vector<2x1xf32> -> vector<2x65xf32>
    %c0_136 = arith.constant 0 : index
    %c0_137 = arith.constant 0 : index
    %773 = vector.load %arg6[%c0_136, %c0_137] : memref<65x384xf32, #tpu.memory_space<vmem>>, vector<65x384xf32>
    %cst_138 = arith.constant dense<0.000000e+00> : vector<2x384xf32>
    %774 = tpu.matmul %772, %773, %cst_138 {dimension_numbers = #tpu.dot_dimension_numbers<[1], [0], [0], [1], [0, 0, 1, 1], [], []>} : vector<2x65xf32>, vector<65x384xf32>, vector<2x384xf32> -> vector<2x384xf32>
    %775 = vector.extract_strided_slice %774 {offsets = [0, 128], sizes = [2, 96], strides = [1, 1]} : vector<2x384xf32> to vector<2x96xf32>
    %776 = vector.extract_strided_slice %774 {offsets = [0, 256], sizes = [2, 96], strides = [1, 1]} : vector<2x384xf32> to vector<2x96xf32>
    %777 = vector.extract_strided_slice %776 {offsets = [0, 0], sizes = [2, 64], strides = [1, 1]} : vector<2x96xf32> to vector<2x64xf32>
    %778 = vector.extract_strided_slice %775 {offsets = [0, 0], sizes = [2, 64], strides = [1, 1]} : vector<2x96xf32> to vector<2x64xf32>
    %779 = arith.addf %777, %778 : vector<2x64xf32>
    %780 = arith.negf %779 : vector<2x64xf32>
    %781 = math.exp %780 : vector<2x64xf32>
    %cst_139 = arith.constant 1.000000e+00 : f32
    %782 = vector.broadcast %cst_139 : f32 to vector<2x64xf32>
    %783 = arith.addf %782, %781 : vector<2x64xf32>
    %784 = arith.divf %782, %783 : vector<2x64xf32>
    %785 = vector.extract_strided_slice %784 {offsets = [0, 0], sizes = [2, 32], strides = [1, 1]} : vector<2x64xf32> to vector<2x32xf32>
    %786 = vector.extract_strided_slice %784 {offsets = [0, 32], sizes = [2, 32], strides = [1, 1]} : vector<2x64xf32> to vector<2x32xf32>
    %787 = vector.extract_strided_slice %776 {offsets = [0, 64], sizes = [2, 32], strides = [1, 1]} : vector<2x96xf32> to vector<2x32xf32>
    %788 = vector.extract_strided_slice %775 {offsets = [0, 64], sizes = [2, 32], strides = [1, 1]} : vector<2x96xf32> to vector<2x32xf32>
    %789 = arith.mulf %785, %788 : vector<2x32xf32>
    %790 = arith.addf %787, %789 : vector<2x32xf32>
    %791 = math.tanh %790 : vector<2x32xf32>
    %cst_140 = arith.constant 1.000000e+00 : f32
    %792 = vector.broadcast %cst_140 : f32 to vector<2x32xf32>
    %793 = arith.subf %792, %786 : vector<2x32xf32>
    %794 = arith.mulf %793, %791 : vector<2x32xf32>
    %795 = arith.mulf %786, %771 : vector<2x32xf32>
    %796 = arith.addf %794, %795 : vector<2x32xf32>
    %c0_141 = arith.constant 0 : index
    %c0_142 = arith.constant 0 : index
    %797 = vector.load %arg8[%c0_141, %c0_142] : memref<32x32xf32, #tpu.memory_space<vmem>>, vector<32x32xf32>
    %cst_143 = arith.constant dense<0.000000e+00> : vector<2x32xf32>
    %798 = tpu.matmul %796, %797, %cst_143 {dimension_numbers = #tpu.dot_dimension_numbers<[1], [0], [0], [1], [0, 0, 1, 1], [], []>} : vector<2x32xf32>, vector<32x32xf32>, vector<2x32xf32> -> vector<2x32xf32>
    %c0_144 = arith.constant 0 : index
    %c0_145 = arith.constant 0 : index
    %799 = vector.load %arg9[%c0_144, %c0_145] : memref<1x32xf32, #tpu.memory_space<vmem>>, vector<1x32xf32>
    %800 = vector.broadcast %799 : vector<1x32xf32> to vector<2x32xf32>
    %801 = arith.addf %798, %800 : vector<2x32xf32>
    %cst_146 = arith.constant 0.000000e+00 : f32
    %802 = vector.broadcast %cst_146 : f32 to vector<2x32xf32>
    %803 = arith.maximumf %801, %802 : vector<2x32xf32>
    %c0_147 = arith.constant 0 : index
    %c0_148 = arith.constant 0 : index
    %804 = vector.load %arg10[%c0_147, %c0_148] : memref<32x8xf32, #tpu.memory_space<vmem>>, vector<32x8xf32>
    %cst_149 = arith.constant dense<0.000000e+00> : vector<2x8xf32>
    %805 = tpu.matmul %803, %804, %cst_149 {dimension_numbers = #tpu.dot_dimension_numbers<[1], [0], [0], [1], [0, 0, 1, 1], [], []>} : vector<2x32xf32>, vector<32x8xf32>, vector<2x8xf32> -> vector<2x8xf32>
    %c0_150 = arith.constant 0 : index
    %c0_151 = arith.constant 0 : index
    %806 = vector.load %arg11[%c0_150, %c0_151] : memref<1x8xf32, #tpu.memory_space<vmem>>, vector<1x8xf32>
    %807 = vector.broadcast %806 : vector<1x8xf32> to vector<2x8xf32>
    %808 = arith.addf %805, %807 : vector<2x8xf32>
    %c0_152 = arith.constant 0 : index
    %c0_153 = arith.constant 0 : index
    %809 = vector.load %arg12[%c0_152, %c0_153] : memref<2x8xf32, #tpu.memory_space<vmem>>, vector<2x8xf32>
    tpu.vector_store %arg12[%c0_152, %c0_153], %808 {strides = array<i32>} : memref<2x8xf32, #tpu.memory_space<vmem>>, vector<2x8xf32>,
    return
  }
}

</mosaic_0001>

<bundles_post_ra>
// kernel: gcngru_pallas.1
= control target key start
LH: loop header
LB: loop body
LE: loop exit
PB: predicated region body
PF: predicated region fallthrough
CT: control target
= control target key end

     0   :  { %vm51_vm0 = vcmask 1043456   ;;  %vm47_vm1 = vcmask 31744   ;;  %s4802_s0 = inlined_call_operand.vmem [shape: f32[4,32], index: 0, kind: input, shape index: {}]   ;;  %s4803_s1 = inlined_call_operand.vmem [shape: f32[4,4], index: 1, kind: input, shape index: {}]   ;;  %s4804_s2 = inlined_call_operand.vmem [shape: f32[16,32], index: 2, kind: input, shape index: {}]   ;;  %s4805_s3 = inlined_call_operand.vmem [shape: f32[1,32], index: 3, kind: input, shape index: {}]   ;;  %s4806_s4 = inlined_call_operand.vmem [shape: f32[32,32], index: 4, kind: input, shape index: {}]   ;;  %s4807_s5 = inlined_call_operand.vmem [shape: f32[5,128], index: 5, kind: input, shape index: {}]   ;;  %s4808_s6 = inlined_call_operand.vmem [shape: f32[65,384], index: 6, kind: input, shape index: {}]   ;;  %s4809_s7 = inlined_call_operand.vmem [shape: f32[4,32], index: 7, kind: input, shape index: {}]   ;;  %s4810_s8 = inlined_call_operand.vmem [shape: f32[32,32], index: 8, kind: input, shape index: {}]   ;;  %s4811_s9 = inlined_call_operand.vmem [shape: f32[1,32], index: 9, kind: input, shape index: {}]   ;;  %s4812_s10 = inlined_call_operand.vmem [shape: f32[32,8], index: 10, kind: input, shape index: {}]   ;;  %s4813_s11 = inlined_call_operand.vmem [shape: f32[1,8], index: 11, kind: input, shape index: {}]   ;;  %s4814_s12 = inlined_call_operand.hbm [shape: f32[2,8], index: 12, kind: output, shape index: {}]  }
   0x1   :  { %v43_v0 = vld [vmem:[%s4802_s0] sm:$0xf] }
   0x2   :  { %v42_v1 = vld [vmem:[%s4803_s1] sm:$0xf]  ;;  %2930 = vmatpush.msk.msra.mxu0 %vm51_vm0, %v43_v0 }
   0x3   :  { %2931 = vmatmul.msk.f32.vlgmr.msra.gmra.mxu0 %vm47_vm1, %v42_v1 }
   0x4   :  { %17 = vsyncpa [#allocation3], 0  ;;  %v45_v2 = vld [vmem:[%s4804_s2 + $0x8] sm:$0xff]  ;;  %s3376_s27 = smov 112   ;;  %v44_v5 = vld [vmem:[%s4804_s2] sm:$0xff]  ;;  %vm84_vm2 = vcmask 130048  }
   0x5   :  { %102 = vmatpush.msra.mxu1 %v45_v2  ;;  %v3099_v6 = vld [vmem:[%s4805_s3] ss:$0 sm:$0xff]  ;;  %s3377_s30 = smov 16   ;;  %v3082_v13 = vpack.i.bf16 %v44_v5, %v45_v2  ;;  %v340_v23 = vld [vmem:[%s4809_s7 + $0x2] sm:$0x3]  ;;  %s3378_s13 = smov 32  }
   0x6   :  { %152 = vrot.lane.b32.xlu2 %v3099_v6, %s3376_s27  ;;  %v3478_v30 = vld [vmem:[%s4808_s6 + $0xc0] sm:$0x1]  ;;  %vm379_vm3 = vcmask 1040384   ;;  %v3483_v31 = vld [vmem:[%s4808_s6 + $0xa8] sm:$0xff]  ;;  %v3492_v32 = vld [vmem:[%s4808_s6 + $0x90] sm:$0xff]  ;;  %vm250_vm4 = vcmask 261120  }
   0x7   :  { %103 = vmatpush.msra.mxu1 %v44_v5  ;;  %3083 = vrot.lane.b32.xlu1 %v3082_v13, %s3376_s27  ;;  %v292_v33 = vld [vmem:[%s4807_s5] sm:$0xf]  ;;  %v3502_v34 = vld [vmem:[%s4808_s6 + $0x78] sm:$0xff]  ;;  %v3517_v36 = vld [vmem:[%s4808_s6 + $0x48] sm:$0xff]  ;;  %vm346_vm5 = vcmask 523264   ;;  %vm375_vm6 = vcmask 531456  }
   0x8   :  { %v3510_v35 = vld [vmem:[%s4808_s6 + $0x60] sm:$0xff]  ;;  %v3531_v39 = vld [vmem:[%s4808_s6 + $0x30] sm:$0xff]  ;;  %v3538_v40 = vld [vmem:[%s4808_s6 + $0x18] sm:$0xff]  ;;  %s3379_s16 = smov 64   ;;  %s3380_s19 = smov 96  }
   0x9   :  { %2945 = vmatpush.msk.msrb.mxu1 %vm379_vm3, %v3478_v30  ;;  %v3523_v37 = vld [vmem:[%s4809_s7] sm:$0x3]  ;;  %v3575_v53 = vld [vmem:[%s4807_s5 + $0x4] ss:$0 sm:$0xff]  ;;  %v3601_v13 = vld [vmem:[%s4808_s6 + $0xd0] sm:$0x1] }
   0xa   :  { %v3548_v43 = vld [vmem:[%s4808_s6] sm:$0xff]  ;;  %s3381_s1 = smov [#allocation2]  }
   0xb   :  { %391 = vmatpush.msrb.mxu1 %v3483_v31  ;;  %v246_v50 = vld [vmem:[%s4806_s4] sm:$0xff]  ;;  %s2919_s29 = sshll.u32 %s3381_s1, 4  ;;  %s2920_s29 = int_to_ptr.vmem [resolvable:$true] %s2919_s29 }
   0xd   :  { %392 = vmatpush.msrb.mxu1 %v3492_v32 }
   0xf   :  { %393 = vmatpush.msrb.mxu1 %v3502_v34 }
  0x11   :  { %394 = vmatpush.msrb.mxu1 %v3510_v35 }
  0x13   :  { %395 = vmatpush.msrb.mxu1 %v3517_v36 }
  0x15   :  { %396 = vmatpush.msrb.mxu1 %v3531_v39 }
  0x17   :  { %397 = vmatpush.msrb.mxu1 %v3538_v40 }
  0x19   :  { %398 = vmatpush.msrb.mxu1 %v3548_v43 }
  0x60   :  { %v153_v24 = vpop.permute.xlu2 %152 }
  0x79   :  { %v3084_v16 = vpop.permute.xlu1 %3083 }
  0x7a   :  { %v3085_v17 = vunpack.i.l.bf16 %v3084_v16  ;;  %v3086_v18 = vunpack.i.h.bf16 %v3084_v16  ;;  %v3623_v16 = vld [vmem:[%s4808_s6 + $0xa0] sm:$0xff] }
  0x7c   :  { %172 = vmatpush.msra.mxu3 %v3085_v17  ;;  %v3629_v17 = vld [vmem:[%s4808_s6 + $0x80] sm:$0xff] }
  0x7e   :  { %173 = vmatpush.msra.mxu3 %v3086_v18  ;;  %v3637_v18 = vld [vmem:[%s4808_s6 + $0x88] sm:$0xff] }
  0x80   :  { %v72_v3 = vpop.f32.mrf.mxu0  ;;  %2948 = vmatpush.msk.msrb.mxu3 %vm379_vm3, %v3478_v30 }
  0x81   :  { %v76_v4 = vrot.slane %v72_v3, 4 }
  0x82   :  { %469 = vmatpush.msrb.mxu3 %v3483_v31 }
  0x83   :  { %77 = vrot.lane.b32.xlu0 %v76_v4, %s3376_s27 }
  0x84   :  { %470 = vmatpush.msrb.mxu3 %v3492_v32 }
  0x86   :  { %471 = vmatpush.msrb.mxu3 %v3502_v34 }
  0x88   :  { %472 = vmatpush.msrb.mxu3 %v3510_v35 }
  0x8a   :  { %473 = vmatpush.msrb.mxu3 %v3517_v36 }
  0x8c   :  { %474 = vmatpush.msrb.mxu3 %v3531_v39 }
  0x8e   :  { %475 = vmatpush.msrb.mxu3 %v3538_v40 }
  0x90   :  { %476 = vmatpush.msrb.mxu3 %v3548_v43 }
  0xf5   :  { %v78_v7 = vpop.permute.xlu0 %77 }
  0xf6   :  { %v80_v8 = vsel %vm51_vm0, %v72_v3, %v78_v7 }
  0xf7   :  { %2932 = vmatmul.msk.f32.vlgmr.msra.gmra.mxu1 %vm84_vm2, %v80_v8 }
 0x174   :  { %v105_v9 = vpop.f32.mrf.mxu1 }
 0x175   :  { %v106_v10 = vadd.f32 %v3099_v6, %v105_v9 }
 0x177   :  { %v108_v11 = vmax.f32 %v106_v10, 0.0 }
 0x179   :  { %v110_v12 = vrot.slane %v108_v11, 4 }
 0x17b   :  { %111 = vrot.lane.b32.xlu0 %v110_v12, %s3377_s30  ;;  %v3594_v12 = vld [vmem:[%s4808_s6 + $0xb0] sm:$0xff] }
 0x183   :  { %342 = vrot.lane.b32.xlu0 %v340_v23, %s3378_s13 }
 0x1ed   :  { %v112_v14 = vpop.permute.xlu0 %111 }
 0x1ee   :  { %v114_v15 = vsel %vm84_vm2, %v108_v11, %v112_v14  ;;  %v3589_v11 = vld [vmem:[%s4808_s6 + $0xc8] sm:$0x1]  ;;  %v3608_v14 = vld [vmem:[%s4808_s6 + $0x98] sm:$0xff] }
 0x1ef   :  { %2933 = vmatpush.msk.msra.mxu2 %vm51_vm0, %v114_v15  ;;  %2950 = vmatpush.msk.msra.mxu1 %vm379_vm3, %v3589_v11  ;;  %v3615_v15 = vld [vmem:[%s4808_s6 + $0xb8] sm:$0xff] }
 0x1f0   :  { %2934 = vmatmul.msk.f32.vlgmr.msra.gmra.mxu2 %vm47_vm1, %v42_v1 }
 0x1f1   :  { %2940 = vmatpush.msk.msrb.mxu2 %vm51_vm0, %v292_v33  ;;  %489 = vmatpush.msra.mxu1 %v3594_v12  ;;  %v3690_v33 = vld [vmem:[%s4808_s6 + $0x70] sm:$0xff] }
 0x1f3   :  { %2958 = vmatpush.msk.msra.mxu2 %vm379_vm3, %v3589_v11  ;;  %490 = vmatpush.msra.mxu1 %v3608_v14 }
 0x1f5   :  { %v3525_v38 = vpop.permute.xlu0 %342  ;;  %644 = vmatpush.msra.mxu2 %v3594_v12  ;;  %491 = vmatpush.msra.mxu1 %v3629_v17 }
 0x1f6   :  { %v345_v41 = vsel %vm250_vm4, %v3523_v37, %v3525_v38 }
 0x1f7   :  { %v347_v44 = vsel %vm346_vm5, %v345_v41, 1.0  ;;  %645 = vmatpush.msra.mxu2 %v3608_v14  ;;  %v3702_v41 = vld [vmem:[%s4808_s6 + $0x40] sm:$0xff] }
 0x1f8   :  { %2946 = vmatmul.msk.f32.vlgmr.msrb.gmra.mxu1 %vm375_vm6, %v347_v44  ;;  %v3722_v44 = vld [vmem:[%s4808_s6 + $0x10] sm:$0xff] }
 0x1f9   :  { %646 = vmatpush.msra.mxu2 %v3629_v17 }
 0x273   :  { %v135_v19 = vpop.f32.mrf.mxu2 }
 0x274   :  { %v139_v20 = vrot.slane %v135_v19, 4 }
 0x275   :  { %v400_v51 = vpop.f32.mrf.mxu1 }
 0x276   :  { %140 = vrot.lane.b32.xlu1 %v139_v20, %s3376_s27  ;;  %v3652_v20 = vld [vmem:[%s4808_s6 + $0x50] sm:$0xff] }
 0x27e   :  { %424 = vrot.lane.b32.xlu1 %v400_v51, %s3379_s16 }
 0x2e8   :  { %v141_v21 = vpop.permute.xlu1 %140 }
 0x2e9   :  { %v143_v22 = vsel %vm51_vm0, %v135_v19, %v141_v21  ;;  %v3643_v19 = vld [vmem:[%s4808_s6 + $0x68] sm:$0xff]  ;;  %v3661_v21 = vld [vmem:[%s4808_s6 + $0x38] sm:$0xff] }
 0x2ea   :  { %2935 = vmatmul.msk.f32.vlgmr.msra.gmra.mxu3 %vm84_vm2, %v143_v22  ;;  %492 = vmatpush.msra.mxu1 %v3643_v19  ;;  %v3669_v22 = vld [vmem:[%s4808_s6 + $0x20] sm:$0xff] }
 0x2eb   :  { %2952 = vmatpush.msk.msra.mxu3 %vm379_vm3, %v3601_v13  ;;  %647 = vmatpush.msra.mxu2 %v3643_v19 }
 0x2ec   :  { %493 = vmatpush.msra.mxu1 %v3652_v20 }
 0x2ed   :  { %509 = vmatpush.msra.mxu3 %v3615_v15  ;;  %648 = vmatpush.msra.mxu2 %v3652_v20 }
 0x2ee   :  { %494 = vmatpush.msra.mxu1 %v3661_v21 }
 0x2ef   :  { %510 = vmatpush.msra.mxu3 %v3623_v16  ;;  %649 = vmatpush.msra.mxu2 %v3661_v21 }
 0x2f0   :  { %v425_v3 = vpop.permute.xlu1 %424  ;;  %495 = vmatpush.msra.mxu1 %v3669_v22 }
 0x2f1   :  { %511 = vmatpush.msra.mxu3 %v3637_v18  ;;  %650 = vmatpush.msra.mxu2 %v3669_v22 }
 0x2f3   :  { %512 = vmatpush.msra.mxu3 %v3690_v33 }
 0x36d   :  { %v175_v25 = vpop.f32.mrf.mxu3 }
 0x36e   :  { %v176_v26 = vadd.f32 %v175_v25, %v153_v24 }
 0x370   :  { %v178_v27 = vmax.f32 %v176_v26, 0.0 }
 0x372   :  { %v212_v28 = vrot.slane %v178_v27, 4 }
 0x374   :  { %v3087_v29 = vpack.i.bf16 %v178_v27, %v212_v28 }
 0x376   :  { %3088 = vxpose.xlu2.b32.start.end [1/1] (short) (narrow) %v3087_v29, 16  ;;  %v3685_v29 = vld [vmem:[%s4808_s6 + $0x8] sm:$0xff] }
 0x377   :  { %496 = vmatpush.msra.mxu1 %v3685_v29  ;;  %651 = vmatpush.msra.mxu2 %v3685_v29 }
 0x379   :  { %2960 = vmatpush.msk.msrb.mxu1 %vm379_vm3, %v3601_v13 }
 0x37b   :  { %664 = vmatpush.msrb.mxu1 %v3615_v15 }
 0x37d   :  { %665 = vmatpush.msrb.mxu1 %v3623_v16 }
 0x37f   :  { %666 = vmatpush.msrb.mxu1 %v3637_v18 }
 0x381   :  { %667 = vmatpush.msrb.mxu1 %v3690_v33 }
 0x40f   :  { %v3089_v42 = vpop.trf.xlu2 }
 0x410   :  { %v3090_v47 = vunpack.i.l.bf16 %v3089_v42  ;;  %v3093_v49 = vunpack.i.h.bf16 %v3089_v42  ;;  %v3713_v42 = vld [vmem:[%s4808_s6 + $0x28] sm:$0xff] }
 0x417   :  { %v3094_v45 = vpop.trf.xlu2 }
 0x418   :  { %v3095_v46 = vunpack.i.l.bf16 %v3094_v45  ;;  %v3098_v48 = vunpack.i.h.bf16 %v3094_v45 }
 0x41a   :  { %275 = vmatpush.msrb.mxu0 %v3095_v46 }
 0x41c   :  { %276 = vmatpush.msrb.mxu0 %v3090_v47 }
 0x41e   :  { %277 = vmatpush.msrb.mxu0 %v3098_v48 }
 0x420   :  { %278 = vmatpush.msrb.mxu0 %v3093_v49 }
 0x421   :  { %2936 = vmatmul.msk.f32.vlgmr.msrb.gmra.mxu0 %vm250_vm4, %v246_v50 }
 0x422   :  { %2956 = vmatpush.msk.msra.mxu0 %vm379_vm3, %v3478_v30 }
 0x424   :  { %624 = vmatpush.msra.mxu0 %v3483_v31 }
 0x426   :  { %625 = vmatpush.msra.mxu0 %v3492_v32 }
 0x428   :  { %626 = vmatpush.msra.mxu0 %v3502_v34 }
 0x42a   :  { %627 = vmatpush.msra.mxu0 %v3510_v35 }
 0x42c   :  { %628 = vmatpush.msra.mxu0 %v3517_v36 }
 0x42e   :  { %629 = vmatpush.msra.mxu0 %v3531_v39 }
 0x430   :  { %630 = vmatpush.msra.mxu0 %v3538_v40 }
 0x432   :  { %631 = vmatpush.msra.mxu0 %v3548_v43 }
 0x434   :  { %2966 = vmatpush.msk.msrb.mxu0 %vm379_vm3, %v3589_v11 }
 0x436   :  { %799 = vmatpush.msrb.mxu0 %v3594_v12 }
 0x438   :  { %800 = vmatpush.msrb.mxu0 %v3608_v14 }
 0x43a   :  { %801 = vmatpush.msrb.mxu0 %v3629_v17 }
 0x43c   :  { %802 = vmatpush.msrb.mxu0 %v3643_v19 }
 0x43e   :  { %803 = vmatpush.msrb.mxu0 %v3652_v20 }
 0x440   :  { %804 = vmatpush.msrb.mxu0 %v3661_v21 }
 0x442   :  { %805 = vmatpush.msrb.mxu0 %v3669_v22 }
 0x444   :  { %806 = vmatpush.msrb.mxu0 %v3685_v29 }
 0x49e   :  { %v280_v52 = vpop.f32.mrf.mxu0 }
 0x49f   :  { %2941 = vmatmul.msk.f32.vlgmr.msrb.gmra.mxu2 %vm47_vm1, %v280_v52 }
 0x4a0   :  { %2968 = vmatpush.msk.msrb.mxu2 %vm379_vm3, %v3601_v13 }
 0x4a2   :  { %819 = vmatpush.msrb.mxu2 %v3615_v15 }
 0x4a4   :  { %820 = vmatpush.msrb.mxu2 %v3623_v16 }
 0x4a6   :  { %821 = vmatpush.msrb.mxu2 %v3637_v18 }
 0x4a8   :  { %822 = vmatpush.msrb.mxu2 %v3690_v33 }
 0x522   :  { %v327_v54 = vpop.f32.mrf.mxu2 }
 0x523   :  { %v3578_v55 = vadd.f32 %v3575_v53, %v327_v54 }
 0x525   :  { %v403_v56 = vadd.f32 %v400_v51, %v3578_v55 }
 0x527   :  { %v2947_v57 = vmul.f32 -1.442695, %v403_v56 }
 0x529   :  { %3103 = vpow2.f32 %v2947_v57 }
 0x52f   :  { %v3104_v58 = vpop.eup %3103 }
 0x530   :  { %v407_v59 = vadd.f32 1.0, %v3104_v58 }
 0x532   :  { %3105 = vrcp.f32 %v407_v59  ;;  %v419_v63 = vand.u32 2147483648, %v407_v59  ;;  %v417_v1 = vand.u32 2147483647, %v407_v59  ;;  %vm413_vm8 = vweird.f32 %v407_v59 }
 0x534   :  { %v420_v4 = vor.u32 1.1754944e-38, %v419_v63  ;;  %vm418_vm10 = vcmp.eq.f32.partialorder %v417_v1, 8.507059e+37 }
 0x538   :  { %v3106_v60 = vpop.eup %3105 }
 0x539   :  { %v409_v61 = vmul.f32 %v3106_v60, %v407_v59  ;;  %vm414_vm7 = vweird.f32 %v3106_v60 }
 0x53a   :  { %vm415_vm9 = vmor %vm413_vm8, %vm414_vm7 }
 0x53b   :  { %v410_v62 = vsub.f32 1.0, %v409_v61 }
 0x53d   :  { %v411_v0 = vmul.f32 %v3106_v60, %v410_v62 }
 0x53f   :  { %v412_v2 = vadd.f32 %v3106_v60, %v411_v0 }
 0x541   :  { %v416_v5 = vsel %vm415_vm9, %v3106_v60, %v412_v2 }
 0x542   :  { %v421_v6 = vsel %vm418_vm10, %v420_v4, %v416_v5 }
 0x543   :  { %v427_v7 = vmul.f32 %v425_v3, %v421_v6  ;;  %v434_v24 = vsub.f32 1.0, %v421_v6 }
 0x545   :  { %429 = vrot.lane.b32.xlu0 %v427_v7, %s3379_s16 }
 0x54d   :  { %441 = vrot.lane.b32.xlu0 %v3523_v37, %s3378_s13  ;;  %v3697_v37 = vld [vmem:[%s4808_s6 + $0x58] sm:$0xff] }
 0x54e   :  { %513 = vmatpush.msra.mxu3 %v3697_v37  ;;  %668 = vmatpush.msrb.mxu1 %v3697_v37 }
 0x54f   :  { %823 = vmatpush.msrb.mxu2 %v3697_v37 }
 0x550   :  { %514 = vmatpush.msra.mxu3 %v3702_v41  ;;  %669 = vmatpush.msrb.mxu1 %v3702_v41 }
 0x551   :  { %824 = vmatpush.msrb.mxu2 %v3702_v41 }
 0x552   :  { %515 = vmatpush.msra.mxu3 %v3713_v42  ;;  %670 = vmatpush.msrb.mxu1 %v3713_v42 }
 0x553   :  { %825 = vmatpush.msrb.mxu2 %v3713_v42 }
 0x554   :  { %516 = vmatpush.msra.mxu3 %v3722_v44  ;;  %671 = vmatpush.msrb.mxu1 %v3722_v44 }
 0x555   :  { %826 = vmatpush.msrb.mxu2 %v3722_v44 }
 0x5b7   :  { %v430_v8 = vpop.permute.xlu0 %429 }
 0x5b8   :  { %v432_v9 = vadd.f32 %v430_v8, %v3578_v55 }
 0x5ba   :  { %3107 = vtanh.f32 %v432_v9 }
 0x5bf   :  { %v442_v23 = vpop.permute.xlu0 %441 }
 0x5c0   :  { %v3108_v10 = vpop.eup %3107  ;;  %v444_v26 = vmul.f32 %v442_v23, %v421_v6 }
 0x5c1   :  { %436 = vrot.lane.b32.xlu1 %v3108_v10, %s3380_s19 }
 0x633   :  { %v437_v25 = vpop.permute.xlu1 %436 }
 0x634   :  { %v439_v27 = vmul.f32 %v437_v25, %v434_v24 }
 0x636   :  { %v3678_v28 = vadd.f32 %v444_v26, %v439_v27 }
 0x638   :  { %447 = vrot.lane.b32.xlu1 %v3678_v28, %s3380_s19 }
 0x6aa   :  { %v448_v45 = vpop.permute.xlu1 %447 }
 0x6ab   :  { %v450_v46 = vsel %vm250_vm4, %v448_v45, %v3525_v38 }
 0x6ac   :  { %v451_v47 = vsel %vm346_vm5, %v450_v46, 1.0 }
 0x6ad   :  { %2949 = vmatmul.msk.f32.vlgmr.msrb.gmra.mxu3 %vm375_vm6, %v451_v47  ;;  %2951 = vmatmul.msk.f32.vlgmr.msra.gmra.mxu1 %vm375_vm6, %v451_v47 }
 0x6ae   :  { %2964 = vmatpush.msk.msrb.mxu3 %vm379_vm3, %v3478_v30  ;;  %2972 = vmatpush.msk.msra.mxu1 %vm379_vm3, %v3478_v30 }
 0x6b0   :  { %779 = vmatpush.msrb.mxu3 %v3483_v31  ;;  %934 = vmatpush.msra.mxu1 %v3483_v31 }
 0x6b2   :  { %780 = vmatpush.msrb.mxu3 %v3492_v32  ;;  %935 = vmatpush.msra.mxu1 %v3492_v32 }
 0x6b4   :  { %781 = vmatpush.msrb.mxu3 %v3502_v34  ;;  %936 = vmatpush.msra.mxu1 %v3502_v34 }
 0x6b5   :  { %2953 = vmatmul.msk.f32.vlgmr.msra.gmra.mxu3 %vm375_vm6, %v451_v47 }
 0x6b6   :  { %782 = vmatpush.msrb.mxu3 %v3510_v35  ;;  %937 = vmatpush.msra.mxu1 %v3510_v35 }
 0x6b8   :  { %783 = vmatpush.msrb.mxu3 %v3517_v36  ;;  %938 = vmatpush.msra.mxu1 %v3517_v36 }
 0x6ba   :  { %784 = vmatpush.msrb.mxu3 %v3531_v39  ;;  %939 = vmatpush.msra.mxu1 %v3531_v39 }
 0x6bc   :  { %785 = vmatpush.msrb.mxu3 %v3538_v40  ;;  %940 = vmatpush.msra.mxu1 %v3538_v40 }
 0x6be   :  { %786 = vmatpush.msrb.mxu3 %v3548_v43  ;;  %941 = vmatpush.msra.mxu1 %v3548_v43 }
 0x6c0   :  { %2974 = vmatpush.msk.msra.mxu3 %vm379_vm3, %v3589_v11 }
 0x6c2   :  { %954 = vmatpush.msra.mxu3 %v3594_v12 }
 0x6c4   :  { %955 = vmatpush.msra.mxu3 %v3608_v14 }
 0x6c6   :  { %956 = vmatpush.msra.mxu3 %v3629_v17 }
 0x6c8   :  { %957 = vmatpush.msra.mxu3 %v3643_v19 }
 0x6ca   :  { %958 = vmatpush.msra.mxu3 %v3652_v20 }
 0x6cc   :  { %959 = vmatpush.msra.mxu3 %v3661_v21 }
 0x6ce   :  { %960 = vmatpush.msra.mxu3 %v3669_v22 }
 0x6d0   :  { %961 = vmatpush.msra.mxu3 %v3685_v29 }
 0x72a   :  { %v498_v48 = vpop.f32.mrf.mxu1 }
 0x72b   :  { %585 = vrot.lane.b32.xlu1 %v498_v48, %s3379_s16 }
 0x730   :  { %v478_v49 = vpop.f32.mrf.mxu3 }
 0x731   :  { %v522_v50 = vrot.slane %v478_v49, 6 }
 0x733   :  { %544 = vrot.lane.b32.xlu0 %v522_v50, %s3379_s16  ;;  %v524_v56 = vadd.f32 %v522_v50, %v3578_v55 }
 0x735   :  { %v2954_v57 = vmul.f32 -1.442695, %v524_v56  ;;  %v248_v56 = vld [vmem:[%s4806_s4 + $0x10] sm:$0xff] }
 0x738   :  { %v518_v51 = vpop.f32.mrf.mxu3 }
 0x739   :  { %v564_v52 = vadd.f32 %v518_v51, %v498_v48 }
 0x73b   :  { %v2955_v54 = vmul.f32 -1.442695, %v564_v52  ;;  %v247_v52 = vld [vmem:[%s4806_s4 + $0x8] sm:$0xff] }
 0x73c   :  { %2937 = vmatmul.msk.f32.gmra.mxu0 %vm250_vm4, %v247_v52 }
 0x73d   :  { %3109 = vpow2.f32 %v2955_v54 }
 0x73e   :  { %3111 = vpow2.f32 %v2954_v57 }
 0x743   :  { %v3110_v58 = vpop.eup %3109 }
 0x744   :  { %v568_v59 = vadd.f32 1.0, %v3110_v58  ;;  %v3112_v60 = vpop.eup %3111  ;;  %2938 = vmatmul.msk.f32.gmra.mxu0 %vm250_vm4, %v248_v56  ;;  %v249_v58 = vld [vmem:[%s4806_s4 + $0x18] sm:$0xff] }
 0x745   :  { %v528_v61 = vadd.f32 1.0, %v3112_v60 }
 0x746   :  { %3113 = vrcp.f32 %v568_v59  ;;  %v580_v6 = vand.u32 2147483648, %v568_v59  ;;  %vm574_vm12 = vweird.f32 %v568_v59  ;;  %v578_v7 = vand.u32 2147483647, %v568_v59 }
 0x747   :  { %3115 = vrcp.f32 %v528_v61  ;;  %v540_v27 = vand.u32 2147483648, %v528_v61  ;;  %vm534_vm0 = vweird.f32 %v528_v61  ;;  %v538_v45 = vand.u32 2147483647, %v528_v61 }
 0x748   :  { %v581_v10 = vor.u32 1.1754944e-38, %v580_v6  ;;  %vm579_vm14 = vcmp.eq.f32.partialorder %v578_v7, 8.507059e+37 }
 0x749   :  { %v541_v47 = vor.u32 1.1754944e-38, %v540_v27  ;;  %vm539_vm7 = vcmp.eq.f32.partialorder %v538_v45, 8.507059e+37 }
 0x74c   :  { %v3114_v62 = vpop.eup %3113  ;;  %2939 = vmatmul.msk.f32.gmra.mxu0 %vm250_vm4, %v249_v58 }
 0x74d   :  { %v570_v63 = vmul.f32 %v3114_v62, %v568_v59  ;;  %v3116_v1 = vpop.eup %3115  ;;  %vm575_vm11 = vweird.f32 %v3114_v62 }
 0x74e   :  { %v530_v3 = vmul.f32 %v3116_v1, %v528_v61  ;;  %vm576_vm13 = vmor %vm574_vm12, %vm575_vm11  ;;  %vm535_vm15 = vweird.f32 %v3116_v1 }
 0x74f   :  { %v571_v0 = vsub.f32 1.0, %v570_v63  ;;  %vm536_vm2 = vmor %vm534_vm0, %vm535_vm15 }
 0x750   :  { %v531_v5 = vsub.f32 1.0, %v530_v3 }
 0x751   :  { %v572_v2 = vmul.f32 %v3114_v62, %v571_v0  ;;  %v560_v0 = vrot.slane %v3678_v28, 6 }
 0x752   :  { %v532_v9 = vmul.f32 %v3116_v1, %v531_v5 }
 0x753   :  { %v573_v4 = vadd.f32 %v3114_v62, %v572_v2 }
 0x754   :  { %v533_v26 = vadd.f32 %v3116_v1, %v532_v9 }
 0x755   :  { %v577_v8 = vsel %vm576_vm13, %v3114_v62, %v573_v4 }
 0x756   :  { %v582_v24 = vsel %vm579_vm14, %v581_v10, %v577_v8  ;;  %v537_v46 = vsel %vm536_vm2, %v3116_v1, %v533_v26 }
 0x757   :  { %v542_v49 = vsel %vm539_vm7, %v541_v47, %v537_v46  ;;  %v595_v8 = vsub.f32 1.0, %v582_v24  ;;  %v601_v28 = vmul.f32 %v582_v24, %v3525_v38 }
 0x758   :  { %v554_v1 = vsub.f32 1.0, %v542_v49  ;;  %v562_v4 = vmul.f32 %v560_v0, %v542_v49 }
 0x79d   :  { %v586_v23 = vpop.permute.xlu1 %585 }
 0x79e   :  { %v588_v25 = vmul.f32 %v586_v23, %v582_v24 }
 0x7a0   :  { %590 = vrot.lane.b32.xlu0 %v588_v25, %s3379_s16 }
 0x7a5   :  { %v545_v48 = vpop.permute.xlu0 %544 }
 0x7a6   :  { %v547_v50 = vmul.f32 %v545_v48, %v542_v49 }
 0x7a8   :  { %549 = vrot.lane.b32.xlu2 %v547_v50, %s3379_s16 }
 0x7b9   :  { %v283_v63 = vpop.f32.mrf.mxu0 }
 0x7ba   :  { %2942 = vmatmul.msk.f32.gmra.mxu2 %vm47_vm1, %v283_v63 }
 0x7c1   :  { %v286_v6 = vpop.f32.mrf.mxu0 }
 0x7c2   :  { %2943 = vmatmul.msk.f32.gmra.mxu2 %vm47_vm1, %v286_v6 }
 0x802   :  { %v550_v54 = vpop.permute.xlu2 %549 }
 0x803   :  { %v552_v57 = vadd.f32 %v550_v54, %v3578_v55 }
 0x805   :  { %3117 = vtanh.f32 %v552_v57 }
 0x80b   :  { %v3118_v59 = vpop.eup %3117 }
 0x80c   :  { %556 = vrot.lane.b32.xlu1 %v3118_v59, %s3380_s19 }
 0x812   :  { %v591_v60 = vpop.permute.xlu0 %590 }
 0x813   :  { %v593_v61 = vadd.f32 %v591_v60, %v518_v51  ;;  %v289_v51 = vpop.f32.mrf.mxu0 }
 0x814   :  { %2944 = vmatmul.msk.f32.gmra.mxu2 %vm47_vm1, %v289_v51 }
 0x815   :  { %3119 = vtanh.f32 %v593_v61 }
 0x81b   :  { %v3120_v62 = vpop.eup %3119 }
 0x81c   :  { %597 = vrot.lane.b32.xlu0 %v3120_v62, %s3380_s19 }
 0x83d   :  { %v3843_v38 = vpop.f32.mrf.mxu2 }
 0x845   :  { %v3845_v24 = vpop.f32.mrf.mxu2 }
 0x87e   :  { %v557_v2 = vpop.permute.xlu1 %556 }
 0x87f   :  { %v559_v3 = vmul.f32 %v557_v2, %v554_v1 }
 0x881   :  { %v3798_v5 = vadd.f32 %v562_v4, %v559_v3 }
 0x883   :  { %604 = vrot.lane.b32.xlu1 %v3798_v5, %s3380_s19 }
 0x88e   :  { %v598_v7 = vpop.permute.xlu0 %597 }
 0x88f   :  { %v600_v9 = vmul.f32 %v598_v7, %v595_v8 }
 0x891   :  { %v3805_v10 = vadd.f32 %v601_v28, %v600_v9 }
 0x893   :  { %v608_v23 = vrot.slane %v3805_v10, 6 }
 0x897   :  { %v3847_v46 = vpop.f32.mrf.mxu2 }
 0x8f5   :  { %v605_v25 = vpop.permute.xlu1 %604 }
 0x8f6   :  { %v610_v26 = vsel %vm250_vm4, %v605_v25, %v608_v23 }
 0x8f7   :  { %v611_v27 = vsel %vm346_vm5, %v610_v26, 1.0 }
 0x8f8   :  { %v613_v45 = vrot.slane %v611_v27, 2 }
 0x8fa   :  { %2957 = vmatmul.msk.f32.vlgmr.msra.gmra.mxu0 %vm375_vm6, %v613_v45  ;;  %2959 = vmatmul.msk.f32.vlgmr.msra.gmra.mxu2 %vm375_vm6, %v613_v45 }
 0x8fb   :  { %2961 = vmatmul.msk.f32.vlgmr.msrb.gmra.mxu1 %vm375_vm6, %v613_v45  ;;  %2976 = vmatpush.msk.msra.mxu0 %vm379_vm3, %v3601_v13 }
 0x8fc   :  { %2980 = vmatpush.msk.msra.mxu2 %vm379_vm3, %v3478_v30  ;;  %2982 = vmatpush.msk.msrb.mxu1 %vm379_vm3, %v3589_v11 }
 0x8fd   :  { %974 = vmatpush.msra.mxu0 %v3615_v15 }
 0x8fe   :  { %1083 = vmatpush.msra.mxu2 %v3483_v31  ;;  %1103 = vmatpush.msrb.mxu1 %v3594_v12 }
 0x8ff   :  { %975 = vmatpush.msra.mxu0 %v3623_v16 }
 0x900   :  { %1084 = vmatpush.msra.mxu2 %v3492_v32  ;;  %1104 = vmatpush.msrb.mxu1 %v3608_v14 }
 0x901   :  { %976 = vmatpush.msra.mxu0 %v3637_v18 }
 0x902   :  { %1085 = vmatpush.msra.mxu2 %v3502_v34  ;;  %1105 = vmatpush.msrb.mxu1 %v3629_v17 }
 0x903   :  { %977 = vmatpush.msra.mxu0 %v3690_v33 }
 0x904   :  { %1086 = vmatpush.msra.mxu2 %v3510_v35  ;;  %1106 = vmatpush.msrb.mxu1 %v3643_v19 }
 0x905   :  { %978 = vmatpush.msra.mxu0 %v3697_v37 }
 0x906   :  { %1087 = vmatpush.msra.mxu2 %v3517_v36  ;;  %1107 = vmatpush.msrb.mxu1 %v3652_v20 }
 0x907   :  { %979 = vmatpush.msra.mxu0 %v3702_v41 }
 0x908   :  { %1088 = vmatpush.msra.mxu2 %v3531_v39  ;;  %1108 = vmatpush.msrb.mxu1 %v3661_v21 }
 0x909   :  { %980 = vmatpush.msra.mxu0 %v3713_v42 }
 0x90a   :  { %1089 = vmatpush.msra.mxu2 %v3538_v40  ;;  %1109 = vmatpush.msrb.mxu1 %v3669_v22 }
 0x90b   :  { %981 = vmatpush.msra.mxu0 %v3722_v44 }
 0x90c   :  { %1090 = vmatpush.msra.mxu2 %v3548_v43  ;;  %1110 = vmatpush.msrb.mxu1 %v3685_v29 }
 0x977   :  { %v633_v47 = vpop.f32.mrf.mxu0 }
 0x978   :  { %v677_v48 = vrot.slane %v633_v47, 4  ;;  %v673_v52 = vpop.f32.mrf.mxu1 }
 0x97a   :  { %699 = vrot.lane.b32.xlu0 %v677_v48, %s3379_s16  ;;  %v679_v50 = vadd.f32 %v677_v48, %v3578_v55 }
 0x97c   :  { %v2962_v54 = vmul.f32 -1.442695, %v679_v50 }
 0x97d   :  { %v653_v49 = vpop.f32.mrf.mxu2 }
 0x97e   :  { %740 = vrot.lane.b32.xlu1 %v653_v49, %s3379_s16  ;;  %v719_v56 = vadd.f32 %v673_v52, %v653_v49  ;;  %3121 = vpow2.f32 %v2962_v54 }
 0x980   :  { %v2963_v57 = vmul.f32 -1.442695, %v719_v56 }
 0x982   :  { %3123 = vpow2.f32 %v2963_v57 }
 0x984   :  { %v3122_v58 = vpop.eup %3121 }
 0x985   :  { %v683_v59 = vadd.f32 1.0, %v3122_v58 }
 0x987   :  { %3125 = vrcp.f32 %v683_v59  ;;  %v695_v7 = vand.u32 2147483648, %v683_v59  ;;  %vm689_vm8 = vweird.f32 %v683_v59  ;;  %v693_v8 = vand.u32 2147483647, %v683_v59 }
 0x988   :  { %v3124_v60 = vpop.eup %3123 }
 0x989   :  { %v723_v61 = vadd.f32 1.0, %v3124_v60  ;;  %v696_v23 = vor.u32 1.1754944e-38, %v695_v7  ;;  %vm694_vm11 = vcmp.eq.f32.partialorder %v693_v8, 8.507059e+37 }
 0x98b   :  { %3127 = vrcp.f32 %v723_v61  ;;  %v735_v25 = vand.u32 2147483648, %v723_v61  ;;  %vm729_vm12 = vweird.f32 %v723_v61  ;;  %v733_v26 = vand.u32 2147483647, %v723_v61 }
 0x98d   :  { %v3126_v62 = vpop.eup %3125  ;;  %v736_v49 = vor.u32 1.1754944e-38, %v735_v25  ;;  %vm734_vm14 = vcmp.eq.f32.partialorder %v733_v26, 8.507059e+37 }
 0x98e   :  { %v685_v63 = vmul.f32 %v3126_v62, %v683_v59  ;;  %vm690_vm1 = vweird.f32 %v3126_v62 }
 0x98f   :  { %vm691_vm9 = vmor %vm689_vm8, %vm690_vm1 }
 0x990   :  { %v686_v1 = vsub.f32 1.0, %v685_v63  ;;  %v715_v63 = vrot.slane %v3798_v5, 6 }
 0x991   :  { %v3128_v0 = vpop.eup %3127 }
 0x992   :  { %v725_v2 = vmul.f32 %v3128_v0, %v723_v61  ;;  %v687_v3 = vmul.f32 %v3126_v62, %v686_v1  ;;  %vm730_vm10 = vweird.f32 %v3128_v0 }
 0x993   :  { %vm731_vm13 = vmor %vm729_vm12, %vm730_vm10 }
 0x994   :  { %v726_v4 = vsub.f32 1.0, %v725_v2  ;;  %v688_v6 = vadd.f32 %v3126_v62, %v687_v3 }
 0x996   :  { %v727_v51 = vmul.f32 %v3128_v0, %v726_v4  ;;  %v692_v9 = vsel %vm691_vm9, %v3126_v62, %v688_v6 }
 0x997   :  { %v697_v45 = vsel %vm694_vm11, %v696_v23, %v692_v9 }
 0x998   :  { %v728_v28 = vadd.f32 %v3128_v0, %v727_v51  ;;  %v717_v3 = vmul.f32 %v715_v63, %v697_v45 }
 0x99a   :  { %v732_v48 = vsel %vm731_vm13, %v3128_v0, %v728_v28  ;;  %v709_v0 = vsub.f32 1.0, %v697_v45 }
 0x99b   :  { %v737_v54 = vsel %vm734_vm14, %v736_v49, %v732_v48 }
 0x99c   :  { %v756_v7 = vmul.f32 %v737_v54, %v3805_v10 }
 0x9ec   :  { %v700_v27 = vpop.permute.xlu0 %699 }
 0x9ed   :  { %v702_v47 = vmul.f32 %v700_v27, %v697_v45 }
 0x9ef   :  { %704 = vrot.lane.b32.xlu0 %v702_v47, %s3379_s16 }
 0x9f0   :  { %v741_v50 = vpop.permute.xlu1 %740 }
 0x9f1   :  { %v743_v56 = vmul.f32 %v741_v50, %v737_v54 }
 0x9f3   :  { %745 = vrot.lane.b32.xlu1 %v743_v56, %s3379_s16 }
 0xa61   :  { %v705_v57 = vpop.permute.xlu0 %704 }
 0xa62   :  { %v707_v58 = vadd.f32 %v705_v57, %v3578_v55 }
 0xa64   :  { %3129 = vtanh.f32 %v707_v58 }
 0xa65   :  { %v746_v59 = vpop.permute.xlu1 %745 }
 0xa66   :  { %v748_v60 = vadd.f32 %v746_v59, %v673_v52  ;;  %v750_v52 = vsub.f32 1.0, %v737_v54 }
 0xa68   :  { %3131 = vtanh.f32 %v748_v60 }
 0xa6a   :  { %v3130_v61 = vpop.eup %3129 }
 0xa6b   :  { %711 = vrot.lane.b32.xlu0 %v3130_v61, %s3380_s19 }
 0xa6e   :  { %v3132_v62 = vpop.eup %3131 }
 0xa6f   :  { %752 = vrot.lane.b32.xlu1 %v3132_v62, %s3380_s19 }
 0xadd   :  { %v712_v1 = vpop.permute.xlu0 %711 }
 0xade   :  { %v714_v2 = vmul.f32 %v712_v1, %v709_v0 }
 0xae0   :  { %v3858_v4 = vadd.f32 %v717_v3, %v714_v2 }
 0xae1   :  { %v753_v6 = vpop.permute.xlu1 %752 }
 0xae2   :  { %759 = vrot.lane.b32.xlu0 %v3858_v4, %s3380_s19  ;;  %v755_v51 = vmul.f32 %v753_v6, %v750_v52 }
 0xae4   :  { %v3863_v8 = vadd.f32 %v756_v7, %v755_v51 }
 0xae6   :  { %v763_v9 = vrot.slane %v3863_v8, 4 }
 0xb54   :  { %v760_v28 = vpop.permute.xlu0 %759 }
 0xb55   :  { %v765_v5 = vsel %vm250_vm4, %v760_v28, %v763_v9 }
 0xb56   :  { %v766_v23 = vsel %vm346_vm5, %v765_v5, 1.0 }
 0xb57   :  { %v768_v25 = vrot.slane %v766_v23, 4 }
 0xb59   :  { %2965 = vmatmul.msk.f32.vlgmr.msrb.gmra.mxu3 %vm375_vm6, %v768_v25  ;;  %2967 = vmatmul.msk.f32.vlgmr.msrb.gmra.mxu0 %vm375_vm6, %v768_v25 }
 0xb5a   :  { %2969 = vmatmul.msk.f32.vlgmr.msrb.gmra.mxu2 %vm375_vm6, %v768_v25  ;;  %2984 = vmatpush.msk.msrb.mxu3 %vm379_vm3, %v3601_v13 }
 0xb5b   :  { %2988 = vmatpush.msk.msrb.mxu0 %vm379_vm3, %v3478_v30  ;;  %2990 = vmatpush.msk.msrb.mxu2 %vm379_vm3, %v3589_v11 }
 0xb5c   :  { %1123 = vmatpush.msrb.mxu3 %v3615_v15 }
 0xb5d   :  { %1238 = vmatpush.msrb.mxu0 %v3483_v31  ;;  %1258 = vmatpush.msrb.mxu2 %v3594_v12 }
 0xb5e   :  { %1124 = vmatpush.msrb.mxu3 %v3623_v16 }
 0xb5f   :  { %1239 = vmatpush.msrb.mxu0 %v3492_v32  ;;  %1259 = vmatpush.msrb.mxu2 %v3608_v14 }
 0xb60   :  { %1125 = vmatpush.msrb.mxu3 %v3637_v18 }
 0xb61   :  { %1240 = vmatpush.msrb.mxu0 %v3502_v34  ;;  %1260 = vmatpush.msrb.mxu2 %v3629_v17 }
 0xb62   :  { %1126 = vmatpush.msrb.mxu3 %v3690_v33 }
 0xb63   :  { %1241 = vmatpush.msrb.mxu0 %v3510_v35  ;;  %1261 = vmatpush.msrb.mxu2 %v3643_v19 }
 0xb64   :  { %1127 = vmatpush.msrb.mxu3 %v3697_v37 }
 0xb65   :  { %1242 = vmatpush.msrb.mxu0 %v3517_v36  ;;  %1262 = vmatpush.msrb.mxu2 %v3652_v20 }
 0xb66   :  { %1128 = vmatpush.msrb.mxu3 %v3702_v41 }
 0xb67   :  { %1243 = vmatpush.msrb.mxu0 %v3531_v39  ;;  %1263 = vmatpush.msrb.mxu2 %v3661_v21 }
 0xb68   :  { %1129 = vmatpush.msrb.mxu3 %v3713_v42 }
 0xb69   :  { %1244 = vmatpush.msrb.mxu0 %v3538_v40  ;;  %1264 = vmatpush.msrb.mxu2 %v3669_v22 }
 0xb6a   :  { %1130 = vmatpush.msrb.mxu3 %v3722_v44 }
 0xb6b   :  { %1245 = vmatpush.msrb.mxu0 %v3548_v43  ;;  %1265 = vmatpush.msrb.mxu2 %v3685_v29 }
 0xbd6   :  { %v808_v30 = vpop.f32.mrf.mxu0 }
 0xbd7   :  { %895 = vrot.lane.b32.xlu0 %v808_v30, %s3379_s16 }
 0xbdc   :  { %v788_v31 = vpop.f32.mrf.mxu3 }
 0xbdd   :  { %v832_v32 = vrot.slane %v788_v31, 2  ;;  %v828_v34 = vpop.f32.mrf.mxu2 }
 0xbde   :  { %v874_v35 = vadd.f32 %v828_v34, %v808_v30 }
 0xbdf   :  { %854 = vrot.lane.b32.xlu1 %v832_v32, %s3379_s16  ;;  %v834_v39 = vadd.f32 %v832_v32, %v3578_v55 }
 0xbe0   :  { %v2971_v36 = vmul.f32 -1.442695, %v874_v35  ;;  %v870_v35 = vrot.slane %v3858_v4, 6 }
 0xbe1   :  { %v2970_v40 = vmul.f32 -1.442695, %v834_v39 }
 0xbe2   :  { %3133 = vpow2.f32 %v2971_v36 }
 0xbe3   :  { %3135 = vpow2.f32 %v2970_v40 }
 0xbe8   :  { %v3134_v10 = vpop.eup %3133 }
 0xbe9   :  { %v878_v26 = vadd.f32 1.0, %v3134_v10  ;;  %v3136_v43 = vpop.eup %3135 }
 0xbea   :  { %v838_v27 = vadd.f32 1.0, %v3136_v43 }
 0xbeb   :  { %3137 = vrcp.f32 %v878_v26  ;;  %v890_v58 = vand.u32 2147483648, %v878_v26  ;;  %vm884_vm0 = vweird.f32 %v878_v26  ;;  %v888_v59 = vand.u32 2147483647, %v878_v26 }
 0xbec   :  { %3139 = vrcp.f32 %v838_v27  ;;  %v850_v3 = vand.u32 2147483648, %v838_v27  ;;  %vm844_vm8 = vweird.f32 %v838_v27  ;;  %v848_v6 = vand.u32 2147483647, %v838_v27 }
 0xbed   :  { %v891_v62 = vor.u32 1.1754944e-38, %v890_v58  ;;  %vm889_vm7 = vcmp.eq.f32.partialorder %v888_v59, 8.507059e+37 }
 0xbee   :  { %v851_v51 = vor.u32 1.1754944e-38, %v850_v3  ;;  %vm849_vm10 = vcmp.eq.f32.partialorder %v848_v6, 8.507059e+37 }
 0xbf1   :  { %v3138_v45 = vpop.eup %3137 }
 0xbf2   :  { %v880_v47 = vmul.f32 %v3138_v45, %v878_v26  ;;  %v3140_v49 = vpop.eup %3139  ;;  %vm885_vm15 = vweird.f32 %v3138_v45 }
 0xbf3   :  { %v840_v54 = vmul.f32 %v3140_v49, %v838_v27  ;;  %vm886_vm2 = vmor %vm884_vm0, %vm885_vm15  ;;  %vm845_vm1 = vweird.f32 %v3140_v49 }
 0xbf4   :  { %v881_v48 = vsub.f32 1.0, %v880_v47  ;;  %vm846_vm9 = vmor %vm844_vm8, %vm845_vm1 }
 0xbf5   :  { %v841_v57 = vsub.f32 1.0, %v840_v54  ;;  %v3938_v54 = vld [vmem:[%s4808_s6 + $0xa8] sm:$0xff] }
 0xbf6   :  { %v882_v50 = vmul.f32 %v3138_v45, %v881_v48 }
 0xbf7   :  { %v842_v61 = vmul.f32 %v3140_v49, %v841_v57 }
 0xbf8   :  { %v883_v56 = vadd.f32 %v3138_v45, %v882_v50 }
 0xbf9   :  { %v843_v2 = vadd.f32 %v3140_v49, %v842_v61 }
 0xbfa   :  { %v887_v60 = vsel %vm886_vm2, %v3138_v45, %v883_v56 }
 0xbfb   :  { %v892_v0 = vsel %vm889_vm7, %v891_v62, %v887_v60  ;;  %v847_v52 = vsel %vm846_vm9, %v3140_v49, %v843_v2 }
 0xbfc   :  { %v852_v9 = vsel %vm849_vm10, %v851_v51, %v847_v52  ;;  %v905_v43 = vsub.f32 1.0, %v892_v0  ;;  %v911_v27 = vmul.f32 %v892_v0, %v3863_v8  ;;  %v3928_v8 = vld [vmem:[%s4808_s6 + $0xc0] sm:$0x1] }
 0xbfd   :  { %v864_v36 = vsub.f32 1.0, %v852_v9  ;;  %v872_v10 = vmul.f32 %v870_v35, %v852_v9 }
 0xc49   :  { %v896_v63 = vpop.permute.xlu0 %895 }
 0xc4a   :  { %v898_v1 = vmul.f32 %v896_v63, %v892_v0 }
 0xc4c   :  { %900 = vrot.lane.b32.xlu0 %v898_v1, %s3379_s16 }
 0xc51   :  { %v855_v7 = vpop.permute.xlu1 %854 }
 0xc52   :  { %v857_v28 = vmul.f32 %v855_v7, %v852_v9 }
 0xc54   :  { %859 = vrot.lane.b32.xlu1 %v857_v28, %s3379_s16 }
 0xcbe   :  { %v901_v5 = vpop.permute.xlu0 %900 }
 0xcbf   :  { %v903_v23 = vadd.f32 %v901_v5, %v828_v34 }
 0xcc1   :  { %3141 = vtanh.f32 %v903_v23 }
 0xcc6   :  { %v860_v25 = vpop.permute.xlu1 %859 }
 0xcc7   :  { %v3142_v30 = vpop.eup %3141  ;;  %v862_v31 = vadd.f32 %v860_v25, %v3578_v55 }
 0xcc8   :  { %907 = vrot.lane.b32.xlu0 %v3142_v30, %s3380_s19 }
 0xcc9   :  { %3143 = vtanh.f32 %v862_v31 }
 0xccf   :  { %v3144_v32 = vpop.eup %3143 }
 0xcd0   :  { %866 = vrot.lane.b32.xlu1 %v3144_v32, %s3380_s19 }
 0xd3a   :  { %v908_v34 = vpop.permute.xlu0 %907 }
 0xd3b   :  { %v910_v55 = vmul.f32 %v908_v34, %v905_v43 }
 0xd3d   :  { %v3915_v45 = vadd.f32 %v911_v27, %v910_v55 }
 0xd3f   :  { %v918_v47 = vrot.slane %v3915_v45, 2 }
 0xd42   :  { %v867_v39 = vpop.permute.xlu1 %866 }
 0xd43   :  { %v869_v40 = vmul.f32 %v867_v39, %v864_v36 }
 0xd45   :  { %v3910_v26 = vadd.f32 %v872_v10, %v869_v40 }
 0xd47   :  { %914 = vrot.lane.b32.xlu1 %v3910_v26, %s3380_s19 }
 0xdb9   :  { %v915_v48 = vpop.permute.xlu1 %914 }
 0xdba   :  { %v920_v4 = vsel %vm250_vm4, %v915_v48, %v918_v47  ;;  %v1023_v48 = vrot.slane %v3910_v26, 6 }
 0xdbb   :  { %v921_v49 = vsel %vm346_vm5, %v920_v4, 1.0 }
 0xdbc   :  { %v923_v50 = vrot.slane %v921_v49, 6 }
 0xdbe   :  { %2973 = vmatmul.msk.f32.vlgmr.msra.gmra.mxu1 %vm375_vm6, %v923_v50  ;;  %2975 = vmatmul.msk.f32.vlgmr.msra.gmra.mxu3 %vm375_vm6, %v923_v50 }
 0xdbf   :  { %2977 = vmatmul.msk.f32.vlgmr.msra.gmra.mxu0 %vm375_vm6, %v923_v50  ;;  %2992 = vmatpush.msk.msra.mxu1 %vm379_vm3, %v3601_v13  ;;  %v3946_v13 = vld [vmem:[%s4808_s6 + $0x90] sm:$0xff] }
 0xdc0   :  { %2996 = vmatpush.msk.msra.mxu3 %vm379_vm3, %v3928_v8  ;;  %2998 = vmatpush.msk.msra.mxu0 %vm379_vm3, %v3589_v11  ;;  %v3954_v11 = vld [vmem:[%s4808_s6 + $0x78] sm:$0xff] }
 0xdc1   :  { %1278 = vmatpush.msra.mxu1 %v3615_v15  ;;  %v3978_v15 = vld [vmem:[%s4808_s6 + $0x30] sm:$0xff] }
 0xdc2   :  { %1393 = vmatpush.msra.mxu3 %v3938_v54  ;;  %1413 = vmatpush.msra.mxu0 %v3594_v12  ;;  %v3962_v12 = vld [vmem:[%s4808_s6 + $0x60] sm:$0xff] }
 0xdc3   :  { %1279 = vmatpush.msra.mxu1 %v3623_v16  ;;  %v3986_v16 = vld [vmem:[%s4808_s6 + $0x18] sm:$0xff] }
 0xdc4   :  { %1394 = vmatpush.msra.mxu3 %v3946_v13  ;;  %1414 = vmatpush.msra.mxu0 %v3608_v14  ;;  %v3970_v14 = vld [vmem:[%s4808_s6 + $0x48] sm:$0xff] }
 0xdc5   :  { %1280 = vmatpush.msra.mxu1 %v3637_v18 }
 0xdc6   :  { %1395 = vmatpush.msra.mxu3 %v3954_v11  ;;  %1415 = vmatpush.msra.mxu0 %v3629_v17  ;;  %v3994_v17 = vld [vmem:[%s4808_s6] sm:$0xff] }
 0xdc7   :  { %1281 = vmatpush.msra.mxu1 %v3690_v33 }
 0xdc8   :  { %1396 = vmatpush.msra.mxu3 %v3962_v12  ;;  %1416 = vmatpush.msra.mxu0 %v3643_v19 }
 0xdc9   :  { %1282 = vmatpush.msra.mxu1 %v3697_v37 }
 0xdca   :  { %1397 = vmatpush.msra.mxu3 %v3970_v14  ;;  %1417 = vmatpush.msra.mxu0 %v3652_v20  ;;  %v4002_v20 = vadd.f32 %v3575_v53, %v3843_v38 }
 0xdcb   :  { %1283 = vmatpush.msra.mxu1 %v3702_v41 }
 0xdcc   :  { %1398 = vmatpush.msra.mxu3 %v3978_v15  ;;  %1418 = vmatpush.msra.mxu0 %v3661_v21 }
 0xdcd   :  { %1284 = vmatpush.msra.mxu1 %v3713_v42 }
 0xdce   :  { %1399 = vmatpush.msra.mxu3 %v3986_v16  ;;  %1419 = vmatpush.msra.mxu0 %v3669_v22 }
 0xdcf   :  { %1285 = vmatpush.msra.mxu1 %v3722_v44 }
 0xdd0   :  { %1400 = vmatpush.msra.mxu3 %v3994_v17  ;;  %1420 = vmatpush.msra.mxu0 %v3685_v29 }
 0xe3b   :  { %v943_v18 = vpop.f32.mrf.mxu1 }
 0xe3c   :  { %1007 = vrot.lane.b32.xlu0 %v943_v18, %s3379_s16  ;;  %v986_v21 = vadd.f32 %v943_v18, %v4002_v20  ;;  %v983_v56 = vpop.f32.mrf.mxu0 }
 0xe3e   :  { %v2978_v22 = vmul.f32 -1.442695, %v986_v21 }
 0xe40   :  { %3145 = vpow2.f32 %v2978_v22 }
 0xe41   :  { %v963_v19 = vpop.f32.mrf.mxu3 }
 0xe42   :  { %1048 = vrot.lane.b32.xlu1 %v963_v19, %s3379_s16  ;;  %v1027_v57 = vadd.f32 %v983_v56, %v963_v19 }
 0xe44   :  { %v2979_v58 = vmul.f32 -1.442695, %v1027_v57 }
 0xe46   :  { %v3146_v59 = vpop.eup %3145  ;;  %3147 = vpow2.f32 %v2979_v58 }
 0xe47   :  { %v990_v29 = vadd.f32 1.0, %v3146_v59 }
 0xe49   :  { %3149 = vrcp.f32 %v990_v29  ;;  %v1002_v6 = vand.u32 2147483648, %v990_v29  ;;  %vm996_vm12 = vweird.f32 %v990_v29  ;;  %v1000_v52 = vand.u32 2147483647, %v990_v29 }
 0xe4b   :  { %v1003_v9 = vor.u32 1.1754944e-38, %v1002_v6  ;;  %vm1001_vm14 = vcmp.eq.f32.partialorder %v1000_v52, 8.507059e+37 }
 0xe4c   :  { %v3148_v60 = vpop.eup %3147 }
 0xe4d   :  { %v1031_v61 = vadd.f32 1.0, %v3148_v60  ;;  %v4027_v60 = vld [vmem:[%s4808_s6 + $0xd0] sm:$0x1] }
 0xe4f   :  { %v3150_v62 = vpop.eup %3149  ;;  %3151 = vrcp.f32 %v1031_v61  ;;  %v1043_v25 = vand.u32 2147483648, %v1031_v61  ;;  %vm1037_vm0 = vweird.f32 %v1031_v61  ;;  %v1041_v31 = vand.u32 2147483647, %v1031_v61 }
 0xe50   :  { %v992_v63 = vmul.f32 %v3150_v62, %v990_v29  ;;  %vm997_vm11 = vweird.f32 %v3150_v62 }
 0xe51   :  { %vm998_vm13 = vmor %vm996_vm12, %vm997_vm11  ;;  %v1044_v35 = vor.u32 1.1754944e-38, %v1043_v25  ;;  %vm1042_vm7 = vcmp.eq.f32.partialorder %v1041_v31, 8.507059e+37 }
 0xe52   :  { %v993_v1 = vsub.f32 1.0, %v992_v63  ;;  %v4056_v63 = vld [vmem:[%s4808_s6 + $0xa0] sm:$0xff] }
 0xe54   :  { %v994_v38 = vmul.f32 %v3150_v62, %v993_v1  ;;  %v4069_v1 = vld [vmem:[%s4808_s6 + $0x88] sm:$0xff] }
 0xe55   :  { %v3152_v0 = vpop.eup %3151 }
 0xe56   :  { %v1033_v53 = vmul.f32 %v3152_v0, %v1031_v61  ;;  %v995_v3 = vadd.f32 %v3150_v62, %v994_v38  ;;  %vm1038_vm15 = vweird.f32 %v3152_v0  ;;  %v4043_v61 = vld [vmem:[%s4808_s6 + $0xb8] sm:$0xff]  ;;  %v4084_v38 = vld [vmem:[%s4808_s6 + $0x68] sm:$0xff] }
 0xe57   :  { %vm1039_vm2 = vmor %vm1037_vm0, %vm1038_vm15 }
 0xe58   :  { %v1034_v2 = vsub.f32 1.0, %v1033_v53  ;;  %v999_v7 = vsel %vm998_vm13, %v3150_v62, %v995_v3  ;;  %v4050_v62 = vld [vmem:[%s4808_s6 + $0xb0] sm:$0xff]  ;;  %v4076_v53 = vld [vmem:[%s4808_s6 + $0x80] sm:$0xff] }
 0xe59   :  { %v1004_v23 = vsel %vm1001_vm14, %v1003_v9, %v999_v7 }
 0xe5a   :  { %v1035_v51 = vmul.f32 %v3152_v0, %v1034_v2  ;;  %v1017_v4 = vsub.f32 1.0, %v1004_v23  ;;  %v1025_v18 = vmul.f32 %v1023_v48, %v1004_v23  ;;  %v4092_v2 = vld [vmem:[%s4808_s6 + $0x50] sm:$0xff] }
 0xe5c   :  { %v1036_v28 = vadd.f32 %v3152_v0, %v1035_v51 }
 0xe5e   :  { %v1040_v32 = vsel %vm1039_vm2, %v3152_v0, %v1036_v28  ;;  %v4063_v0 = vld [vmem:[%s4808_s6 + $0x98] sm:$0xff] }
 0xe5f   :  { %v1045_v39 = vsel %vm1042_vm7, %v1044_v35, %v1040_v32 }
 0xe60   :  { %v1058_v22 = vsub.f32 1.0, %v1045_v39  ;;  %v1064_v57 = vmul.f32 %v1045_v39, %v3915_v45  ;;  %v4036_v45 = vld [vmem:[%s4808_s6 + $0xc8] sm:$0x1] }
 0xeae   :  { %v1008_v5 = vpop.permute.xlu0 %1007 }
 0xeaf   :  { %v1010_v30 = vmul.f32 %v1008_v5, %v1004_v23 }
 0xeb1   :  { %1012 = vrot.lane.b32.xlu0 %v1010_v30, %s3379_s16 }
 0xeb4   :  { %v1049_v36 = vpop.permute.xlu1 %1048 }
 0xeb5   :  { %v1051_v40 = vmul.f32 %v1049_v36, %v1045_v39 }
 0xeb7   :  { %1053 = vrot.lane.b32.xlu1 %v1051_v40, %s3379_s16 }
 0xf23   :  { %v1013_v10 = vpop.permute.xlu0 %1012 }
 0xf24   :  { %v1015_v34 = vadd.f32 %v1013_v10, %v4002_v20 }
 0xf26   :  { %3153 = vtanh.f32 %v1015_v34 }
 0xf29   :  { %v1054_v43 = vpop.permute.xlu1 %1053 }
 0xf2a   :  { %v1056_v55 = vadd.f32 %v1054_v43, %v983_v56 }
 0xf2c   :  { %v3154_v27 = vpop.eup %3153  ;;  %3155 = vtanh.f32 %v1056_v55 }
 0xf2d   :  { %1019 = vrot.lane.b32.xlu0 %v3154_v27, %s3380_s19 }
 0xf32   :  { %v3156_v47 = vpop.eup %3155 }
 0xf33   :  { %1060 = vrot.lane.b32.xlu1 %v3156_v47, %s3380_s19 }
 0xf9f   :  { %v1020_v49 = vpop.permute.xlu0 %1019 }
 0xfa0   :  { %v1022_v50 = vmul.f32 %v1020_v49, %v1017_v4 }
 0xfa2   :  { %v4011_v19 = vadd.f32 %v1025_v18, %v1022_v50 }
 0xfa4   :  { %1067 = vrot.lane.b32.xlu0 %v4011_v19, %s3380_s19 }
 0xfa5   :  { %v1061_v21 = vpop.permute.xlu1 %1060 }
 0xfa6   :  { %v1063_v56 = vmul.f32 %v1061_v21, %v1058_v22 }
 0xfa8   :  { %v4016_v58 = vadd.f32 %v1064_v57, %v1063_v56 }
0x1016   :  { %v1068_v59 = vpop.permute.xlu0 %1067 }
0x1017   :  { %v1070_v26 = vsel %vm250_vm4, %v1068_v59, %v4016_v58 }
0x1018   :  { %v1071_v29 = vsel %vm346_vm5, %v1070_v26, 1.0 }
0x1019   :  { %2981 = vmatmul.msk.f32.vlgmr.msra.gmra.mxu2 %vm375_vm6, %v1071_v29  ;;  %2983 = vmatmul.msk.f32.vlgmr.msrb.gmra.mxu1 %vm375_vm6, %v1071_v29 }
0x101a   :  { %2985 = vmatmul.msk.f32.vlgmr.msrb.gmra.mxu3 %vm375_vm6, %v1071_v29  ;;  %3000 = vmatpush.msk.msra.mxu2 %vm379_vm3, %v4027_v60 }
0x101b   :  { %3004 = vmatpush.msk.msrb.mxu1 %vm379_vm3, %v3928_v8  ;;  %3006 = vmatpush.msk.msrb.mxu3 %vm379_vm3, %v4036_v45 }
0x101c   :  { %1433 = vmatpush.msra.mxu2 %v4043_v61 }
0x101d   :  { %1548 = vmatpush.msrb.mxu1 %v3938_v54  ;;  %1568 = vmatpush.msrb.mxu3 %v4050_v62 }
0x101e   :  { %1434 = vmatpush.msra.mxu2 %v4056_v63 }
0x101f   :  { %1549 = vmatpush.msrb.mxu1 %v3946_v13  ;;  %1569 = vmatpush.msrb.mxu3 %v4063_v0 }
0x1020   :  { %1435 = vmatpush.msra.mxu2 %v4069_v1 }
0x1021   :  { %1550 = vmatpush.msrb.mxu1 %v3954_v11  ;;  %1570 = vmatpush.msrb.mxu3 %v4076_v53 }
0x1022   :  { %1436 = vmatpush.msra.mxu2 %v3690_v33  ;;  %v4100_v33 = vld [vmem:[%s4808_s6 + $0x38] sm:$0xff] }
0x1023   :  { %1551 = vmatpush.msrb.mxu1 %v3962_v12  ;;  %1571 = vmatpush.msrb.mxu3 %v4084_v38 }
0x1024   :  { %1437 = vmatpush.msra.mxu2 %v3697_v37  ;;  %v4108_v37 = vld [vmem:[%s4808_s6 + $0x20] sm:$0xff] }
0x1025   :  { %1552 = vmatpush.msrb.mxu1 %v3970_v14  ;;  %1572 = vmatpush.msrb.mxu3 %v4092_v2 }
0x1026   :  { %1438 = vmatpush.msra.mxu2 %v3702_v41  ;;  %v4116_v41 = vld [vmem:[%s4808_s6 + $0x8] sm:$0xff] }
0x1027   :  { %1553 = vmatpush.msrb.mxu1 %v3978_v15  ;;  %1573 = vmatpush.msrb.mxu3 %v4100_v33 }
0x1028   :  { %1439 = vmatpush.msra.mxu2 %v3713_v42 }
0x1029   :  { %1554 = vmatpush.msrb.mxu1 %v3986_v16  ;;  %1574 = vmatpush.msrb.mxu3 %v4108_v37 }
0x102a   :  { %1440 = vmatpush.msra.mxu2 %v3722_v44 }
0x102b   :  { %1555 = vmatpush.msrb.mxu1 %v3994_v17  ;;  %1575 = vmatpush.msrb.mxu3 %v4116_v41 }
0x1096   :  { %v1112_v42 = vpop.f32.mrf.mxu1 }
0x1097   :  { %1199 = vrot.lane.b32.xlu0 %v1112_v42, %s3379_s16 }
0x109c   :  { %v1092_v3 = vpop.f32.mrf.mxu2 }
0x109d   :  { %v1136_v6 = vrot.slane %v1092_v3, 6  ;;  %v1132_v52 = vpop.f32.mrf.mxu3 }
0x109e   :  { %v1178_v51 = vadd.f32 %v1132_v52, %v1112_v42 }
0x109f   :  { %1158 = vrot.lane.b32.xlu1 %v1136_v6, %s3379_s16  ;;  %v1138_v44 = vadd.f32 %v1136_v6, %v4002_v20 }
0x10a0   :  { %v2987_v7 = vmul.f32 -1.442695, %v1178_v51 }
0x10a1   :  { %v2986_v9 = vmul.f32 -1.442695, %v1138_v44  ;;  %v1174_v44 = vrot.slane %v4011_v19, 6 }
0x10a2   :  { %3157 = vpow2.f32 %v2987_v7 }
0x10a3   :  { %3159 = vpow2.f32 %v2986_v9 }
0x10a8   :  { %v3158_v28 = vpop.eup %3157 }
0x10a9   :  { %v1182_v5 = vadd.f32 1.0, %v3158_v28  ;;  %v3160_v23 = vpop.eup %3159 }
0x10aa   :  { %v1142_v25 = vadd.f32 1.0, %v3160_v23 }
0x10ab   :  { %3161 = vrcp.f32 %v1182_v5  ;;  %v1194_v34 = vand.u32 2147483648, %v1182_v5  ;;  %vm1188_vm8 = vweird.f32 %v1182_v5  ;;  %v1192_v43 = vand.u32 2147483647, %v1182_v5 }
0x10ac   :  { %3163 = vrcp.f32 %v1142_v25  ;;  %v1154_v18 = vand.u32 2147483648, %v1142_v25  ;;  %vm1148_vm12 = vweird.f32 %v1142_v25  ;;  %v1152_v21 = vand.u32 2147483647, %v1142_v25 }
0x10ad   :  { %v1195_v47 = vor.u32 1.1754944e-38, %v1194_v34  ;;  %vm1193_vm10 = vcmp.eq.f32.partialorder %v1192_v43, 8.507059e+37  ;;  %v4167_v34 = vld [vmem:[%s4808_s6 + $0x58] sm:$0xff]  ;;  %v4175_v43 = vld [vmem:[%s4808_s6 + $0x40] sm:$0xff] }
0x10ae   :  { %v1155_v56 = vor.u32 1.1754944e-38, %v1154_v18  ;;  %vm1153_vm14 = vcmp.eq.f32.partialorder %v1152_v21, 8.507059e+37 }
0x10b1   :  { %v3162_v30 = vpop.eup %3161 }
0x10b2   :  { %v1184_v31 = vmul.f32 %v3162_v30, %v1182_v5  ;;  %v3164_v35 = vpop.eup %3163  ;;  %vm1189_vm1 = vweird.f32 %v3162_v30 }
0x10b3   :  { %v1144_v39 = vmul.f32 %v3164_v35, %v1142_v25  ;;  %vm1190_vm9 = vmor %vm1188_vm8, %vm1189_vm1  ;;  %vm1149_vm11 = vweird.f32 %v3164_v35 }
0x10b4   :  { %v1185_v32 = vsub.f32 1.0, %v1184_v31  ;;  %vm1150_vm13 = vmor %vm1148_vm12, %vm1149_vm11 }
0x10b5   :  { %v1145_v10 = vsub.f32 1.0, %v1144_v39 }
0x10b6   :  { %v1186_v36 = vmul.f32 %v3162_v30, %v1185_v32 }
0x10b7   :  { %v1146_v27 = vmul.f32 %v3164_v35, %v1145_v10 }
0x10b8   :  { %v1187_v40 = vadd.f32 %v3162_v30, %v1186_v36 }
0x10b9   :  { %v1147_v50 = vadd.f32 %v3164_v35, %v1146_v27  ;;  %v4191_v27 = vld [vmem:[%s4808_s6 + $0x10] sm:$0xff] }
0x10ba   :  { %v1191_v55 = vsel %vm1190_vm9, %v3162_v30, %v1187_v40 }
0x10bb   :  { %v1196_v4 = vsel %vm1193_vm10, %v1195_v47, %v1191_v55  ;;  %v1151_v22 = vsel %vm1150_vm13, %v3164_v35, %v1147_v50  ;;  %v4183_v55 = vld [vmem:[%s4808_s6 + $0x28] sm:$0xff] }
0x10bc   :  { %v1156_v59 = vsel %vm1153_vm14, %v1155_v56, %v1151_v22  ;;  %v1209_v30 = vsub.f32 1.0, %v1196_v4  ;;  %v1215_v32 = vmul.f32 %v1196_v4, %v4016_v58  ;;  %v4159_v58 = vld [vmem:[%s4808_s6 + $0x70] sm:$0xff] }
0x10bd   :  { %v1168_v9 = vsub.f32 1.0, %v1156_v59  ;;  %v1176_v23 = vmul.f32 %v1174_v44, %v1156_v59 }
0x1109   :  { %v1200_v48 = vpop.permute.xlu0 %1199 }
0x110a   :  { %v1202_v49 = vmul.f32 %v1200_v48, %v1196_v4 }
0x110c   :  { %1204 = vrot.lane.b32.xlu2 %v1202_v49, %s3379_s16 }
0x1111   :  { %v1159_v57 = vpop.permute.xlu1 %1158 }
0x1112   :  { %v1161_v26 = vmul.f32 %v1159_v57, %v1156_v59 }
0x1114   :  { %1163 = vrot.lane.b32.xlu1 %v1161_v26, %s3379_s16 }
0x1166   :  { %v1205_v29 = vpop.permute.xlu2 %1204 }
0x1167   :  { %v1207_v42 = vadd.f32 %v1205_v29, %v1132_v52 }
0x1169   :  { %3165 = vtanh.f32 %v1207_v42 }
0x116f   :  { %v3166_v3 = vpop.eup %3165 }
0x1170   :  { %1211 = vrot.lane.b32.xlu1 %v3166_v3, %s3380_s19 }
0x1186   :  { %v1164_v6 = vpop.permute.xlu1 %1163 }
0x1187   :  { %v1166_v51 = vadd.f32 %v1164_v6, %v4002_v20 }
0x1189   :  { %3167 = vtanh.f32 %v1166_v51 }
0x118f   :  { %v3168_v7 = vpop.eup %3167 }
0x1190   :  { %1170 = vrot.lane.b32.xlu0 %v3168_v7, %s3380_s19 }
0x11e2   :  { %v1212_v52 = vpop.permute.xlu1 %1211 }
0x11e3   :  { %v1214_v31 = vmul.f32 %v1212_v52, %v1209_v30 }
0x11e5   :  { %v4133_v35 = vadd.f32 %v1215_v32, %v1214_v31 }
0x11e7   :  { %v1222_v36 = vrot.slane %v4133_v35, 6 }
0x1202   :  { %v1171_v28 = vpop.permute.xlu0 %1170 }
0x1203   :  { %v1173_v5 = vmul.f32 %v1171_v28, %v1168_v9 }
0x1205   :  { %v4128_v25 = vadd.f32 %v1176_v23, %v1173_v5 }
0x1207   :  { %1218 = vrot.lane.b32.xlu2 %v4128_v25, %s3380_s19 }
0x1261   :  { %v1219_v39 = vpop.permute.xlu2 %1218 }
0x1262   :  { %v1224_v19 = vsel %vm250_vm4, %v1219_v39, %v1222_v36 }
0x1263   :  { %v1225_v40 = vsel %vm346_vm5, %v1224_v19, 1.0 }
0x1264   :  { %v1227_v10 = vrot.slane %v1225_v40, 2 }
0x1266   :  { %2989 = vmatmul.msk.f32.vlgmr.msrb.gmra.mxu0 %vm375_vm6, %v1227_v10  ;;  %2991 = vmatmul.msk.f32.vlgmr.msrb.gmra.mxu2 %vm375_vm6, %v1227_v10 }
0x1267   :  { %2993 = vmatmul.msk.f32.vlgmr.msra.gmra.mxu1 %vm375_vm6, %v1227_v10  ;;  %3008 = vmatpush.msk.msrb.mxu0 %vm379_vm3, %v4027_v60 }
0x1268   :  { %3012 = vmatpush.msk.msrb.mxu2 %vm379_vm3, %v3928_v8  ;;  %3014 = vmatpush.msk.msra.mxu1 %vm379_vm3, %v4036_v45 }
0x1269   :  { %1588 = vmatpush.msrb.mxu0 %v4043_v61 }
0x126a   :  { %1697 = vmatpush.msrb.mxu2 %v3938_v54  ;;  %1717 = vmatpush.msra.mxu1 %v4050_v62 }
0x126b   :  { %1589 = vmatpush.msrb.mxu0 %v4056_v63 }
0x126c   :  { %1698 = vmatpush.msrb.mxu2 %v3946_v13  ;;  %1718 = vmatpush.msra.mxu1 %v4063_v0 }
0x126d   :  { %1590 = vmatpush.msrb.mxu0 %v4069_v1 }
0x126e   :  { %1699 = vmatpush.msrb.mxu2 %v3954_v11  ;;  %1719 = vmatpush.msra.mxu1 %v4076_v53 }
0x126f   :  { %1591 = vmatpush.msrb.mxu0 %v4159_v58 }
0x1270   :  { %1700 = vmatpush.msrb.mxu2 %v3962_v12  ;;  %1720 = vmatpush.msra.mxu1 %v4084_v38 }
0x1271   :  { %1592 = vmatpush.msrb.mxu0 %v4167_v34 }
0x1272   :  { %1701 = vmatpush.msrb.mxu2 %v3970_v14  ;;  %1721 = vmatpush.msra.mxu1 %v4092_v2 }
0x1273   :  { %1593 = vmatpush.msrb.mxu0 %v4175_v43 }
0x1274   :  { %1702 = vmatpush.msrb.mxu2 %v3978_v15  ;;  %1722 = vmatpush.msra.mxu1 %v4100_v33 }
0x1275   :  { %1594 = vmatpush.msrb.mxu0 %v4183_v55 }
0x1276   :  { %1703 = vmatpush.msrb.mxu2 %v3986_v16  ;;  %1723 = vmatpush.msra.mxu1 %v4108_v37 }
0x1277   :  { %1595 = vmatpush.msrb.mxu0 %v4191_v27 }
0x1278   :  { %1704 = vmatpush.msrb.mxu2 %v3994_v17  ;;  %1724 = vmatpush.msra.mxu1 %v4116_v41 }
0x12e3   :  { %v1247_v47 = vpop.f32.mrf.mxu0 }
0x12e4   :  { %v1291_v48 = vrot.slane %v1247_v47, 4  ;;  %v1287_v50 = vpop.f32.mrf.mxu1 }
0x12e6   :  { %1313 = vrot.lane.b32.xlu0 %v1291_v48, %s3379_s16  ;;  %v1293_v49 = vadd.f32 %v1291_v48, %v4002_v20 }
0x12e8   :  { %v2994_v18 = vmul.f32 -1.442695, %v1293_v49 }
0x12e9   :  { %v1267_v4 = vpop.f32.mrf.mxu2 }
0x12ea   :  { %1354 = vrot.lane.b32.xlu1 %v1267_v4, %s3379_s16  ;;  %v1333_v21 = vadd.f32 %v1287_v50, %v1267_v4  ;;  %3169 = vpow2.f32 %v2994_v18 }
0x12ec   :  { %v2995_v22 = vmul.f32 -1.442695, %v1333_v21 }
0x12ee   :  { %3171 = vpow2.f32 %v2995_v22 }
0x12f0   :  { %v3170_v56 = vpop.eup %3169 }
0x12f1   :  { %v1297_v57 = vadd.f32 1.0, %v3170_v56 }
0x12f3   :  { %3173 = vrcp.f32 %v1297_v57  ;;  %v1309_v5 = vand.u32 2147483648, %v1297_v57  ;;  %vm1303_vm0 = vweird.f32 %v1297_v57  ;;  %v1307_v23 = vand.u32 2147483647, %v1297_v57 }
0x12f4   :  { %v3172_v59 = vpop.eup %3171 }
0x12f5   :  { %v1337_v26 = vadd.f32 1.0, %v3172_v59  ;;  %v1310_v31 = vor.u32 1.1754944e-38, %v1309_v5  ;;  %vm1308_vm1 = vcmp.eq.f32.partialorder %v1307_v23, 8.507059e+37 }
0x12f7   :  { %3175 = vrcp.f32 %v1337_v26  ;;  %v1349_v32 = vand.u32 2147483648, %v1337_v26  ;;  %vm1343_vm8 = vweird.f32 %v1337_v26  ;;  %v1347_v36 = vand.u32 2147483647, %v1337_v26 }
0x12f9   :  { %v3174_v29 = vpop.eup %3173  ;;  %v1350_v47 = vor.u32 1.1754944e-38, %v1349_v32  ;;  %vm1348_vm10 = vcmp.eq.f32.partialorder %v1347_v36, 8.507059e+37 }
0x12fa   :  { %v1299_v42 = vmul.f32 %v3174_v29, %v1297_v57  ;;  %vm1304_vm15 = vweird.f32 %v3174_v29 }
0x12fb   :  { %vm1305_vm2 = vmor %vm1303_vm0, %vm1304_vm15 }
0x12fc   :  { %v1300_v6 = vsub.f32 1.0, %v1299_v42 }
0x12fd   :  { %v3176_v3 = vpop.eup %3175 }
0x12fe   :  { %v1339_v51 = vmul.f32 %v3176_v3, %v1337_v26  ;;  %v1301_v7 = vmul.f32 %v3174_v29, %v1300_v6  ;;  %vm1344_vm7 = vweird.f32 %v3176_v3  ;;  %v1329_v26 = vrot.slane %v4128_v25, 6 }
0x12ff   :  { %vm1345_vm9 = vmor %vm1343_vm8, %vm1344_vm7 }
0x1300   :  { %v1340_v44 = vsub.f32 1.0, %v1339_v51  ;;  %v1302_v9 = vadd.f32 %v3174_v29, %v1301_v7 }
0x1302   :  { %v1341_v28 = vmul.f32 %v3176_v3, %v1340_v44  ;;  %v1306_v52 = vsel %vm1305_vm2, %v3174_v29, %v1302_v9 }
0x1303   :  { %v1311_v19 = vsel %vm1308_vm1, %v1310_v31, %v1306_v52 }
0x1304   :  { %v1342_v30 = vadd.f32 %v3176_v3, %v1341_v28  ;;  %v1323_v29 = vsub.f32 1.0, %v1311_v19  ;;  %v1331_v6 = vmul.f32 %v1329_v26, %v1311_v19 }
0x1306   :  { %v1346_v10 = vsel %vm1345_vm9, %v3176_v3, %v1342_v30 }
0x1307   :  { %v1351_v4 = vsel %vm1348_vm10, %v1350_v47, %v1346_v10 }
0x1308   :  { %v1364_v44 = vsub.f32 1.0, %v1351_v4 }
0x1358   :  { %v1314_v39 = vpop.permute.xlu0 %1313 }
0x1359   :  { %v1316_v40 = vmul.f32 %v1314_v39, %v1311_v19 }
0x135b   :  { %1318 = vrot.lane.b32.xlu2 %v1316_v40, %s3379_s16 }
0x135c   :  { %v1355_v48 = vpop.permute.xlu1 %1354 }
0x135d   :  { %v1357_v49 = vmul.f32 %v1355_v48, %v1351_v4 }
0x135f   :  { %1359 = vrot.lane.b32.xlu0 %v1357_v49, %s3379_s16 }
0x13b5   :  { %v1319_v18 = vpop.permute.xlu2 %1318 }
0x13b6   :  { %v1321_v21 = vadd.f32 %v1319_v18, %v4002_v20 }
0x13b8   :  { %3177 = vtanh.f32 %v1321_v21 }
0x13be   :  { %v3178_v22 = vpop.eup %3177 }
0x13bf   :  { %1325 = vrot.lane.b32.xlu1 %v3178_v22, %s3380_s19 }
0x13d1   :  { %v1360_v56 = vpop.permute.xlu0 %1359 }
0x13d2   :  { %v1362_v57 = vadd.f32 %v1360_v56, %v1287_v50  ;;  %v1370_v50 = vmul.f32 %v1351_v4, %v4133_v35 }
0x13d4   :  { %3179 = vtanh.f32 %v1362_v57 }
0x13da   :  { %v3180_v59 = vpop.eup %3179 }
0x13db   :  { %1366 = vrot.lane.b32.xlu2 %v3180_v59, %s3380_s19 }
0x1431   :  { %v1326_v42 = vpop.permute.xlu1 %1325 }
0x1432   :  { %v1328_v3 = vmul.f32 %v1326_v42, %v1323_v29 }
0x1434   :  { %v4205_v51 = vadd.f32 %v1331_v6, %v1328_v3 }
0x1435   :  { %v1367_v7 = vpop.permute.xlu2 %1366 }
0x1436   :  { %1373 = vrot.lane.b32.xlu0 %v4205_v51, %s3380_s19  ;;  %v1369_v9 = vmul.f32 %v1367_v7, %v1364_v44 }
0x1438   :  { %v4210_v28 = vadd.f32 %v1370_v50, %v1369_v9 }
0x143a   :  { %v1377_v5 = vrot.slane %v4210_v28, 4 }
0x14a8   :  { %v1374_v23 = vpop.permute.xlu0 %1373 }
0x14a9   :  { %v1379_v25 = vsel %vm250_vm4, %v1374_v23, %v1377_v5 }
0x14aa   :  { %v1380_v52 = vsel %vm346_vm5, %v1379_v25, 1.0 }
0x14ab   :  { %v1382_v30 = vrot.slane %v1380_v52, 4 }
0x14ad   :  { %2997 = vmatmul.msk.f32.vlgmr.msra.gmra.mxu3 %vm375_vm6, %v1382_v30  ;;  %2999 = vmatmul.msk.f32.vlgmr.msra.gmra.mxu0 %vm375_vm6, %v1382_v30 }
0x14ae   :  { %3001 = vmatmul.msk.f32.vlgmr.msra.gmra.mxu2 %vm375_vm6, %v1382_v30  ;;  %3016 = vmatpush.msk.msra.mxu3 %vm379_vm3, %v4027_v60 }
0x14af   :  { %3020 = vmatpush.msk.msra.mxu0 %vm379_vm3, %v3928_v8  ;;  %3022 = vmatpush.msk.msra.mxu2 %vm379_vm3, %v4036_v45 }
0x14b0   :  { %1737 = vmatpush.msra.mxu3 %v4043_v61 }
0x14b1   :  { %1852 = vmatpush.msra.mxu0 %v3938_v54  ;;  %1872 = vmatpush.msra.mxu2 %v4050_v62 }
0x14b2   :  { %1738 = vmatpush.msra.mxu3 %v4056_v63 }
0x14b3   :  { %1853 = vmatpush.msra.mxu0 %v3946_v13  ;;  %1873 = vmatpush.msra.mxu2 %v4063_v0 }
0x14b4   :  { %1739 = vmatpush.msra.mxu3 %v4069_v1 }
0x14b5   :  { %1854 = vmatpush.msra.mxu0 %v3954_v11  ;;  %1874 = vmatpush.msra.mxu2 %v4076_v53 }
0x14b6   :  { %1740 = vmatpush.msra.mxu3 %v4159_v58 }
0x14b7   :  { %1855 = vmatpush.msra.mxu0 %v3962_v12  ;;  %1875 = vmatpush.msra.mxu2 %v4084_v38 }
0x14b8   :  { %1741 = vmatpush.msra.mxu3 %v4167_v34 }
0x14b9   :  { %1856 = vmatpush.msra.mxu0 %v3970_v14  ;;  %1876 = vmatpush.msra.mxu2 %v4092_v2 }
0x14ba   :  { %1742 = vmatpush.msra.mxu3 %v4175_v43 }
0x14bb   :  { %1857 = vmatpush.msra.mxu0 %v3978_v15  ;;  %1877 = vmatpush.msra.mxu2 %v4100_v33 }
0x14bc   :  { %1743 = vmatpush.msra.mxu3 %v4183_v55 }
0x14bd   :  { %1858 = vmatpush.msra.mxu0 %v3986_v16  ;;  %1878 = vmatpush.msra.mxu2 %v4108_v37 }
0x14be   :  { %1744 = vmatpush.msra.mxu3 %v4191_v27 }
0x14bf   :  { %1859 = vmatpush.msra.mxu0 %v3994_v17  ;;  %1879 = vmatpush.msra.mxu2 %v4116_v41 }
0x152a   :  { %v1422_v35 = vpop.f32.mrf.mxu0 }
0x152b   :  { %1509 = vrot.lane.b32.xlu2 %v1422_v35, %s3379_s16 }
0x1530   :  { %v1402_v31 = vpop.f32.mrf.mxu3 }
0x1531   :  { %v1446_v32 = vrot.slane %v1402_v31, 2  ;;  %v1442_v36 = vpop.f32.mrf.mxu2 }
0x1532   :  { %v1488_v39 = vadd.f32 %v1442_v36, %v1422_v35 }
0x1533   :  { %1468 = vrot.lane.b32.xlu1 %v1446_v32, %s3379_s16  ;;  %v1448_v4 = vadd.f32 %v1446_v32, %v4002_v20 }
0x1534   :  { %v3003_v19 = vmul.f32 -1.442695, %v1488_v39 }
0x1535   :  { %v3002_v18 = vmul.f32 -1.442695, %v1448_v4 }
0x1536   :  { %3181 = vpow2.f32 %v3003_v19 }
0x153c   :  { %v3182_v40 = vpop.eup %3181 }
0x153d   :  { %v1492_v10 = vadd.f32 1.0, %v3182_v40 }
0x153f   :  { %3183 = vrcp.f32 %v1492_v10  ;;  %v1504_v56 = vand.u32 2147483648, %v1492_v10  ;;  %vm1498_vm12 = vweird.f32 %v1492_v10  ;;  %v1502_v57 = vand.u32 2147483647, %v1492_v10 }
0x1540   :  { %3185 = vpow2.f32 %v3002_v18 }
0x1541   :  { %v1505_v29 = vor.u32 1.1754944e-38, %v1504_v56  ;;  %vm1503_vm14 = vcmp.eq.f32.partialorder %v1502_v57, 8.507059e+37 }
0x1545   :  { %v3184_v47 = vpop.eup %3183 }
0x1546   :  { %v1494_v48 = vmul.f32 %v3184_v47, %v1492_v10  ;;  %vm1499_vm11 = vweird.f32 %v3184_v47  ;;  %v3186_v59 = vpop.eup %3185 }
0x1547   :  { %vm1500_vm13 = vmor %vm1498_vm12, %vm1499_vm11  ;;  %v1452_v42 = vadd.f32 1.0, %v3186_v59 }
0x1548   :  { %v1495_v49 = vsub.f32 1.0, %v1494_v48 }
0x1549   :  { %3187 = vrcp.f32 %v1452_v42  ;;  %v1464_v25 = vand.u32 2147483648, %v1452_v42  ;;  %vm1458_vm0 = vweird.f32 %v1452_v42  ;;  %v1462_v52 = vand.u32 2147483647, %v1452_v42 }
0x154a   :  { %v1496_v21 = vmul.f32 %v3184_v47, %v1495_v49  ;;  %v1484_v49 = vrot.slane %v4205_v51, 6 }
0x154b   :  { %v1465_v35 = vor.u32 1.1754944e-38, %v1464_v25  ;;  %vm1463_vm7 = vcmp.eq.f32.partialorder %v1462_v52, 8.507059e+37 }
0x154c   :  { %v1497_v22 = vadd.f32 %v3184_v47, %v1496_v21 }
0x154e   :  { %v1501_v26 = vsel %vm1500_vm13, %v3184_v47, %v1497_v22 }
0x154f   :  { %v1506_v6 = vsel %vm1503_vm14, %v1505_v29, %v1501_v26  ;;  %v3188_v44 = vpop.eup %3187 }
0x1550   :  { %v1454_v9 = vmul.f32 %v3188_v44, %v1452_v42  ;;  %vm1459_vm15 = vweird.f32 %v3188_v44  ;;  %v1519_v59 = vsub.f32 1.0, %v1506_v6 }
0x1551   :  { %vm1460_vm2 = vmor %vm1458_vm0, %vm1459_vm15 }
0x1552   :  { %v1455_v50 = vsub.f32 1.0, %v1454_v9 }
0x1554   :  { %v1456_v5 = vmul.f32 %v3188_v44, %v1455_v50 }
0x1556   :  { %v1457_v23 = vadd.f32 %v3188_v44, %v1456_v5 }
0x1558   :  { %v1461_v30 = vsel %vm1460_vm2, %v3188_v44, %v1457_v23 }
0x1559   :  { %v1466_v32 = vsel %vm1463_vm7, %v1465_v35, %v1461_v30 }
0x155a   :  { %v1478_v18 = vsub.f32 1.0, %v1466_v32  ;;  %v1486_v56 = vmul.f32 %v1484_v49, %v1466_v32 }
0x1585   :  { %v1510_v3 = vpop.permute.xlu2 %1509 }
0x1586   :  { %v1512_v7 = vmul.f32 %v1510_v3, %v1506_v6 }
0x1588   :  { %1514 = vrot.lane.b32.xlu1 %v1512_v7, %s3379_s16 }
0x15a5   :  { %v1469_v31 = vpop.permute.xlu1 %1468 }
0x15a6   :  { %v1471_v39 = vmul.f32 %v1469_v31, %v1466_v32 }
0x15a8   :  { %1473 = vrot.lane.b32.xlu0 %v1471_v39, %s3379_s16 }
0x15fa   :  { %v1515_v19 = vpop.permute.xlu1 %1514 }
0x15fb   :  { %v1517_v40 = vadd.f32 %v1515_v19, %v1442_v36 }
0x15fd   :  { %3189 = vtanh.f32 %v1517_v40 }
0x1603   :  { %v3190_v10 = vpop.eup %3189 }
0x1604   :  { %1521 = vrot.lane.b32.xlu0 %v3190_v10, %s3380_s19 }
0x161a   :  { %v1474_v47 = vpop.permute.xlu0 %1473 }
0x161b   :  { %v1476_v48 = vadd.f32 %v1474_v47, %v4002_v20  ;;  %v1525_v20 = vmul.f32 %v1506_v6, %v4210_v28 }
0x161d   :  { %3191 = vtanh.f32 %v1476_v48 }
0x1623   :  { %v3192_v4 = vpop.eup %3191 }
0x1624   :  { %1480 = vrot.lane.b32.xlu2 %v3192_v4, %s3380_s19 }
0x1676   :  { %v1522_v36 = vpop.permute.xlu0 %1521 }
0x1677   :  { %v1524_v26 = vmul.f32 %v1522_v36, %v1519_v59 }
0x1679   :  { %v4262_v29 = vadd.f32 %v1525_v20, %v1524_v26 }
0x167b   :  { %v1532_v42 = vrot.slane %v4262_v29, 2 }
0x167e   :  { %v1481_v21 = vpop.permute.xlu2 %1480 }
0x167f   :  { %v1483_v22 = vmul.f32 %v1481_v21, %v1478_v18 }
0x1681   :  { %v4257_v57 = vadd.f32 %v1486_v56, %v1483_v22 }
0x1683   :  { %1528 = vrot.lane.b32.xlu1 %v4257_v57, %s3380_s19  ;;  %v1637_v25 = vrot.slane %v4257_v57, 6 }
0x16f5   :  { %v1529_v3 = vpop.permute.xlu1 %1528 }
0x16f6   :  { %v1534_v51 = vsel %vm250_vm4, %v1529_v3, %v1532_v42 }
0x16f7   :  { %v1535_v7 = vsel %vm346_vm5, %v1534_v51, 1.0 }
0x16f8   :  { %v1537_v44 = vrot.slane %v1535_v7, 6 }
0x16fa   :  { %3005 = vmatmul.msk.f32.vlgmr.msrb.gmra.mxu1 %vm375_vm6, %v1537_v44  ;;  %3007 = vmatmul.msk.f32.vlgmr.msrb.gmra.mxu3 %vm375_vm6, %v1537_v44 }
0x16fb   :  { %3009 = vmatmul.msk.f32.vlgmr.msrb.gmra.mxu0 %vm375_vm6, %v1537_v44  ;;  %3024 = vmatpush.msk.msrb.mxu1 %vm379_vm3, %v4027_v60 }
0x16fc   :  { %3028 = vmatpush.msk.msrb.mxu3 %vm379_vm3, %v3928_v8  ;;  %3030 = vmatpush.msk.msrb.mxu0 %vm379_vm3, %v4036_v45  ;;  %v4303_v8 = vld [vmem:[%s4807_s5 + $0x4] ss:$0 sm:$0xff] }
0x16fd   :  { %1892 = vmatpush.msrb.mxu1 %v4043_v61 }
0x16fe   :  { %2007 = vmatpush.msrb.mxu3 %v3938_v54  ;;  %2027 = vmatpush.msrb.mxu0 %v4050_v62  ;;  %v4307_v54 = vadd.f32 %v4303_v8, %v3845_v24 }
0x16ff   :  { %1893 = vmatpush.msrb.mxu1 %v4056_v63 }
0x1700   :  { %2008 = vmatpush.msrb.mxu3 %v3946_v13  ;;  %2028 = vmatpush.msrb.mxu0 %v4063_v0 }
0x1701   :  { %1894 = vmatpush.msrb.mxu1 %v4069_v1 }
0x1702   :  { %2009 = vmatpush.msrb.mxu3 %v3954_v11  ;;  %2029 = vmatpush.msrb.mxu0 %v4076_v53 }
0x1703   :  { %1895 = vmatpush.msrb.mxu1 %v4159_v58 }
0x1704   :  { %2010 = vmatpush.msrb.mxu3 %v3962_v12  ;;  %2030 = vmatpush.msrb.mxu0 %v4084_v38 }
0x1705   :  { %1896 = vmatpush.msrb.mxu1 %v4167_v34 }
0x1706   :  { %2011 = vmatpush.msrb.mxu3 %v3970_v14  ;;  %2031 = vmatpush.msrb.mxu0 %v4092_v2 }
0x1707   :  { %1897 = vmatpush.msrb.mxu1 %v4175_v43 }
0x1708   :  { %2012 = vmatpush.msrb.mxu3 %v3978_v15  ;;  %2032 = vmatpush.msrb.mxu0 %v4100_v33 }
0x1709   :  { %1898 = vmatpush.msrb.mxu1 %v4183_v55 }
0x170a   :  { %2013 = vmatpush.msrb.mxu3 %v3986_v16  ;;  %2033 = vmatpush.msrb.mxu0 %v4108_v37 }
0x170b   :  { %1899 = vmatpush.msrb.mxu1 %v4191_v27 }
0x170c   :  { %2014 = vmatpush.msrb.mxu3 %v3994_v17  ;;  %2034 = vmatpush.msrb.mxu0 %v4116_v41 }
0x1777   :  { %v1557_v13 = vpop.f32.mrf.mxu1 }
0x1778   :  { %v1600_v11 = vadd.f32 %v1557_v13, %v4307_v54  ;;  %1621 = vrot.lane.b32.xlu2 %v1557_v13, %s3379_s16  ;;  %v1597_v31 = vpop.f32.mrf.mxu0 }
0x177a   :  { %v3010_v12 = vmul.f32 -1.442695, %v1600_v11 }
0x177c   :  { %3193 = vpow2.f32 %v3010_v12 }
0x177d   :  { %v1577_v14 = vpop.f32.mrf.mxu3 }
0x177e   :  { %1662 = vrot.lane.b32.xlu0 %v1577_v14, %s3379_s16  ;;  %v1641_v32 = vadd.f32 %v1597_v31, %v1577_v14 }
0x1780   :  { %v3011_v39 = vmul.f32 -1.442695, %v1641_v32 }
0x1782   :  { %v3194_v15 = vpop.eup %3193 }
0x1783   :  { %v1604_v16 = vadd.f32 1.0, %v3194_v15 }
0x1785   :  { %3195 = vrcp.f32 %v1604_v16  ;;  %v1616_v9 = vand.u32 2147483648, %v1604_v16  ;;  %v1614_v24 = vand.u32 2147483647, %v1604_v16  ;;  %vm1610_vm8 = vweird.f32 %v1604_v16 }
0x1786   :  { %3197 = vpow2.f32 %v3011_v39 }
0x1787   :  { %v1617_v23 = vor.u32 1.1754944e-38, %v1616_v9  ;;  %vm1615_vm10 = vcmp.eq.f32.partialorder %v1614_v24, 8.507059e+37 }
0x178b   :  { %v3196_v17 = vpop.eup %3195 }
0x178c   :  { %v1606_v28 = vmul.f32 %v3196_v17, %v1604_v16  ;;  %vm1611_vm1 = vweird.f32 %v3196_v17  ;;  %v3198_v19 = vpop.eup %3197 }
0x178d   :  { %vm1612_vm9 = vmor %vm1610_vm8, %vm1611_vm1  ;;  %v1645_v40 = vadd.f32 1.0, %v3198_v19 }
0x178e   :  { %v1607_v6 = vsub.f32 1.0, %v1606_v28 }
0x178f   :  { %3199 = vrcp.f32 %v1645_v40  ;;  %v1657_v22 = vand.u32 2147483648, %v1645_v40  ;;  %vm1651_vm12 = vweird.f32 %v1645_v40  ;;  %v1655_v56 = vand.u32 2147483647, %v1645_v40 }
0x1790   :  { %v1608_v50 = vmul.f32 %v3196_v17, %v1607_v6 }
0x1791   :  { %v1658_v36 = vor.u32 1.1754944e-38, %v1657_v22  ;;  %vm1656_vm14 = vcmp.eq.f32.partialorder %v1655_v56, 8.507059e+37 }
0x1792   :  { %v1609_v5 = vadd.f32 %v3196_v17, %v1608_v50 }
0x1794   :  { %v1613_v52 = vsel %vm1612_vm9, %v3196_v17, %v1609_v5 }
0x1795   :  { %v1618_v30 = vsel %vm1615_vm10, %v1617_v23, %v1613_v52  ;;  %v3200_v48 = vpop.eup %3199  ;;  %v4346_v23 = vld [vmem:[%s4808_s6 + $0xa8] sm:$0xff] }
0x1796   :  { %v1639_v35 = vmul.f32 %v1637_v25, %v1618_v30  ;;  %v1647_v4 = vmul.f32 %v3200_v48, %v1645_v40  ;;  %vm1652_vm11 = vweird.f32 %v3200_v48  ;;  %v1631_v11 = vsub.f32 1.0, %v1618_v30 }
0x1797   :  { %vm1653_vm13 = vmor %vm1651_vm12, %vm1652_vm11 }
0x1798   :  { %v1648_v49 = vsub.f32 1.0, %v1647_v4 }
0x179a   :  { %v1649_v18 = vmul.f32 %v3200_v48, %v1648_v49 }
0x179c   :  { %v1650_v21 = vadd.f32 %v3200_v48, %v1649_v18 }
0x179e   :  { %v1654_v57 = vsel %vm1653_vm13, %v3200_v48, %v1650_v21 }
0x179f   :  { %v1659_v26 = vsel %vm1656_vm14, %v1658_v36, %v1654_v57 }
0x17a0   :  { %v1672_v17 = vsub.f32 1.0, %v1659_v26  ;;  %v1678_v6 = vmul.f32 %v1659_v26, %v4262_v29  ;;  %v4336_v29 = vld [vmem:[%s4808_s6 + $0xc0] sm:$0x1] }
0x17d2   :  { %v1622_v10 = vpop.permute.xlu2 %1621 }
0x17d3   :  { %v1624_v47 = vmul.f32 %v1622_v10, %v1618_v30 }
0x17d5   :  { %1626 = vrot.lane.b32.xlu1 %v1624_v47, %s3379_s16 }
0x17f0   :  { %v1663_v59 = vpop.permute.xlu0 %1662 }
0x17f1   :  { %v1665_v20 = vmul.f32 %v1663_v59, %v1659_v26 }
0x17f3   :  { %1667 = vrot.lane.b32.xlu2 %v1665_v20, %s3379_s16 }
0x1847   :  { %v1627_v42 = vpop.permute.xlu1 %1626 }
0x1848   :  { %v1629_v3 = vadd.f32 %v1627_v42, %v4307_v54 }
0x184a   :  { %3201 = vtanh.f32 %v1629_v3 }
0x184d   :  { %v1668_v51 = vpop.permute.xlu2 %1667 }
0x184e   :  { %v1670_v7 = vadd.f32 %v1668_v51, %v1597_v31 }
0x1850   :  { %v3202_v44 = vpop.eup %3201  ;;  %3203 = vtanh.f32 %v1670_v7 }
0x1851   :  { %1633 = vrot.lane.b32.xlu0 %v3202_v44, %s3380_s19 }
0x1856   :  { %v3204_v13 = vpop.eup %3203 }
0x1857   :  { %1674 = vrot.lane.b32.xlu1 %v3204_v13, %s3380_s19 }
0x18c3   :  { %v1634_v12 = vpop.permute.xlu0 %1633 }
0x18c4   :  { %v1636_v14 = vmul.f32 %v1634_v12, %v1631_v11 }
0x18c6   :  { %v4318_v15 = vadd.f32 %v1639_v35, %v1636_v14 }
0x18c8   :  { %1681 = vrot.lane.b32.xlu2 %v4318_v15, %s3380_s19 }
0x18c9   :  { %v1675_v16 = vpop.permute.xlu1 %1674 }
0x18ca   :  { %v1677_v28 = vmul.f32 %v1675_v16, %v1672_v17 }
0x18cc   :  { %v4323_v9 = vadd.f32 %v1678_v6, %v1677_v28 }
0x1922   :  { %v1682_v50 = vpop.permute.xlu2 %1681 }
0x1923   :  { %v1684_v24 = vsel %vm250_vm4, %v1682_v50, %v4323_v9  ;;  %v1788_v50 = vrot.slane %v4318_v15, 6 }
0x1924   :  { %v1685_v5 = vsel %vm346_vm5, %v1684_v24, 1.0 }
0x1925   :  { %3013 = vmatmul.msk.f32.vlgmr.msrb.gmra.mxu2 %vm375_vm6, %v1685_v5  ;;  %3015 = vmatmul.msk.f32.vlgmr.msra.gmra.mxu1 %vm375_vm6, %v1685_v5 }
0x1926   :  { %3017 = vmatmul.msk.f32.vlgmr.msra.gmra.mxu3 %vm375_vm6, %v1685_v5  ;;  %3032 = vmatpush.msk.msrb.mxu2 %vm379_vm3, %v4027_v60  ;;  %v4354_v60 = vld [vmem:[%s4808_s6 + $0x90] sm:$0xff] }
0x1927   :  { %3036 = vmatpush.msk.msra.mxu1 %vm379_vm3, %v4336_v29  ;;  %3038 = vmatpush.msk.msra.mxu3 %vm379_vm3, %v4036_v45  ;;  %v4362_v45 = vld [vmem:[%s4808_s6 + $0x78] sm:$0xff] }
0x1928   :  { %2047 = vmatpush.msrb.mxu2 %v4043_v61  ;;  %v4370_v61 = vld [vmem:[%s4808_s6 + $0x60] sm:$0xff] }
0x1929   :  { %2162 = vmatpush.msra.mxu1 %v4346_v23  ;;  %2182 = vmatpush.msra.mxu3 %v4050_v62  ;;  %v4378_v62 = vld [vmem:[%s4808_s6 + $0x48] sm:$0xff] }
0x192a   :  { %2048 = vmatpush.msrb.mxu2 %v4056_v63  ;;  %v4386_v63 = vld [vmem:[%s4808_s6 + $0x30] sm:$0xff] }
0x192b   :  { %2163 = vmatpush.msra.mxu1 %v4354_v60  ;;  %2183 = vmatpush.msra.mxu3 %v4063_v0  ;;  %v4394_v0 = vld [vmem:[%s4808_s6 + $0x18] sm:$0xff] }
0x192c   :  { %2049 = vmatpush.msrb.mxu2 %v4069_v1  ;;  %v4402_v1 = vld [vmem:[%s4808_s6] sm:$0xff] }
0x192d   :  { %2164 = vmatpush.msra.mxu1 %v4362_v45  ;;  %2184 = vmatpush.msra.mxu3 %v4076_v53 }
0x192e   :  { %2050 = vmatpush.msrb.mxu2 %v4159_v58 }
0x192f   :  { %2165 = vmatpush.msra.mxu1 %v4370_v61  ;;  %2185 = vmatpush.msra.mxu3 %v4084_v38 }
0x1930   :  { %2051 = vmatpush.msrb.mxu2 %v4167_v34 }
0x1931   :  { %2166 = vmatpush.msra.mxu1 %v4378_v62  ;;  %2186 = vmatpush.msra.mxu3 %v4092_v2 }
0x1932   :  { %2052 = vmatpush.msrb.mxu2 %v4175_v43 }
0x1933   :  { %2167 = vmatpush.msra.mxu1 %v4386_v63  ;;  %2187 = vmatpush.msra.mxu3 %v4100_v33 }
0x1934   :  { %2053 = vmatpush.msrb.mxu2 %v4183_v55 }
0x1935   :  { %2168 = vmatpush.msra.mxu1 %v4394_v0  ;;  %2188 = vmatpush.msra.mxu3 %v4108_v37 }
0x1936   :  { %2054 = vmatpush.msrb.mxu2 %v4191_v27 }
0x1937   :  { %2169 = vmatpush.msra.mxu1 %v4402_v1  ;;  %2189 = vmatpush.msra.mxu3 %v4116_v41 }
0x19a2   :  { %v1726_v53 = vpop.f32.mrf.mxu1 }
0x19a3   :  { %1813 = vrot.lane.b32.xlu1 %v1726_v53, %s3379_s16 }
0x19a8   :  { %v1706_v38 = vpop.f32.mrf.mxu2 }
0x19a9   :  { %v1750_v2 = vrot.slane %v1706_v38, 6  ;;  %v1746_v33 = vpop.f32.mrf.mxu3 }
0x19aa   :  { %v1792_v37 = vadd.f32 %v1746_v33, %v1726_v53 }
0x19ab   :  { %1772 = vrot.lane.b32.xlu0 %v1750_v2, %s3379_s16  ;;  %v1752_v52 = vadd.f32 %v1750_v2, %v4307_v54 }
0x19ac   :  { %v3019_v25 = vmul.f32 -1.442695, %v1792_v37 }
0x19ad   :  { %v3018_v30 = vmul.f32 -1.442695, %v1752_v52 }
0x19ae   :  { %3205 = vpow2.f32 %v3019_v25 }
0x19af   :  { %3207 = vpow2.f32 %v3018_v30 }
0x19b4   :  { %v3206_v35 = vpop.eup %3205 }
0x19b5   :  { %v1796_v31 = vadd.f32 1.0, %v3206_v35  ;;  %v3208_v32 = vpop.eup %3207 }
0x19b6   :  { %v1756_v41 = vadd.f32 1.0, %v3208_v32 }
0x19b7   :  { %3209 = vrcp.f32 %v1796_v31  ;;  %v1808_v18 = vand.u32 2147483648, %v1796_v31  ;;  %vm1802_vm0 = vweird.f32 %v1796_v31  ;;  %v1806_v21 = vand.u32 2147483647, %v1796_v31 }
0x19b8   :  { %3211 = vrcp.f32 %v1756_v41  ;;  %v1768_v42 = vand.u32 2147483648, %v1756_v41  ;;  %vm1762_vm8 = vweird.f32 %v1756_v41  ;;  %v1766_v3 = vand.u32 2147483647, %v1756_v41 }
0x19b9   :  { %v1809_v57 = vor.u32 1.1754944e-38, %v1808_v18  ;;  %vm1807_vm7 = vcmp.eq.f32.partialorder %v1806_v21, 8.507059e+37  ;;  %v4496_v18 = vld [vmem:[%s4808_s6 + $0x50] sm:$0xff] }
0x19ba   :  { %v1769_v7 = vor.u32 1.1754944e-38, %v1768_v42  ;;  %vm1767_vm10 = vcmp.eq.f32.partialorder %v1766_v3, 8.507059e+37 }
0x19bd   :  { %v3210_v39 = vpop.eup %3209 }
0x19be   :  { %v1798_v19 = vmul.f32 %v3210_v39, %v1796_v31  ;;  %v3212_v10 = vpop.eup %3211  ;;  %vm1803_vm15 = vweird.f32 %v3210_v39 }
0x19bf   :  { %v1758_v48 = vmul.f32 %v3212_v10, %v1756_v41  ;;  %vm1804_vm2 = vmor %vm1802_vm0, %vm1803_vm15  ;;  %vm1763_vm1 = vweird.f32 %v3212_v10 }
0x19c0   :  { %v1799_v40 = vsub.f32 1.0, %v1798_v19  ;;  %vm1764_vm9 = vmor %vm1762_vm8, %vm1763_vm1  ;;  %v4447_v19 = vld [vmem:[%s4808_s6 + $0xb8] sm:$0xff] }
0x19c1   :  { %v1759_v49 = vsub.f32 1.0, %v1758_v48  ;;  %v4473_v48 = vld [vmem:[%s4808_s6 + $0x88] sm:$0xff] }
0x19c2   :  { %v1800_v47 = vmul.f32 %v3210_v39, %v1799_v40  ;;  %v4454_v40 = vld [vmem:[%s4808_s6 + $0xb0] sm:$0xff] }
0x19c3   :  { %v1760_v56 = vmul.f32 %v3212_v10, %v1759_v49  ;;  %v4488_v49 = vld [vmem:[%s4808_s6 + $0x68] sm:$0xff] }
0x19c4   :  { %v1801_v4 = vadd.f32 %v3210_v39, %v1800_v47  ;;  %v4467_v47 = vld [vmem:[%s4808_s6 + $0x98] sm:$0xff] }
0x19c5   :  { %v1761_v20 = vadd.f32 %v3212_v10, %v1760_v56 }
0x19c6   :  { %v1805_v22 = vsel %vm1804_vm2, %v3210_v39, %v1801_v4  ;;  %v4440_v39 = vld [vmem:[%s4808_s6 + $0xc8] sm:$0x1]  ;;  %v4480_v4 = vld [vmem:[%s4808_s6 + $0x80] sm:$0xff] }
0x19c7   :  { %v1810_v59 = vsel %vm1807_vm7, %v1809_v57, %v1805_v22  ;;  %v1765_v51 = vsel %vm1764_vm9, %v3212_v10, %v1761_v20  ;;  %v4460_v10 = vld [vmem:[%s4808_s6 + $0xa0] sm:$0xff] }
0x19c8   :  { %v1770_v13 = vsel %vm1767_vm10, %v1769_v7, %v1765_v51  ;;  %v1823_v25 = vsub.f32 1.0, %v1810_v59 }
0x19c9   :  { %v1782_v24 = vsub.f32 1.0, %v1770_v13  ;;  %v1790_v38 = vmul.f32 %v1788_v50, %v1770_v13 }
0x1a15   :  { %v1814_v36 = vpop.permute.xlu1 %1813 }
0x1a16   :  { %v1816_v26 = vmul.f32 %v1814_v36, %v1810_v59 }
0x1a18   :  { %1818 = vrot.lane.b32.xlu0 %v1816_v26, %s3379_s16 }
0x1a1d   :  { %v1773_v44 = vpop.permute.xlu0 %1772 }
0x1a1e   :  { %v1775_v11 = vmul.f32 %v1773_v44, %v1770_v13 }
0x1a20   :  { %1777 = vrot.lane.b32.xlu2 %v1775_v11, %s3379_s16 }
0x1a7a   :  { %v1778_v12 = vpop.permute.xlu2 %1777 }
0x1a7b   :  { %v1780_v14 = vadd.f32 %v1778_v12, %v4307_v54 }
0x1a7d   :  { %3213 = vtanh.f32 %v1780_v14 }
0x1a83   :  { %v3214_v16 = vpop.eup %3213 }
0x1a84   :  { %1784 = vrot.lane.b32.xlu1 %v3214_v16, %s3380_s19 }
0x1a8a   :  { %v1819_v17 = vpop.permute.xlu0 %1818 }
0x1a8b   :  { %v1821_v28 = vadd.f32 %v1819_v17, %v1746_v33  ;;  %v1829_v33 = vmul.f32 %v1810_v59, %v4323_v9  ;;  %v4431_v9 = vld [vmem:[%s4808_s6 + $0xd0] sm:$0x1] }
0x1a8d   :  { %3215 = vtanh.f32 %v1821_v28 }
0x1a93   :  { %v3216_v6 = vpop.eup %3215 }
0x1a94   :  { %1825 = vrot.lane.b32.xlu2 %v3216_v6, %s3380_s19 }
0x1aee   :  { %v1826_v37 = vpop.permute.xlu2 %1825 }
0x1aef   :  { %v1828_v52 = vmul.f32 %v1826_v37, %v1823_v25 }
0x1af1   :  { %v4420_v30 = vadd.f32 %v1829_v33, %v1828_v52 }
0x1af3   :  { %v1836_v35 = vrot.slane %v4420_v30, 6 }
0x1af6   :  { %v1785_v5 = vpop.permute.xlu1 %1784 }
0x1af7   :  { %v1787_v53 = vmul.f32 %v1785_v5, %v1782_v24 }
0x1af9   :  { %v4415_v2 = vadd.f32 %v1790_v38, %v1787_v53 }
0x1afb   :  { %1832 = vrot.lane.b32.xlu0 %v4415_v2, %s3380_s19 }
0x1b6d   :  { %v1833_v31 = vpop.permute.xlu0 %1832 }
0x1b6e   :  { %v1838_v15 = vsel %vm250_vm4, %v1833_v31, %v1836_v35 }
0x1b6f   :  { %v1839_v32 = vsel %vm346_vm5, %v1838_v15, 1.0 }
0x1b70   :  { %v1841_v41 = vrot.slane %v1839_v32, 2 }
0x1b72   :  { %3021 = vmatmul.msk.f32.vlgmr.msra.gmra.mxu0 %vm375_vm6, %v1841_v41  ;;  %3023 = vmatmul.msk.f32.vlgmr.msra.gmra.mxu2 %vm375_vm6, %v1841_v41 }
0x1b73   :  { %3025 = vmatmul.msk.f32.vlgmr.msrb.gmra.mxu1 %vm375_vm6, %v1841_v41  ;;  %3040 = vmatpush.msk.msra.mxu0 %vm379_vm3, %v4431_v9 }
0x1b74   :  { %3044 = vmatpush.msk.msra.mxu2 %vm379_vm3, %v4336_v29  ;;  %3046 = vmatpush.msk.msrb.mxu1 %vm379_vm3, %v4440_v39 }
0x1b75   :  { %2202 = vmatpush.msra.mxu0 %v4447_v19 }
0x1b76   :  { %2311 = vmatpush.msra.mxu2 %v4346_v23  ;;  %2331 = vmatpush.msrb.mxu1 %v4454_v40 }
0x1b77   :  { %2203 = vmatpush.msra.mxu0 %v4460_v10 }
0x1b78   :  { %2312 = vmatpush.msra.mxu2 %v4354_v60  ;;  %2332 = vmatpush.msrb.mxu1 %v4467_v47 }
0x1b79   :  { %2204 = vmatpush.msra.mxu0 %v4473_v48 }
0x1b7a   :  { %2313 = vmatpush.msra.mxu2 %v4362_v45  ;;  %2333 = vmatpush.msrb.mxu1 %v4480_v4 }
0x1b7b   :  { %2205 = vmatpush.msra.mxu0 %v4159_v58  ;;  %v4504_v58 = vld [vmem:[%s4808_s6 + $0x38] sm:$0xff] }
0x1b7c   :  { %2314 = vmatpush.msra.mxu2 %v4370_v61  ;;  %2334 = vmatpush.msrb.mxu1 %v4488_v49 }
0x1b7d   :  { %2206 = vmatpush.msra.mxu0 %v4167_v34  ;;  %v4512_v34 = vld [vmem:[%s4808_s6 + $0x20] sm:$0xff] }
0x1b7e   :  { %2315 = vmatpush.msra.mxu2 %v4378_v62  ;;  %2335 = vmatpush.msrb.mxu1 %v4496_v18 }
0x1b7f   :  { %2207 = vmatpush.msra.mxu0 %v4175_v43  ;;  %v4520_v43 = vld [vmem:[%s4808_s6 + $0x8] sm:$0xff] }
0x1b80   :  { %2316 = vmatpush.msra.mxu2 %v4386_v63  ;;  %2336 = vmatpush.msrb.mxu1 %v4504_v58 }
0x1b81   :  { %2208 = vmatpush.msra.mxu0 %v4183_v55 }
0x1b82   :  { %2317 = vmatpush.msra.mxu2 %v4394_v0  ;;  %2337 = vmatpush.msrb.mxu1 %v4512_v34 }
0x1b83   :  { %2209 = vmatpush.msra.mxu0 %v4191_v27 }
0x1b84   :  { %2318 = vmatpush.msra.mxu2 %v4402_v1  ;;  %2338 = vmatpush.msrb.mxu1 %v4520_v43 }
0x1bef   :  { %v1861_v55 = vpop.f32.mrf.mxu0 }
0x1bf0   :  { %v1905_v21 = vrot.slane %v1861_v55, 4  ;;  %v1901_v56 = vpop.f32.mrf.mxu1 }
0x1bf2   :  { %1927 = vrot.lane.b32.xlu1 %v1905_v21, %s3379_s16  ;;  %v1907_v26 = vadd.f32 %v1905_v21, %v4307_v54 }
0x1bf4   :  { %v3026_v20 = vmul.f32 -1.442695, %v1907_v26 }
0x1bf5   :  { %v1881_v22 = vpop.f32.mrf.mxu2 }
0x1bf6   :  { %1968 = vrot.lane.b32.xlu2 %v1881_v22, %s3379_s16  ;;  %v1947_v57 = vadd.f32 %v1901_v56, %v1881_v22 }
0x1bf8   :  { %v3027_v36 = vmul.f32 -1.442695, %v1947_v57 }
0x1bfa   :  { %3217 = vpow2.f32 %v3027_v36 }
0x1c00   :  { %v3218_v27 = vpop.eup %3217 }
0x1c01   :  { %v1951_v59 = vadd.f32 1.0, %v3218_v27  ;;  %v1943_v27 = vrot.slane %v4415_v2, 6 }
0x1c03   :  { %3219 = vrcp.f32 %v1951_v59  ;;  %v1963_v12 = vand.u32 2147483648, %v1951_v59  ;;  %vm1957_vm12 = vweird.f32 %v1951_v59  ;;  %v1961_v14 = vand.u32 2147483647, %v1951_v59 }
0x1c04   :  { %3221 = vpow2.f32 %v3026_v20 }
0x1c05   :  { %v1964_v28 = vor.u32 1.1754944e-38, %v1963_v12  ;;  %vm1962_vm14 = vcmp.eq.f32.partialorder %v1961_v14, 8.507059e+37 }
0x1c09   :  { %v3220_v42 = vpop.eup %3219 }
0x1c0a   :  { %v1953_v3 = vmul.f32 %v3220_v42, %v1951_v59  ;;  %v3222_v51 = vpop.eup %3221  ;;  %vm1958_vm11 = vweird.f32 %v3220_v42 }
0x1c0b   :  { %v1911_v44 = vadd.f32 1.0, %v3222_v51  ;;  %vm1959_vm13 = vmor %vm1957_vm12, %vm1958_vm11 }
0x1c0c   :  { %v1954_v7 = vsub.f32 1.0, %v1953_v3 }
0x1c0d   :  { %3223 = vrcp.f32 %v1911_v44  ;;  %v1923_v25 = vand.u32 2147483648, %v1911_v44  ;;  %vm1917_vm0 = vweird.f32 %v1911_v44  ;;  %v1921_v52 = vand.u32 2147483647, %v1911_v44 }
0x1c0e   :  { %v1955_v13 = vmul.f32 %v3220_v42, %v1954_v7 }
0x1c0f   :  { %v1924_v35 = vor.u32 1.1754944e-38, %v1923_v25  ;;  %vm1922_vm7 = vcmp.eq.f32.partialorder %v1921_v52, 8.507059e+37 }
0x1c10   :  { %v1956_v11 = vadd.f32 %v3220_v42, %v1955_v13 }
0x1c12   :  { %v1960_v16 = vsel %vm1959_vm13, %v3220_v42, %v1956_v11 }
0x1c13   :  { %v3224_v17 = vpop.eup %3223  ;;  %v1965_v50 = vsel %vm1962_vm14, %v1964_v28, %v1960_v16  ;;  %v4579_v28 = vld [vmem:[%s4808_s6 + $0x40] sm:$0xff] }
0x1c14   :  { %v1913_v5 = vmul.f32 %v3224_v17, %v1911_v44  ;;  %vm1918_vm15 = vweird.f32 %v3224_v17  ;;  %v1978_v51 = vsub.f32 1.0, %v1965_v50  ;;  %v1984_v44 = vmul.f32 %v1965_v50, %v4420_v30  ;;  %v4563_v30 = vld [vmem:[%s4808_s6 + $0x70] sm:$0xff] }
0x1c15   :  { %vm1919_vm2 = vmor %vm1917_vm0, %vm1918_vm15 }
0x1c16   :  { %v1914_v53 = vsub.f32 1.0, %v1913_v5 }
0x1c18   :  { %v1915_v38 = vmul.f32 %v3224_v17, %v1914_v53 }
0x1c1a   :  { %v1916_v37 = vadd.f32 %v3224_v17, %v1915_v38 }
0x1c1c   :  { %v1920_v33 = vsel %vm1919_vm2, %v3224_v17, %v1916_v37  ;;  %v4571_v17 = vld [vmem:[%s4808_s6 + $0x58] sm:$0xff] }
0x1c1d   :  { %v1925_v15 = vsel %vm1922_vm7, %v1924_v35, %v1920_v33 }
0x1c1e   :  { %v1937_v59 = vsub.f32 1.0, %v1925_v15  ;;  %v1945_v42 = vmul.f32 %v1943_v27, %v1925_v15 }
0x1c50   :  { %v1969_v6 = vpop.permute.xlu2 %1968 }
0x1c51   :  { %v1971_v24 = vmul.f32 %v1969_v6, %v1965_v50  ;;  %v4587_v6 = vld [vmem:[%s4808_s6 + $0x28] sm:$0xff]  ;;  %v4595_v50 = vld [vmem:[%s4808_s6 + $0x10] sm:$0xff] }
0x1c53   :  { %1973 = vrot.lane.b32.xlu1 %v1971_v24, %s3379_s16 }
0x1c64   :  { %v1928_v31 = vpop.permute.xlu1 %1927 }
0x1c65   :  { %v1930_v32 = vmul.f32 %v1928_v31, %v1925_v15 }
0x1c67   :  { %1932 = vrot.lane.b32.xlu0 %v1930_v32, %s3379_s16 }
0x1cc5   :  { %v1974_v41 = vpop.permute.xlu1 %1973 }
0x1cc6   :  { %v1976_v55 = vadd.f32 %v1974_v41, %v1901_v56 }
0x1cc8   :  { %3225 = vtanh.f32 %v1976_v55 }
0x1cce   :  { %v3226_v21 = vpop.eup %3225 }
0x1ccf   :  { %1980 = vrot.lane.b32.xlu0 %v3226_v21, %s3380_s19 }
0x1cd9   :  { %v1933_v22 = vpop.permute.xlu0 %1932 }
0x1cda   :  { %v1935_v57 = vadd.f32 %v1933_v22, %v4307_v54 }
0x1cdc   :  { %3227 = vtanh.f32 %v1935_v57 }
0x1ce2   :  { %v3228_v36 = vpop.eup %3227 }
0x1ce3   :  { %1939 = vrot.lane.b32.xlu2 %v3228_v36, %s3380_s19 }
0x1d3d   :  { %v1940_v26 = vpop.permute.xlu2 %1939 }
0x1d3e   :  { %v1942_v20 = vmul.f32 %v1940_v26, %v1937_v59 }
0x1d40   :  { %v4532_v3 = vadd.f32 %v1945_v42, %v1942_v20 }
0x1d41   :  { %v1981_v56 = vpop.permute.xlu0 %1980 }
0x1d42   :  { %1987 = vrot.lane.b32.xlu1 %v4532_v3, %s3380_s19  ;;  %v1983_v7 = vmul.f32 %v1981_v56, %v1978_v51  ;;  %v2098_v22 = vrot.slane %v4532_v3, 6 }
0x1d44   :  { %v4537_v13 = vadd.f32 %v1984_v44, %v1983_v7 }
0x1d46   :  { %v1991_v11 = vrot.slane %v4537_v13, 4 }
0x1db4   :  { %v1988_v12 = vpop.permute.xlu1 %1987 }
0x1db5   :  { %v1993_v2 = vsel %vm250_vm4, %v1988_v12, %v1991_v11 }
0x1db6   :  { %v1994_v14 = vsel %vm346_vm5, %v1993_v2, 1.0 }
0x1db7   :  { %v1996_v16 = vrot.slane %v1994_v14, 4 }
0x1db9   :  { %3029 = vmatmul.msk.f32.vlgmr.msrb.gmra.mxu3 %vm375_vm6, %v1996_v16  ;;  %3031 = vmatmul.msk.f32.vlgmr.msrb.gmra.mxu0 %vm375_vm6, %v1996_v16 }
0x1dba   :  { %3033 = vmatmul.msk.f32.vlgmr.msrb.gmra.mxu2 %vm375_vm6, %v1996_v16  ;;  %3048 = vmatpush.msk.msrb.mxu3 %vm379_vm3, %v4431_v9 }
0x1dbb   :  { %3052 = vmatpush.msk.msrb.mxu0 %vm379_vm3, %v4336_v29  ;;  %3054 = vmatpush.msk.msrb.mxu2 %vm379_vm3, %v4440_v39 }
0x1dbc   :  { %2351 = vmatpush.msrb.mxu3 %v4447_v19 }
0x1dbd   :  { %2466 = vmatpush.msrb.mxu0 %v4346_v23  ;;  %2486 = vmatpush.msrb.mxu2 %v4454_v40 }
0x1dbe   :  { %2352 = vmatpush.msrb.mxu3 %v4460_v10 }
0x1dbf   :  { %2467 = vmatpush.msrb.mxu0 %v4354_v60  ;;  %2487 = vmatpush.msrb.mxu2 %v4467_v47 }
0x1dc0   :  { %2353 = vmatpush.msrb.mxu3 %v4473_v48 }
0x1dc1   :  { %2468 = vmatpush.msrb.mxu0 %v4362_v45  ;;  %2488 = vmatpush.msrb.mxu2 %v4480_v4 }
0x1dc2   :  { %2354 = vmatpush.msrb.mxu3 %v4563_v30 }
0x1dc3   :  { %2469 = vmatpush.msrb.mxu0 %v4370_v61  ;;  %2489 = vmatpush.msrb.mxu2 %v4488_v49 }
0x1dc4   :  { %2355 = vmatpush.msrb.mxu3 %v4571_v17 }
0x1dc5   :  { %2470 = vmatpush.msrb.mxu0 %v4378_v62  ;;  %2490 = vmatpush.msrb.mxu2 %v4496_v18 }
0x1dc6   :  { %2356 = vmatpush.msrb.mxu3 %v4579_v28 }
0x1dc7   :  { %2471 = vmatpush.msrb.mxu0 %v4386_v63  ;;  %2491 = vmatpush.msrb.mxu2 %v4504_v58 }
0x1dc8   :  { %2357 = vmatpush.msrb.mxu3 %v4587_v6 }
0x1dc9   :  { %2472 = vmatpush.msrb.mxu0 %v4394_v0  ;;  %2492 = vmatpush.msrb.mxu2 %v4512_v34 }
0x1dca   :  { %2358 = vmatpush.msrb.mxu3 %v4595_v50 }
0x1dcb   :  { %2473 = vmatpush.msrb.mxu0 %v4402_v1  ;;  %2493 = vmatpush.msrb.mxu2 %v4520_v43 }
0x1e36   :  { %v2036_v24 = vpop.f32.mrf.mxu0 }
0x1e37   :  { %2123 = vrot.lane.b32.xlu0 %v2036_v24, %s3379_s16 }
0x1e3c   :  { %v2016_v5 = vpop.f32.mrf.mxu3 }
0x1e3d   :  { %v2060_v53 = vrot.slane %v2016_v5, 2  ;;  %v2056_v59 = vpop.f32.mrf.mxu2 }
0x1e3e   :  { %v2102_v26 = vadd.f32 %v2056_v59, %v2036_v24 }
0x1e3f   :  { %v2062_v38 = vadd.f32 %v2060_v53, %v4307_v54  ;;  %2082 = vrot.lane.b32.xlu2 %v2060_v53, %s3379_s16 }
0x1e40   :  { %v3035_v20 = vmul.f32 -1.442695, %v2102_v26 }
0x1e41   :  { %v3034_v37 = vmul.f32 -1.442695, %v2062_v38 }
0x1e43   :  { %3229 = vpow2.f32 %v3034_v37 }
0x1e49   :  { %v3230_v25 = vpop.eup %3229 }
0x1e4a   :  { %v2066_v52 = vadd.f32 1.0, %v3230_v25 }
0x1e4c   :  { %3231 = vrcp.f32 %v2066_v52  ;;  %v2078_v15 = vand.u32 2147483648, %v2066_v52  ;;  %v2076_v41 = vand.u32 2147483647, %v2066_v52  ;;  %vm2072_vm8 = vweird.f32 %v2066_v52 }
0x1e4d   :  { %3233 = vpow2.f32 %v3035_v20 }
0x1e4e   :  { %v2079_v21 = vor.u32 1.1754944e-38, %v2078_v15  ;;  %vm2077_vm10 = vcmp.eq.f32.partialorder %v2076_v41, 8.507059e+37 }
0x1e52   :  { %v3232_v33 = vpop.eup %3231 }
0x1e53   :  { %v2068_v35 = vmul.f32 %v3232_v33, %v2066_v52  ;;  %vm2073_vm1 = vweird.f32 %v3232_v33  ;;  %v3234_v42 = vpop.eup %3233 }
0x1e54   :  { %vm2074_vm9 = vmor %vm2072_vm8, %vm2073_vm1  ;;  %v2106_v56 = vadd.f32 1.0, %v3234_v42 }
0x1e55   :  { %v2069_v31 = vsub.f32 1.0, %v2068_v35 }
0x1e56   :  { %3235 = vrcp.f32 %v2106_v56  ;;  %v2118_v14 = vand.u32 2147483648, %v2106_v56  ;;  %vm2112_vm12 = vweird.f32 %v2106_v56  ;;  %v2116_v16 = vand.u32 2147483647, %v2106_v56 }
0x1e57   :  { %v2070_v32 = vmul.f32 %v3232_v33, %v2069_v31 }
0x1e58   :  { %v2119_v5 = vor.u32 1.1754944e-38, %v2118_v14  ;;  %vm2117_vm14 = vcmp.eq.f32.partialorder %v2116_v16, 8.507059e+37 }
0x1e59   :  { %v2071_v55 = vadd.f32 %v3232_v33, %v2070_v32 }
0x1e5b   :  { %v2075_v57 = vsel %vm2074_vm9, %v3232_v33, %v2071_v55 }
0x1e5c   :  { %v2080_v36 = vsel %vm2077_vm10, %v2079_v21, %v2075_v57  ;;  %v3236_v51 = vpop.eup %3235 }
0x1e5d   :  { %v2100_v27 = vmul.f32 %v2098_v22, %v2080_v36  ;;  %v2108_v7 = vmul.f32 %v3236_v51, %v2106_v56  ;;  %vm2113_vm11 = vweird.f32 %v3236_v51  ;;  %v2092_v32 = vsub.f32 1.0, %v2080_v36 }
0x1e5e   :  { %vm2114_vm13 = vmor %vm2112_vm12, %vm2113_vm11 }
0x1e5f   :  { %v2109_v12 = vsub.f32 1.0, %v2108_v7 }
0x1e61   :  { %v2110_v2 = vmul.f32 %v3236_v51, %v2109_v12 }
0x1e63   :  { %v2111_v3 = vadd.f32 %v3236_v51, %v2110_v2 }
0x1e65   :  { %v2115_v24 = vsel %vm2114_vm13, %v3236_v51, %v2111_v3 }
0x1e66   :  { %v2120_v38 = vsel %vm2117_vm14, %v2119_v5, %v2115_v24 }
0x1e67   :  { %v2133_v57 = vsub.f32 1.0, %v2120_v38  ;;  %v2139_v26 = vmul.f32 %v2120_v38, %v4537_v13 }
0x1e99   :  { %v2083_v44 = vpop.permute.xlu2 %2082 }
0x1e9a   :  { %v2085_v11 = vmul.f32 %v2083_v44, %v2080_v36 }
0x1e9c   :  { %2087 = vrot.lane.b32.xlu1 %v2085_v11, %s3379_s16 }
0x1ea9   :  { %v2124_v53 = vpop.permute.xlu0 %2123 }
0x1eaa   :  { %v2126_v37 = vmul.f32 %v2124_v53, %v2120_v38 }
0x1eac   :  { %2128 = vrot.lane.b32.xlu2 %v2126_v37, %s3379_s16 }
0x1f06   :  { %v2129_v25 = vpop.permute.xlu2 %2128 }
0x1f07   :  { %v2131_v52 = vadd.f32 %v2129_v25, %v2056_v59 }
0x1f09   :  { %3237 = vtanh.f32 %v2131_v52 }
0x1f0e   :  { %v2088_v33 = vpop.permute.xlu1 %2087 }
0x1f0f   :  { %v3238_v35 = vpop.eup %3237  ;;  %v2090_v31 = vadd.f32 %v2088_v33, %v4307_v54 }
0x1f10   :  { %2135 = vrot.lane.b32.xlu1 %v3238_v35, %s3380_s19 }
0x1f11   :  { %3239 = vtanh.f32 %v2090_v31 }
0x1f17   :  { %v3240_v15 = vpop.eup %3239 }
0x1f18   :  { %2094 = vrot.lane.b32.xlu0 %v3240_v15, %s3380_s19 }
0x1f82   :  { %v2136_v22 = vpop.permute.xlu1 %2135 }
0x1f83   :  { %v2138_v59 = vmul.f32 %v2136_v22, %v2133_v57 }
0x1f85   :  { %v4614_v54 = vadd.f32 %v2139_v26, %v2138_v59 }
0x1f87   :  { %v2146_v20 = vrot.slane %v4614_v54, 2 }
0x1f8a   :  { %v2095_v41 = vpop.permute.xlu0 %2094 }
0x1f8b   :  { %v2097_v55 = vmul.f32 %v2095_v41, %v2092_v32 }
0x1f8d   :  { %v4609_v21 = vadd.f32 %v2100_v27, %v2097_v55 }
0x1f8f   :  { %2142 = vrot.lane.b32.xlu2 %v4609_v21, %s3380_s19 }
0x1fe9   :  { %v2143_v42 = vpop.permute.xlu2 %2142 }
0x1fea   :  { %v2148_v56 = vsel %vm250_vm4, %v2143_v42, %v2146_v20 }
0x1feb   :  { %v2149_v36 = vsel %vm346_vm5, %v2148_v56, 1.0 }
0x1fec   :  { %v2151_v51 = vrot.slane %v2149_v36, 6  ;;  %v2251_v36 = vrot.slane %v4609_v21, 6 }
0x1fee   :  { %3037 = vmatmul.msk.f32.vlgmr.msra.gmra.mxu1 %vm375_vm6, %v2151_v51  ;;  %3039 = vmatmul.msk.f32.vlgmr.msra.gmra.mxu3 %vm375_vm6, %v2151_v51 }
0x1fef   :  { %3041 = vmatmul.msk.f32.vlgmr.msra.gmra.mxu0 %vm375_vm6, %v2151_v51  ;;  %3056 = vmatpush.msk.msra.mxu1 %vm379_vm3, %v4431_v9 }
0x1ff0   :  { %3060 = vmatpush.msk.msra.mxu3 %vm379_vm3, %v4336_v29  ;;  %3062 = vmatpush.msk.msra.mxu0 %vm379_vm3, %v4440_v39 }
0x1ff1   :  { %2506 = vmatpush.msra.mxu1 %v4447_v19 }
0x1ff2   :  { %2621 = vmatpush.msra.mxu3 %v4346_v23  ;;  %2641 = vmatpush.msra.mxu0 %v4454_v40 }
0x1ff3   :  { %2507 = vmatpush.msra.mxu1 %v4460_v10 }
0x1ff4   :  { %2622 = vmatpush.msra.mxu3 %v4354_v60  ;;  %2642 = vmatpush.msra.mxu0 %v4467_v47  ;;  %v4656_v60 = vadd.f32 %v4303_v8, %v3847_v46 }
0x1ff5   :  { %2508 = vmatpush.msra.mxu1 %v4473_v48 }
0x1ff6   :  { %2623 = vmatpush.msra.mxu3 %v4362_v45  ;;  %2643 = vmatpush.msra.mxu0 %v4480_v4 }
0x1ff7   :  { %2509 = vmatpush.msra.mxu1 %v4563_v30 }
0x1ff8   :  { %2624 = vmatpush.msra.mxu3 %v4370_v61  ;;  %2644 = vmatpush.msra.mxu0 %v4488_v49 }
0x1ff9   :  { %2510 = vmatpush.msra.mxu1 %v4571_v17 }
0x1ffa   :  { %2625 = vmatpush.msra.mxu3 %v4378_v62  ;;  %2645 = vmatpush.msra.mxu0 %v4496_v18 }
0x1ffb   :  { %2511 = vmatpush.msra.mxu1 %v4579_v28 }
0x1ffc   :  { %2626 = vmatpush.msra.mxu3 %v4386_v63  ;;  %2646 = vmatpush.msra.mxu0 %v4504_v58 }
0x1ffd   :  { %2512 = vmatpush.msra.mxu1 %v4587_v6 }
0x1ffe   :  { %2627 = vmatpush.msra.mxu3 %v4394_v0  ;;  %2647 = vmatpush.msra.mxu0 %v4512_v34 }
0x1fff   :  { %2513 = vmatpush.msra.mxu1 %v4595_v50 }
0x2000   :  { %2628 = vmatpush.msra.mxu3 %v4402_v1  ;;  %2648 = vmatpush.msra.mxu0 %v4520_v43 }
0x206b   :  { %v2171_v29 = vpop.f32.mrf.mxu1 }
0x206c   :  { %2235 = vrot.lane.b32.xlu0 %v2171_v29, %s3379_s16  ;;  %v2214_v45 = vadd.f32 %v2171_v29, %v4656_v60  ;;  %v2211_v62 = vpop.f32.mrf.mxu0 }
0x206e   :  { %v3042_v61 = vmul.f32 -1.442695, %v2214_v45 }
0x2070   :  { %3241 = vpow2.f32 %v3042_v61 }
0x2071   :  { %v2191_v23 = vpop.f32.mrf.mxu3 }
0x2072   :  { %2276 = vrot.lane.b32.xlu1 %v2191_v23, %s3379_s16  ;;  %v2255_v63 = vadd.f32 %v2211_v62, %v2191_v23 }
0x2074   :  { %v3043_v0 = vmul.f32 -1.442695, %v2255_v63 }
0x2076   :  { %v3242_v1 = vpop.eup %3241  ;;  %3243 = vpow2.f32 %v3043_v0 }
0x2077   :  { %v2218_v13 = vadd.f32 1.0, %v3242_v1 }
0x2079   :  { %3245 = vrcp.f32 %v2218_v13  ;;  %v2230_v16 = vand.u32 2147483648, %v2218_v13  ;;  %vm2224_vm0 = vweird.f32 %v2218_v13  ;;  %v2228_v24 = vand.u32 2147483647, %v2218_v13 }
0x207b   :  { %v2231_v38 = vor.u32 1.1754944e-38, %v2230_v16  ;;  %vm2229_vm7 = vcmp.eq.f32.partialorder %v2228_v24, 8.507059e+37 }
0x207c   :  { %v3244_v27 = vpop.eup %3243 }
0x207d   :  { %v2259_v7 = vadd.f32 1.0, %v3244_v27 }
0x207f   :  { %v3246_v44 = vpop.eup %3245  ;;  %3247 = vrcp.f32 %v2259_v7  ;;  %v2271_v33 = vand.u32 2147483648, %v2259_v7  ;;  %vm2265_vm8 = vweird.f32 %v2259_v7  ;;  %v2269_v31 = vand.u32 2147483647, %v2259_v7 }
0x2080   :  { %v2220_v11 = vmul.f32 %v3246_v44, %v2218_v13  ;;  %vm2225_vm15 = vweird.f32 %v3246_v44 }
0x2081   :  { %vm2226_vm2 = vmor %vm2224_vm0, %vm2225_vm15  ;;  %v2272_v32 = vor.u32 1.1754944e-38, %v2271_v33  ;;  %vm2270_vm10 = vcmp.eq.f32.partialorder %v2269_v31, 8.507059e+37 }
0x2082   :  { %v2221_v2 = vsub.f32 1.0, %v2220_v11 }
0x2084   :  { %v2222_v8 = vmul.f32 %v3246_v44, %v2221_v2 }
0x2085   :  { %v3248_v12 = vpop.eup %3247 }
0x2086   :  { %v2261_v46 = vmul.f32 %v3248_v12, %v2259_v7  ;;  %v2223_v14 = vadd.f32 %v3246_v44, %v2222_v8  ;;  %vm2266_vm1 = vweird.f32 %v3248_v12 }
0x2087   :  { %vm2267_vm9 = vmor %vm2265_vm8, %vm2266_vm1 }
0x2088   :  { %v2262_v3 = vsub.f32 1.0, %v2261_v46  ;;  %v2227_v53 = vsel %vm2226_vm2, %v3246_v44, %v2223_v14 }
0x2089   :  { %v2232_v52 = vsel %vm2229_vm7, %v2231_v38, %v2227_v53 }
0x208a   :  { %v2263_v5 = vmul.f32 %v3248_v12, %v2262_v3  ;;  %v2245_v51 = vsub.f32 1.0, %v2232_v52  ;;  %v2253_v45 = vmul.f32 %v2251_v36, %v2232_v52 }
0x208c   :  { %v2264_v37 = vadd.f32 %v3248_v12, %v2263_v5 }
0x208e   :  { %v2268_v15 = vsel %vm2267_vm9, %v3248_v12, %v2264_v37 }
0x208f   :  { %v2273_v55 = vsel %vm2270_vm10, %v2272_v32, %v2268_v15 }
0x2090   :  { %v2286_v0 = vsub.f32 1.0, %v2273_v55 }
0x20de   :  { %v2236_v25 = vpop.permute.xlu0 %2235 }
0x20df   :  { %v2238_v35 = vmul.f32 %v2236_v25, %v2232_v52 }
0x20e1   :  { %2240 = vrot.lane.b32.xlu2 %v2238_v35, %s3379_s16 }
0x20e4   :  { %v2277_v41 = vpop.permute.xlu1 %2276 }
0x20e5   :  { %v2279_v22 = vmul.f32 %v2277_v41, %v2273_v55 }
0x20e7   :  { %2281 = vrot.lane.b32.xlu0 %v2279_v22, %s3379_s16 }
0x213b   :  { %v2241_v57 = vpop.permute.xlu2 %2240 }
0x213c   :  { %v2243_v59 = vadd.f32 %v2241_v57, %v4656_v60 }
0x213e   :  { %3249 = vtanh.f32 %v2243_v59 }
0x2144   :  { %v3250_v26 = vpop.eup %3249 }
0x2145   :  { %2247 = vrot.lane.b32.xlu1 %v3250_v26, %s3380_s19 }
0x2159   :  { %v2282_v20 = vpop.permute.xlu0 %2281 }
0x215a   :  { %v2284_v42 = vadd.f32 %v2282_v20, %v2211_v62  ;;  %v2292_v62 = vmul.f32 %v2273_v55, %v4614_v54 }
0x215c   :  { %3251 = vtanh.f32 %v2284_v42 }
0x2162   :  { %v3252_v56 = vpop.eup %3251 }
0x2163   :  { %2288 = vrot.lane.b32.xlu2 %v3252_v56, %s3380_s19 }
0x21b7   :  { %v2248_v29 = vpop.permute.xlu1 %2247 }
0x21b8   :  { %v2250_v23 = vmul.f32 %v2248_v29, %v2245_v51 }
0x21ba   :  { %v4665_v61 = vadd.f32 %v2253_v45, %v2250_v23 }
0x21bc   :  { %2295 = vrot.lane.b32.xlu0 %v4665_v61, %s3380_s19  ;;  %v2402_v22 = vrot.slane %v4665_v61, 6 }
0x21bd   :  { %v2289_v63 = vpop.permute.xlu2 %2288 }
0x21be   :  { %v2291_v1 = vmul.f32 %v2289_v63, %v2286_v0 }
0x21c0   :  { %v4670_v13 = vadd.f32 %v2292_v62, %v2291_v1 }
0x222e   :  { %v2296_v27 = vpop.permute.xlu0 %2295 }
0x222f   :  { %v2298_v21 = vsel %vm250_vm4, %v2296_v27, %v4670_v13 }
0x2230   :  { %v2299_v7 = vsel %vm346_vm5, %v2298_v21, 1.0 }
0x2231   :  { %3045 = vmatmul.msk.f32.vlgmr.msra.gmra.mxu2 %vm375_vm6, %v2299_v7  ;;  %3047 = vmatmul.msk.f32.vlgmr.msrb.gmra.mxu1 %vm375_vm6, %v2299_v7 }
0x2232   :  { %3049 = vmatmul.msk.f32.vlgmr.msrb.gmra.mxu3 %vm375_vm6, %v2299_v7  ;;  %3064 = vmatpush.msk.msra.mxu2 %vm379_vm3, %v4431_v9 }
0x2233   :  { %3068 = vmatpush.msk.msrb.mxu1 %vm379_vm3, %v4440_v39  ;;  %3070 = vmatpush.msk.msrb.mxu3 %vm379_vm3, %v4431_v9 }
0x2234   :  { %2661 = vmatpush.msra.mxu2 %v4447_v19 }
0x2235   :  { %2776 = vmatpush.msrb.mxu1 %v4454_v40  ;;  %2796 = vmatpush.msrb.mxu3 %v4447_v19 }
0x2236   :  { %2662 = vmatpush.msra.mxu2 %v4460_v10 }
0x2237   :  { %2777 = vmatpush.msrb.mxu1 %v4467_v47  ;;  %2797 = vmatpush.msrb.mxu3 %v4460_v10 }
0x2238   :  { %2663 = vmatpush.msra.mxu2 %v4473_v48 }
0x2239   :  { %2778 = vmatpush.msrb.mxu1 %v4480_v4  ;;  %2798 = vmatpush.msrb.mxu3 %v4473_v48 }
0x223a   :  { %2664 = vmatpush.msra.mxu2 %v4563_v30 }
0x223b   :  { %2779 = vmatpush.msrb.mxu1 %v4488_v49  ;;  %2799 = vmatpush.msrb.mxu3 %v4563_v30 }
0x223c   :  { %2665 = vmatpush.msra.mxu2 %v4571_v17 }
0x223d   :  { %2780 = vmatpush.msrb.mxu1 %v4496_v18  ;;  %2800 = vmatpush.msrb.mxu3 %v4571_v17 }
0x223e   :  { %2666 = vmatpush.msra.mxu2 %v4579_v28 }
0x223f   :  { %2781 = vmatpush.msrb.mxu1 %v4504_v58  ;;  %2801 = vmatpush.msrb.mxu3 %v4579_v28 }
0x2240   :  { %2667 = vmatpush.msra.mxu2 %v4587_v6 }
0x2241   :  { %2782 = vmatpush.msrb.mxu1 %v4512_v34  ;;  %2802 = vmatpush.msrb.mxu3 %v4587_v6 }
0x2242   :  { %2668 = vmatpush.msra.mxu2 %v4595_v50 }
0x2243   :  { %2783 = vmatpush.msrb.mxu1 %v4520_v43  ;;  %2803 = vmatpush.msrb.mxu3 %v4595_v50 }
0x22ae   :  { %v2340_v9 = vpop.f32.mrf.mxu1 }
0x22af   :  { %2427 = vrot.lane.b32.xlu2 %v2340_v9, %s3379_s16 }
0x22b4   :  { %v2320_v39 = vpop.f32.mrf.mxu2 }
0x22b5   :  { %v2364_v19 = vrot.slane %v2320_v39, 6  ;;  %v2360_v40 = vpop.f32.mrf.mxu3 }
0x22b6   :  { %v2406_v10 = vadd.f32 %v2360_v40, %v2340_v9 }
0x22b7   :  { %2386 = vrot.lane.b32.xlu1 %v2364_v19, %s3379_s16  ;;  %v2366_v58 = vadd.f32 %v2364_v19, %v4656_v60 }
0x22b8   :  { %v3051_v47 = vmul.f32 -1.442695, %v2406_v10 }
0x22b9   :  { %v3050_v43 = vmul.f32 -1.442695, %v2366_v58 }
0x22ba   :  { %3253 = vpow2.f32 %v3051_v47 }
0x22c0   :  { %v3254_v48 = vpop.eup %3253 }
0x22c1   :  { %v2410_v4 = vadd.f32 1.0, %v3254_v48 }
0x22c3   :  { %3255 = vrcp.f32 %v2410_v4  ;;  %v2422_v28 = vand.u32 2147483648, %v2410_v4  ;;  %vm2416_vm11 = vweird.f32 %v2410_v4  ;;  %v2420_v6 = vand.u32 2147483647, %v2410_v4 }
0x22c4   :  { %3257 = vpow2.f32 %v3050_v43 }
0x22c5   :  { %v2423_v44 = vor.u32 1.1754944e-38, %v2422_v28  ;;  %vm2421_vm13 = vcmp.eq.f32.partialorder %v2420_v6, 8.507059e+37 }
0x22c9   :  { %v3256_v49 = vpop.eup %3255 }
0x22ca   :  { %v2412_v18 = vmul.f32 %v3256_v49, %v2410_v4  ;;  %vm2417_vm3 = vweird.f32 %v3256_v49  ;;  %v3258_v50 = vpop.eup %3257 }
0x22cb   :  { %vm2418_vm12 = vmor %vm2416_vm11, %vm2417_vm3  ;;  %v2370_v11 = vadd.f32 1.0, %v3258_v50 }
0x22cc   :  { %v2413_v34 = vsub.f32 1.0, %v2412_v18 }
0x22cd   :  { %3259 = vrcp.f32 %v2370_v11  ;;  %v2382_v5 = vand.u32 2147483648, %v2370_v11  ;;  %vm2376_vm15 = vweird.f32 %v2370_v11  ;;  %v2380_v53 = vand.u32 2147483647, %v2370_v11 }
0x22ce   :  { %v2414_v30 = vmul.f32 %v3256_v49, %v2413_v34 }
0x22cf   :  { %v2383_v37 = vor.u32 1.1754944e-38, %v2382_v5  ;;  %vm2381_vm2 = vcmp.eq.f32.partialorder %v2380_v53, 8.507059e+37 }
0x22d0   :  { %v2415_v17 = vadd.f32 %v3256_v49, %v2414_v30 }
0x22d2   :  { %v2419_v54 = vsel %vm2418_vm12, %v3256_v49, %v2415_v17 }
0x22d3   :  { %v2424_v2 = vsel %vm2421_vm13, %v2423_v44, %v2419_v54  ;;  %v3260_v8 = vpop.eup %3259 }
0x22d4   :  { %v2372_v3 = vmul.f32 %v3260_v8, %v2370_v11  ;;  %vm2377_vm14 = vweird.f32 %v3260_v8  ;;  %v2437_v36 = vsub.f32 1.0, %v2424_v2  ;;  %v2443_v29 = vmul.f32 %v2424_v2, %v4670_v13 }
0x22d5   :  { %vm2378_vm0 = vmor %vm2376_vm15, %vm2377_vm14 }
0x22d6   :  { %v2373_v14 = vsub.f32 1.0, %v2372_v3 }
0x22d8   :  { %v2374_v16 = vmul.f32 %v3260_v8, %v2373_v14 }
0x22da   :  { %v2375_v24 = vadd.f32 %v3260_v8, %v2374_v16 }
0x22dc   :  { %v2379_v38 = vsel %vm2378_vm0, %v3260_v8, %v2375_v24 }
0x22dd   :  { %v2384_v52 = vsel %vm2381_vm2, %v2383_v37, %v2379_v38 }
0x22de   :  { %v2396_v57 = vsub.f32 1.0, %v2384_v52  ;;  %v2404_v20 = vmul.f32 %v2402_v22, %v2384_v52 }
0x2309   :  { %v2428_v12 = vpop.permute.xlu2 %2427 }
0x230a   :  { %v2430_v46 = vmul.f32 %v2428_v12, %v2424_v2 }
0x230c   :  { %2432 = vrot.lane.b32.xlu1 %v2430_v46, %s3379_s16 }
0x2329   :  { %v2387_v25 = vpop.permute.xlu1 %2386 }
0x232a   :  { %v2389_v33 = vmul.f32 %v2387_v25, %v2384_v52 }
0x232c   :  { %2391 = vrot.lane.b32.xlu0 %v2389_v33, %s3379_s16 }
0x237e   :  { %v2433_v35 = vpop.permute.xlu1 %2432 }
0x237f   :  { %v2435_v31 = vadd.f32 %v2433_v35, %v2360_v40 }
0x2381   :  { %3261 = vtanh.f32 %v2435_v31 }
0x2387   :  { %v3262_v15 = vpop.eup %3261 }
0x2388   :  { %2439 = vrot.lane.b32.xlu0 %v3262_v15, %s3380_s19 }
0x239e   :  { %v2392_v32 = vpop.permute.xlu0 %2391 }
0x239f   :  { %v2394_v41 = vadd.f32 %v2392_v32, %v4656_v60 }
0x23a1   :  { %3263 = vtanh.f32 %v2394_v41 }
0x23a7   :  { %v3264_v55 = vpop.eup %3263 }
0x23a8   :  { %2398 = vrot.lane.b32.xlu2 %v3264_v55, %s3380_s19 }
0x23fa   :  { %v2440_v56 = vpop.permute.xlu0 %2439 }
0x23fb   :  { %v2442_v51 = vmul.f32 %v2440_v56, %v2437_v36 }
0x23fd   :  { %v4719_v23 = vadd.f32 %v2443_v29, %v2442_v51 }
0x23ff   :  { %v2450_v45 = vrot.slane %v4719_v23, 6 }
0x2402   :  { %v2399_v59 = vpop.permute.xlu2 %2398 }
0x2403   :  { %v2401_v26 = vmul.f32 %v2399_v59, %v2396_v57 }
0x2405   :  { %v2405_v42 = vadd.f32 %v2404_v20, %v2401_v26 }
0x2407   :  { %2446 = vrot.lane.b32.xlu1 %v2405_v42, %s3380_s19  ;;  %v2557_v58 = vrot.slane %v2405_v42, 6 }
0x2479   :  { %v2447_v63 = vpop.permute.xlu1 %2446 }
0x247a   :  { %v2452_v0 = vsel %vm250_vm4, %v2447_v63, %v2450_v45 }
0x247b   :  { %v2453_v61 = vsel %vm346_vm5, %v2452_v0, 1.0 }
0x247c   :  { %v2455_v1 = vrot.slane %v2453_v61, 2 }
0x247e   :  { %3053 = vmatmul.msk.f32.vlgmr.msrb.gmra.mxu0 %vm375_vm6, %v2455_v1  ;;  %3055 = vmatmul.msk.f32.vlgmr.msrb.gmra.mxu2 %vm375_vm6, %v2455_v1 }
0x247f   :  { %3057 = vmatmul.msk.f32.vlgmr.msra.gmra.mxu1 %vm375_vm6, %v2455_v1 }
0x24fb   :  { %v2475_v62 = vpop.f32.mrf.mxu0 }
0x24fc   :  { %v2519_v27 = vrot.slane %v2475_v62, 4  ;;  %v2515_v17 = vpop.f32.mrf.mxu1 }
0x24fe   :  { %v2521_v13 = vadd.f32 %v2519_v27, %v4656_v60  ;;  %2541 = vrot.lane.b32.xlu2 %v2519_v27, %s3379_s16 }
0x2500   :  { %v3058_v21 = vmul.f32 -1.442695, %v2521_v13 }
0x2501   :  { %v2495_v7 = vpop.f32.mrf.mxu2 }
0x2502   :  { %3265 = vpow2.f32 %v3058_v21  ;;  %2582 = vrot.lane.b32.xlu0 %v2495_v7, %s3379_s16  ;;  %v2561_v28 = vadd.f32 %v2515_v17, %v2495_v7 }
0x2504   :  { %v3059_v6 = vmul.f32 -1.442695, %v2561_v28 }
0x2508   :  { %v3266_v9 = vpop.eup %3265 }
0x2509   :  { %v2525_v39 = vadd.f32 1.0, %v3266_v9 }
0x250b   :  { %3267 = vrcp.f32 %v2525_v39  ;;  %v2537_v47 = vand.u32 2147483648, %v2525_v39  ;;  %v2535_v4 = vand.u32 2147483647, %v2525_v39  ;;  %vm2531_vm1 = vweird.f32 %v2525_v39 }
0x250c   :  { %3269 = vpow2.f32 %v3059_v6 }
0x250d   :  { %v2538_v18 = vor.u32 1.1754944e-38, %v2537_v47  ;;  %vm2536_vm9 = vcmp.eq.f32.partialorder %v2535_v4, 8.507059e+37 }
0x2511   :  { %v3268_v19 = vpop.eup %3267 }
0x2512   :  { %v2527_v40 = vmul.f32 %v3268_v19, %v2525_v39  ;;  %vm2532_vm7 = vweird.f32 %v3268_v19  ;;  %v3270_v50 = vpop.eup %3269 }
0x2513   :  { %vm2533_vm8 = vmor %vm2531_vm1, %vm2532_vm7  ;;  %v2565_v54 = vadd.f32 1.0, %v3270_v50 }
0x2514   :  { %v2528_v10 = vsub.f32 1.0, %v2527_v40 }
0x2515   :  { %3271 = vrcp.f32 %v2565_v54  ;;  %v2577_v14 = vand.u32 2147483648, %v2565_v54  ;;  %vm2571_vm3 = vweird.f32 %v2565_v54  ;;  %v2575_v16 = vand.u32 2147483647, %v2565_v54 }
0x2516   :  { %v2529_v48 = vmul.f32 %v3268_v19, %v2528_v10 }
0x2517   :  { %v2578_v5 = vor.u32 1.1754944e-38, %v2577_v14  ;;  %vm2576_vm12 = vcmp.eq.f32.partialorder %v2575_v16, 8.507059e+37 }
0x2518   :  { %v2530_v49 = vadd.f32 %v3268_v19, %v2529_v48 }
0x251a   :  { %v2534_v34 = vsel %vm2533_vm8, %v3268_v19, %v2530_v49 }
0x251b   :  { %v2539_v43 = vsel %vm2536_vm9, %v2538_v18, %v2534_v34  ;;  %v3272_v12 = vpop.eup %3271 }
0x251c   :  { %v2559_v30 = vmul.f32 %v2557_v58, %v2539_v43  ;;  %v2567_v2 = vmul.f32 %v3272_v12, %v2565_v54  ;;  %vm2572_vm10 = vweird.f32 %v3272_v12  ;;  %v2551_v32 = vsub.f32 1.0, %v2539_v43 }
0x251d   :  { %vm2573_vm11 = vmor %vm2571_vm3, %vm2572_vm10  ;;  %vm2912_vm3 = vcmask 58368  }
0x251e   :  { %v2568_v46 = vsub.f32 1.0, %v2567_v2 }
0x2520   :  { %v2569_v8 = vmul.f32 %v3272_v12, %v2568_v46 }
0x2522   :  { %v2570_v3 = vadd.f32 %v3272_v12, %v2569_v8 }
0x2524   :  { %v2574_v24 = vsel %vm2573_vm11, %v3272_v12, %v2570_v3 }
0x2525   :  { %v2579_v38 = vsel %vm2576_vm12, %v2578_v5, %v2574_v24 }
0x2526   :  { %v2592_v59 = vsub.f32 1.0, %v2579_v38  ;;  %v2598_v20 = vmul.f32 %v2579_v38, %v4719_v23 }
0x2558   :  { %v2542_v44 = vpop.permute.xlu2 %2541 }
0x2559   :  { %v2544_v11 = vmul.f32 %v2542_v44, %v2539_v43 }
0x255b   :  { %2546 = vrot.lane.b32.xlu1 %v2544_v11, %s3379_s16 }
0x2574   :  { %v2583_v53 = vpop.permute.xlu0 %2582 }
0x2575   :  { %v2585_v37 = vmul.f32 %v2583_v53, %v2579_v38 }
0x2577   :  { %2587 = vrot.lane.b32.xlu2 %v2585_v37, %s3379_s16 }
0x25cd   :  { %v2547_v25 = vpop.permute.xlu1 %2546 }
0x25ce   :  { %v2549_v52 = vadd.f32 %v2547_v25, %v4656_v60 }
0x25d0   :  { %3273 = vtanh.f32 %v2549_v52 }
0x25d1   :  { %v2588_v33 = vpop.permute.xlu2 %2587 }
0x25d2   :  { %v2590_v35 = vadd.f32 %v2588_v33, %v2515_v17 }
0x25d4   :  { %3275 = vtanh.f32 %v2590_v35 }
0x25d6   :  { %v3274_v31 = vpop.eup %3273 }
0x25d7   :  { %2553 = vrot.lane.b32.xlu0 %v3274_v31, %s3380_s19 }
0x25da   :  { %v3276_v15 = vpop.eup %3275 }
0x25db   :  { %2594 = vrot.lane.b32.xlu1 %v3276_v15, %s3380_s19 }
0x2649   :  { %v2554_v41 = vpop.permute.xlu0 %2553 }
0x264a   :  { %v2556_v55 = vmul.f32 %v2554_v41, %v2551_v32 }
0x264c   :  { %v4735_v22 = vadd.f32 %v2559_v30, %v2556_v55 }
0x264d   :  { %v2595_v57 = vpop.permute.xlu1 %2594 }
0x264e   :  { %2601 = vrot.lane.b32.xlu2 %v4735_v22, %s3380_s19  ;;  %v2597_v26 = vmul.f32 %v2595_v57, %v2592_v59  ;;  %v2712_v37 = vrot.slane %v4735_v22, 6 }
0x2650   :  { %v4740_v42 = vadd.f32 %v2598_v20, %v2597_v26 }
0x2652   :  { %v2605_v56 = vrot.slane %v4740_v42, 4 }
0x26a8   :  { %v2602_v36 = vpop.permute.xlu2 %2601 }
0x26a9   :  { %v2607_v51 = vsel %vm250_vm4, %v2602_v36, %v2605_v56 }
0x26aa   :  { %v2608_v29 = vsel %vm346_vm5, %v2607_v51, 1.0 }
0x26ab   :  { %v2610_v45 = vrot.slane %v2608_v29, 4 }
0x26ad   :  { %3061 = vmatmul.msk.f32.vlgmr.msra.gmra.mxu3 %vm375_vm6, %v2610_v45  ;;  %3063 = vmatmul.msk.f32.vlgmr.msra.gmra.mxu0 %vm375_vm6, %v2610_v45 }
0x26ae   :  { %3065 = vmatmul.msk.f32.vlgmr.msra.gmra.mxu2 %vm375_vm6, %v2610_v45 }
0x272a   :  { %v2650_v63 = vpop.f32.mrf.mxu0 }
0x272b   :  { %2737 = vrot.lane.b32.xlu1 %v2650_v63, %s3379_s16 }
0x2730   :  { %v2630_v23 = vpop.f32.mrf.mxu3 }
0x2731   :  { %v2674_v0 = vrot.slane %v2630_v23, 2  ;;  %v2670_v61 = vpop.f32.mrf.mxu2 }
0x2732   :  { %v2716_v1 = vadd.f32 %v2670_v61, %v2650_v63 }
0x2733   :  { %2696 = vrot.lane.b32.xlu0 %v2674_v0, %s3379_s16  ;;  %v2676_v27 = vadd.f32 %v2674_v0, %v4656_v60 }
0x2734   :  { %v3067_v62 = vmul.f32 -1.442695, %v2716_v1 }
0x2735   :  { %v3066_v13 = vmul.f32 -1.442695, %v2676_v27 }
0x2736   :  { %3277 = vpow2.f32 %v3067_v62 }
0x2737   :  { %3279 = vpow2.f32 %v3066_v13 }
0x273c   :  { %v3278_v21 = vpop.eup %3277 }
0x273d   :  { %v2720_v7 = vadd.f32 1.0, %v3278_v21  ;;  %v3280_v9 = vpop.eup %3279 }
0x273e   :  { %v2680_v39 = vadd.f32 1.0, %v3280_v9 }
0x273f   :  { %3281 = vrcp.f32 %v2720_v7  ;;  %v2732_v58 = vand.u32 2147483648, %v2720_v7  ;;  %vm2726_vm14 = vweird.f32 %v2720_v7  ;;  %v2730_v34 = vand.u32 2147483647, %v2720_v7 }
0x2740   :  { %3283 = vrcp.f32 %v2680_v39  ;;  %v2692_v44 = vand.u32 2147483648, %v2680_v39  ;;  %vm2686_vm7 = vweird.f32 %v2680_v39  ;;  %v2690_v11 = vand.u32 2147483647, %v2680_v39 }
0x2741   :  { %v2733_v17 = vor.u32 1.1754944e-38, %v2732_v58  ;;  %vm2731_vm0 = vcmp.eq.f32.partialorder %v2730_v34, 8.507059e+37 }
0x2742   :  { %v2693_v2 = vor.u32 1.1754944e-38, %v2692_v44  ;;  %vm2691_vm8 = vcmp.eq.f32.partialorder %v2690_v11, 8.507059e+37  ;;  %v3101_v44 = vld [vmem:[%s4811_s9] ss:$0 sm:$0xff] }
0x2745   :  { %v3282_v19 = vpop.eup %3281 }
0x2746   :  { %v2722_v40 = vmul.f32 %v3282_v19, %v2720_v7  ;;  %v3284_v47 = vpop.eup %3283  ;;  %vm2727_vm13 = vweird.f32 %v3282_v19 }
0x2747   :  { %v2682_v4 = vmul.f32 %v3284_v47, %v2680_v39  ;;  %vm2728_vm15 = vmor %vm2726_vm14, %vm2727_vm13  ;;  %vm2687_vm2 = vweird.f32 %v3284_v47 }
0x2748   :  { %v2723_v10 = vsub.f32 1.0, %v2722_v40  ;;  %vm2688_vm1 = vmor %vm2686_vm7, %vm2687_vm2 }
0x2749   :  { %v2683_v18 = vsub.f32 1.0, %v2682_v4  ;;  %v2848_v4 = vld [vmem:[%s4810_s8 + $0x8] sm:$0xff] }
0x274a   :  { %v2724_v48 = vmul.f32 %v3282_v19, %v2723_v10 }
0x274b   :  { %v2684_v30 = vmul.f32 %v3284_v47, %v2683_v18 }
0x274c   :  { %v2725_v49 = vadd.f32 %v3282_v19, %v2724_v48  ;;  %v2849_v48 = vld [vmem:[%s4810_s8 + $0x10] sm:$0xff] }
0x274d   :  { %v2685_v54 = vadd.f32 %v3284_v47, %v2684_v30 }
0x274e   :  { %v2729_v43 = vsel %vm2728_vm15, %v3282_v19, %v2725_v49  ;;  %v2847_v49 = vld [vmem:[%s4810_s8] sm:$0xff] }
0x274f   :  { %v2734_v6 = vsel %vm2731_vm0, %v2733_v17, %v2729_v43  ;;  %v2689_v12 = vsel %vm2688_vm1, %v3284_v47, %v2685_v54  ;;  %v2850_v47 = vld [vmem:[%s4810_s8 + $0x18] sm:$0xff]  ;;  %v2881_v54 = vld [vmem:[%s4812_s10] sm:$0xff] }
0x2750   :  { %v2694_v8 = vsel %vm2691_vm8, %v2693_v2, %v2689_v12  ;;  %v2747_v15 = vsub.f32 1.0, %v2734_v6  ;;  %v2753_v41 = vmul.f32 %v2734_v6, %v4740_v42  ;;  %2872 = vmatpush.msrb.mxu0 %v2850_v47  ;;  %v2884_v17 = vld [vmem:[%s4812_s10 + $0x18] sm:$0xff] }
0x2751   :  { %v2706_v25 = vsub.f32 1.0, %v2694_v8  ;;  %v2714_v35 = vmul.f32 %v2712_v37, %v2694_v8  ;;  %2904 = vmatpush.msrb.mxu2 %v2884_v17 }
0x2752   :  { %2873 = vmatpush.msrb.mxu0 %v2849_v48 }
0x2754   :  { %2874 = vmatpush.msrb.mxu0 %v2848_v4 }
0x2756   :  { %2875 = vmatpush.msrb.mxu0 %v2847_v49 }
0x279d   :  { %v2738_v28 = vpop.permute.xlu1 %2737 }
0x279e   :  { %v2740_v50 = vmul.f32 %v2738_v28, %v2734_v6  ;;  %v2883_v6 = vld [vmem:[%s4812_s10 + $0x10] sm:$0xff] }
0x279f   :  { %2905 = vmatpush.msrb.mxu2 %v2883_v6 }
0x27a0   :  { %2742 = vrot.lane.b32.xlu0 %v2740_v50, %s3379_s16  ;;  %v2882_v50 = vld [vmem:[%s4812_s10 + $0x8] sm:$0xff]  ;;  %s2921_s10 = sshll.u32 %s4814_s12, 4  ;;  %s2922_s10 = int_to_ptr.hbm [resolvable:$true] %s2921_s10 }
0x27a1   :  { %2906 = vmatpush.msrb.mxu2 %v2882_v50 }
0x27a3   :  { %2907 = vmatpush.msrb.mxu2 %v2881_v54 }
0x27a5   :  { %v2697_v46 = vpop.permute.xlu0 %2696 }
0x27a6   :  { %v2699_v3 = vmul.f32 %v2697_v46, %v2694_v8  ;;  %v3102_v46 = vld [vmem:[%s4813_s11] ss:$0 sm:$0xff] }
0x27a8   :  { %2701 = vrot.lane.b32.xlu2 %v2699_v3, %s3379_s16 }
0x2802   :  { %v2702_v14 = vpop.permute.xlu2 %2701 }
0x2803   :  { %v2704_v16 = vadd.f32 %v2702_v14, %v4656_v60 }
0x2805   :  { %3285 = vtanh.f32 %v2704_v16 }
0x280b   :  { %v3286_v24 = vpop.eup %3285 }
0x280c   :  { %2708 = vrot.lane.b32.xlu1 %v3286_v24, %s3380_s19 }
0x2812   :  { %v2743_v5 = vpop.permute.xlu0 %2742 }
0x2813   :  { %v2745_v53 = vadd.f32 %v2743_v5, %v2670_v61 }
0x2815   :  { %3287 = vtanh.f32 %v2745_v53 }
0x281b   :  { %v3288_v38 = vpop.eup %3287 }
0x281c   :  { %2749 = vrot.lane.b32.xlu2 %v3288_v38, %s3380_s19 }
0x2876   :  { %v2750_v60 = vpop.permute.xlu2 %2749 }
0x2877   :  { %v2752_v32 = vmul.f32 %v2750_v60, %v2747_v15 }
0x2879   :  { %v2754_v55 = vadd.f32 %v2753_v41, %v2752_v32 }
0x287b   :  { %v2760_v57 = vrot.slane %v2754_v55, 2 }
0x287e   :  { %v2709_v52 = vpop.permute.xlu1 %2708 }
0x287f   :  { %v2711_v33 = vmul.f32 %v2709_v52, %v2706_v25 }
0x2881   :  { %v2715_v31 = vadd.f32 %v2714_v35, %v2711_v33 }
0x2883   :  { %2756 = vrot.lane.b32.xlu0 %v2715_v31, %s3380_s19 }
0x28f5   :  { %v2757_v59 = vpop.permute.xlu0 %2756 }
0x28f6   :  { %v2762_v26 = vsel %vm250_vm4, %v2757_v59, %v2760_v57 }
0x28f7   :  { %v2763_v20 = vsel %vm346_vm5, %v2762_v26, 1.0 }
0x28f8   :  { %v2765_v22 = vrot.slane %v2763_v20, 6 }
0x28fa   :  { %3069 = vmatmul.msk.f32.vlgmr.msrb.gmra.mxu1 %vm375_vm6, %v2765_v22  ;;  %3071 = vmatmul.msk.f32.vlgmr.msrb.gmra.mxu3 %vm375_vm6, %v2765_v22 }
0x2977   :  { %v2785_v56 = vpop.f32.mrf.mxu1 }
0x2978   :  { %2829 = vrot.lane.b32.xlu1 %v2785_v56, %s3379_s16 }
0x297d   :  { %v2805_v36 = vpop.f32.mrf.mxu3 }
0x297e   :  { %v2808_v51 = vadd.f32 %v2805_v36, %v2785_v56 }
0x2980   :  { %v3072_v29 = vmul.f32 -1.442695, %v2808_v51 }
0x2982   :  { %3289 = vpow2.f32 %v3072_v29 }
0x2988   :  { %v3290_v42 = vpop.eup %3289 }
0x2989   :  { %v2812_v45 = vadd.f32 1.0, %v3290_v42 }
0x298b   :  { %3291 = vrcp.f32 %v2812_v45  ;;  %v2824_v62 = vand.u32 2147483648, %v2812_v45  ;;  %vm2818_vm9 = vweird.f32 %v2812_v45  ;;  %v2822_v27 = vand.u32 2147483647, %v2812_v45 }
0x298d   :  { %v2825_v21 = vor.u32 1.1754944e-38, %v2824_v62  ;;  %vm2823_vm10 = vcmp.eq.f32.partialorder %v2822_v27, 8.507059e+37 }
0x2991   :  { %v3292_v63 = vpop.eup %3291 }
0x2992   :  { %v2814_v23 = vmul.f32 %v3292_v63, %v2812_v45  ;;  %vm2819_vm5 = vweird.f32 %v3292_v63 }
0x2993   :  { %vm2820_vm6 = vmor %vm2818_vm9, %vm2819_vm5 }
0x2994   :  { %v2815_v0 = vsub.f32 1.0, %v2814_v23 }
0x2996   :  { %v2816_v61 = vmul.f32 %v3292_v63, %v2815_v0 }
0x2998   :  { %v2817_v1 = vadd.f32 %v3292_v63, %v2816_v61 }
0x299a   :  { %v2821_v13 = vsel %vm2820_vm6, %v3292_v63, %v2817_v1 }
0x299b   :  { %v2826_v9 = vsel %vm2823_vm10, %v2825_v21, %v2821_v13 }
0x299c   :  { %v2839_v18 = vsub.f32 1.0, %v2826_v9  ;;  %v2845_v34 = vmul.f32 %v2826_v9, %v2754_v55 }
0x29ea   :  { %v2830_v7 = vpop.permute.xlu1 %2829 }
0x29eb   :  { %v2832_v39 = vmul.f32 %v2830_v7, %v2826_v9 }
0x29ed   :  { %2834 = vrot.lane.b32.xlu2 %v2832_v39, %s3379_s16 }
0x2a47   :  { %v2835_v19 = vpop.permute.xlu2 %2834 }
0x2a48   :  { %v2837_v40 = vadd.f32 %v2835_v19, %v2805_v36 }
0x2a4a   :  { %3293 = vtanh.f32 %v2837_v40 }
0x2a50   :  { %v3294_v10 = vpop.eup %3293 }
0x2a51   :  { %2841 = vrot.lane.b32.xlu0 %v3294_v10, %s3380_s19 }
0x2ac3   :  { %v2842_v58 = vpop.permute.xlu0 %2841 }
0x2ac4   :  { %v2844_v43 = vmul.f32 %v2842_v58, %v2839_v18 }
0x2ac6   :  { %v2846_v30 = vadd.f32 %v2845_v34, %v2844_v43 }
0x2ac8   :  { %2856 = vrot.lane.b32.xlu1 %v2846_v30, %s3380_s19 }
0x2b3a   :  { %v2857_v28 = vpop.permute.xlu1 %2856 }
0x2b3b   :  { %3073 = vmatmul.msk.f32.vlgmr.msrb.gmra.mxu0 %vm250_vm4, %v2857_v28 }
0x2bb8   :  { %v2877_v11 = vpop.f32.mrf.mxu0 }
0x2bb9   :  { %v2878_v12 = vadd.f32 %v3101_v44, %v2877_v11 }
0x2bbb   :  { %v2880_v2 = vmax.f32 %v2878_v12, 0.0 }
0x2bbd   :  { %3074 = vmatmul.msk.f32.vlgmr.msrb.gmra.mxu2 %vm250_vm4, %v2880_v2 }
0x2c40   :  { %v2909_v8 = vpop.f32.mrf.mxu2 }
0x2c41   :  { %v2910_v3 = vadd.f32 %v3102_v46, %v2909_v8 }
0x2c43   :  { %2913 = vst.msk [vmem:[#allocation2] sm:$0x3] %vm2912_vm3, %v2910_v3 }
0x2c44   :  { %2924 = dma.vmem_to_hbm [thread:$0]  %s2920_s29, 32, %s2922_s10, [#allocation3]  }
0x2c45   :  { %3374 = dma.done.wait [#allocation3], 32  }
0x2c46   :  { %3375 = vsyncadd [#allocation3], 4294967264 }
0x2c47   :  { %2929 = vsyncpa [#allocation3], 1 }

</bundles_post_ra>
